<compile_context>
chip_gen: v5e
topology: v5e:2x2
jax: 0.10.0
libtpu: 0.0.40
codegen_flags: <defaults>
</compile_context>

<pallas_src>
import jax
import jax.numpy as jnp
from jax import lax
from jax.experimental import pallas as pl
from jax.experimental.pallas import tpu as pltpu


def _round_up(x, m):
    return (x + m - 1) // m * m


# ------------------------- fused dual-conv kernel --------------------------- #
def _make_fused_kernel(*, k, pad, pool_a, up_b, has_b,
                       a_hw, ci_a, b_hw, ci_b, out_hw, cop):
    """out = conv(pool2(a) if pool_a else a, wA) [+ up2?(conv(b, wB))].

    Refs (all NHWC, one batch element per grid step):
      a_ref : (1, Ha + 2*pa, Wa + 2*pa, ci_a), pa = 2*pad if pool_a else pad
              (zero-padding by 2*pad then 2x2 avg-pooling == pad(pool(a), pad))
      b_ref : (1, Hb + 2*pad, Wb + 2*pad, ci_b)          [only if has_b]
      w*_ref: (k*k*ci, cop) bf16, CO zero-padded to `cop` (lane-dense)
      o_ref : (1, OH, OW, cop)
      im2col_*: VMEM scratch (oh*ow, k*k*ci) bf16
    """
    OH, OW = out_hw
    Ha, Wa = a_hw
    if has_b:
        Hb, Wb = b_hw
        OHb, OWb = Hb + 2 * pad - k + 1, Wb + 2 * pad - k + 1

    def conv_path(get_patch, im2col, oh, ow, ci, w):
        # Fold the k*k taps into the contraction dim: build the im2col matrix
        # once in VMEM, then one lane-dense MXU matmul
        #   (oh*ow, k*k*ci) @ (k*k*ci, cop)
        # instead of k*k tiny (., ci)@(ci, .) matmuls.
        for kh in range(k):
            for kw in range(k):
                col = (kh * k + kw) * ci
                im2col[:, col:col + ci] = get_patch(kh, kw).reshape(oh * ow, ci)
        return jnp.dot(im2col[...], w, preferred_element_type=jnp.float32)

    def kernel(*refs):
        if has_b:
            a_ref, b_ref, wa_ref, wb_ref, o_ref, im2col_a, im2col_b = refs
        else:
            a_ref, wa_ref, o_ref, im2col_a = refs

        # ---- path A: optional fused 2x2 avg-pool (f32 accum), then 3x3 conv --
        if pool_a:
            hpp, wpp = Ha // 2 + 2 * pad, Wa // 2 + 2 * pad
            x5 = a_ref[0].astype(jnp.float32).reshape(hpp, 2, wpp, 2, ci_a)
            pooled = ((x5[:, 0, :, 0, :] + x5[:, 0, :, 1, :]) +
                      (x5[:, 1, :, 0, :] + x5[:, 1, :, 1, :])) * 0.25
            xa = pooled.astype(jnp.bfloat16)                  # (hpp, wpp, ci_a)
            get_a = lambda kh, kw: xa[kh:kh + OH, kw:kw + OW, :]
        else:
            get_a = lambda kh, kw: a_ref[0, kh:kh + OH, kw:kw + OW, :]
        out = conv_path(get_a, im2col_a, OH, OW, ci_a,
                        wa_ref[...]).reshape(OH, OW, cop)     # f32

        # ---- path B: 3x3 conv, optional fused nearest 2x upsample + add ------
        if has_b:
            get_b = lambda kh, kw: b_ref[0, kh:kh + OHb, kw:kw + OWb, :]
            accb = conv_path(get_b, im2col_b, OHb, OWb, ci_b,
                             wb_ref[...]).reshape(OHb, OWb, cop)
            if up_b:
                accb = jnp.repeat(jnp.repeat(accb, 2, axis=0), 2, axis=1)
            out = out + accb

        o_ref[0] = out.astype(o_ref.dtype)                    # lane-dense store

    return kernel


def _fused_dual_conv(a, b, wa_packed, wb_packed, *, k, pad, pool_a, up_b, cop,
                     out_dtype):
    """One pallas_call computing conv(pool2?(a), wA) (+ up2?(conv(b, wB))), NHWC.

    a, b: bf16 NHWC activations (b may be None); w*_packed: bf16 (k*k*ci, cop)
    pre-packed weights (CO zero-padded to `cop`). Returns (N, OH, OW, cop) in
    out_dtype; the caller slices the real CO channels.
    """
    has_b = b is not None
    N, Ha, Wa, ci_a = a.shape
    pa = 2 * pad if pool_a else pad
    a_p = jnp.pad(a, ((0, 0), (pa, pa), (pa, pa), (0, 0)))
    ha_eff, wa_eff = (Ha // 2, Wa // 2) if pool_a else (Ha, Wa)
    OH, OW = ha_eff + 2 * pad - k + 1, wa_eff + 2 * pad - k + 1

    in_specs = [pl.BlockSpec((1, Ha + 2 * pa, Wa + 2 * pa, ci_a),
                             lambda n: (n, 0, 0, 0))]
    args = [a_p]
    scratch_shapes = [pltpu.VMEM((OH * OW, k * k * ci_a), jnp.bfloat16)]
    b_hw, ci_b = (0, 0), 0
    if has_b:
        _, Hb, Wb, ci_b = b.shape
        b_hw = (Hb, Wb)
        OHb, OWb = Hb + 2 * pad - k + 1, Wb + 2 * pad - k + 1
        scale = 2 if up_b else 1
        # TODO(synk): general bilinear resize for mismatched octave sizes.
        assert OH == scale * OHb and OW == scale * OWb, "octave branch sizes must match"
        b_p = jnp.pad(b, ((0, 0), (pad, pad), (pad, pad), (0, 0)))
        in_specs.append(pl.BlockSpec((1, Hb + 2 * pad, Wb + 2 * pad, ci_b),
                                     lambda n: (n, 0, 0, 0)))
        args.append(b_p)
        scratch_shapes.append(pltpu.VMEM((OHb * OWb, k * k * ci_b), jnp.bfloat16))
    in_specs.append(pl.BlockSpec(wa_packed.shape, lambda n: (0, 0)))
    args.append(wa_packed)
    if has_b:
        in_specs.append(pl.BlockSpec(wb_packed.shape, lambda n: (0, 0)))
        args.append(wb_packed)

    kernel = _make_fused_kernel(k=k, pad=pad, pool_a=pool_a, up_b=up_b,
                                has_b=has_b, a_hw=(Ha, Wa), ci_a=ci_a,
                                b_hw=b_hw, ci_b=ci_b, out_hw=(OH, OW), cop=cop)

    return pl.pallas_call(
        kernel,
        out_shape=jax.ShapeDtypeStruct((N, OH, OW, cop), out_dtype),
        grid=(N,),
        in_specs=in_specs,
        out_specs=pl.BlockSpec((1, OH, OW, cop), lambda n: (n, 0, 0, 0)),
        scratch_shapes=scratch_shapes,
        compiler_params=pltpu.CompilerParams(
            dimension_semantics=("parallel",),   # batch sharded over v7x's 2 TCs
            vmem_limit_bytes=32 * 1024 * 1024),
    )(*args)


# ------------------------------ wrapper glue -------------------------------- #
def _pack_weight(w_hwio, cop):
    """(KH, KW, CI, CO) f32 -> (KH*KW*CI, cop) bf16, CO zero-padded to `cop`."""
    KH, KW, CI, CO = w_hwio.shape
    w = w_hwio.reshape(KH * KW * CI, CO)
    return jnp.pad(w, ((0, 0), (0, cop - CO))).astype(jnp.bfloat16)


def _pool2_bf16(t_bf):
    """2x2 avg-pool, NHWC, bf16 in/out with f32 accumulation (XLA glue; only
    used on the stride=2 path — stride=1 pooling is fused inside the kernel)."""
    N, H, W, C = t_bf.shape
    t = t_bf.astype(jnp.float32).reshape(N, H // 2, 2, W // 2, 2, C)
    return (((t[:, :, 0, :, 0, :] + t[:, :, 0, :, 1, :]) +
             (t[:, :, 1, :, 0, :] + t[:, :, 1, :, 1, :])) * 0.25).astype(jnp.bfloat16)


# ---------------------------- OctaveConv forward ---------------------------- #
def octave_conv_forward(x, params, *, alpha_out=0.5, stride=1, padding=1):
    """Mirrors OctaveConv.forward ((x_h, x_l) tuple or single tensor, NCHW)."""
    assert stride in (1, 2), "Stride should be 1 or 2."
    x_h_nchw, x_l_nchw = x if isinstance(x, tuple) else (x, None)
    to_nhwc = lambda t: jnp.transpose(t, (0, 2, 3, 1))
    to_nchw = lambda t: jnp.transpose(t, (0, 3, 1, 2))
    out_dtype = x_h_nchw.dtype

    k = params["w_h2h"].shape[0]
    co_h = params["w_h2h"].shape[-1]
    co_l = params["w_h2l"].shape[-1]
    cop_h = _round_up(co_h, 128)
    cop_l = _round_up(max(co_l, 1), 128)

    # one-time weight packing to the lane-dense (k*k*CI, CO_pad) layout (glue)
    w_h2h = _pack_weight(params["w_h2h"], cop_h)
    w_h2l = _pack_weight(params["w_h2l"], cop_l) if alpha_out > 0 else None

    # bf16 activations into the MXU; accumulation inside the kernels is f32
    x_h = to_nhwc(x_h_nchw).astype(jnp.bfloat16)

    if x_l_nchw is None:
        # single-tensor input: PyTorch returns (x_h2h, x_h2l)
        a = _pool2_bf16(x_h) if stride == 2 else x_h
        x_h2h = _fused_dual_conv(a, None, w_h2h, None, k=k, pad=padding,
                                 pool_a=False, up_b=False, cop=cop_h,
                                 out_dtype=out_dtype)
        x_h2l = None
        if alpha_out > 0:
            x_h2l = _fused_dual_conv(a, None, w_h2l, None, k=k, pad=padding,
                                     pool_a=True, up_b=False, cop=cop_l,
                                     out_dtype=out_dtype)
        return (to_nchw(x_h2h[..., :co_h]),
                to_nchw(x_h2l[..., :co_l]) if x_h2l is not None else None)

    w_l2h = _pack_weight(params["w_l2h"], cop_h)
    w_l2l = _pack_weight(params["w_l2l"], cop_l) if alpha_out > 0 else None
    x_l = to_nhwc(x_l_nchw).astype(jnp.bfloat16)

    if stride == 1:
        # out_h = conv(x_h, w_h2h) + up2(conv(x_l, w_l2h))           (1 kernel)
        out_h = _fused_dual_conv(x_h, x_l, w_h2h, w_l2h, k=k, pad=padding,
                                 pool_a=False, up_b=True, cop=cop_h,
                                 out_dtype=out_dtype)
        # out_l = conv(pool2(x_h), w_h2l) + conv(x_l, w_l2l)         (1 kernel)
        out_l = None
        if alpha_out > 0:
            out_l = _fused_dual_conv(x_h, x_l, w_h2l, w_l2l, k=k, pad=padding,
                                     pool_a=True, up_b=False, cop=cop_l,
                                     out_dtype=out_dtype)
    else:  # stride == 2
        # out_h = conv(pool2(x_h), w_h2h) + conv(x_l, w_l2h)         (1 kernel)
        out_h = _fused_dual_conv(x_h, x_l, w_h2h, w_l2h, k=k, pad=padding,
                                 pool_a=True, up_b=False, cop=cop_h,
                                 out_dtype=out_dtype)
        # out_l = conv(pool2(pool2(x_h)), w_h2l) + conv(pool2(x_l), w_l2l)
        out_l = None
        if alpha_out > 0:
            out_l = _fused_dual_conv(_pool2_bf16(x_h), _pool2_bf16(x_l),
                                     w_h2l, w_l2l, k=k, pad=padding,
                                     pool_a=True, up_b=False, cop=cop_l,
                                     out_dtype=out_dtype)

    out_h = to_nchw(out_h[..., :co_h])
    out_l = to_nchw(out_l[..., :co_l]) if out_l is not None else None
    return out_h, out_l


# ----------------------- deterministic parameter init ----------------------- #
def init_params(key, in_channels, out_channels, alpha_in, alpha_out, k):
    ci_l = int(alpha_in * in_channels)
    ci_h = in_channels - ci_l
    co_l = int(alpha_out * out_channels)
    co_h = out_channels - co_l
    ks = jax.random.split(key, 4)

    def w(k_, co, ci):
        w_oihw = jax.random.normal(k_, (co, ci, k, k), jnp.float32) * 0.1  # OIHW
        return jnp.transpose(w_oihw, (2, 3, 1, 0))                         # -> HWIO

    return dict(w_h2h=w(ks[0], co_h, ci_h), w_h2l=w(ks[1], co_l, ci_h),
                w_l2h=w(ks[2], co_h, ci_l), w_l2l=w(ks[3], co_l, ci_l))


# ----------------------------- pure-JAX reference --------------------------- #
def octave_ref(x, params, *, stride=1, padding=1):
    """Reference transcription of OctaveConv.forward (tuple input), mirroring
    the kernel's numerics (bf16 conv operands, f32 accumulation, f32 pooling)."""
    bf = jnp.bfloat16
    x_h, x_l = x
    to_nhwc = lambda t: jnp.transpose(t, (0, 2, 3, 1))
    to_nchw = lambda t: jnp.transpose(t, (0, 3, 1, 2))
    xh = to_nhwc(x_h).astype(bf)
    xl = to_nhwc(x_l).astype(bf)

    def conv(t_bf, w_hwio):
        return lax.conv_general_dilated(
            t_bf, w_hwio.astype(bf), (1, 1), [(padding, padding)] * 2,
            dimension_numbers=("NHWC", "HWIO", "NHWC"),
            preferred_element_type=jnp.float32)

    up = lambda t: jnp.repeat(jnp.repeat(t, 2, axis=1), 2, axis=2)

    if stride == 2:
        xh = _pool2_bf16(xh)
    x_h2h = conv(xh, params["w_h2h"])
    x_h2l = conv(_pool2_bf16(xh), params["w_h2l"])
    x_l2h = conv(xl, params["w_l2h"])
    if stride == 1:
        x_l2h = up(x_l2h)
    x_l2l = conv(_pool2_bf16(xl) if stride == 2 else xl, params["w_l2l"])
    out_h = x_l2h + x_h2h          # bilinear resize of x_h2h is identity here
    out_l = x_h2l + x_l2l
    return to_nchw(out_h), to_nchw(out_l)


if __name__ == "__main__":
    in_channels, out_channels, ksize = 8, 8, 3
    alpha_in = alpha_out = 0.5
    padding = 1
    N, H, W = 2, 16, 16
    ci_l = int(alpha_in * in_channels)
    ci_h = in_channels - ci_l
    co_l = int(alpha_out * out_channels)
    co_h = out_channels - co_l

    key = jax.random.PRNGKey(0)
    k_xh, k_xl, k_w = jax.random.split(key, 3)
    x_h = jax.random.normal(k_xh, (N, ci_h, H, W), jnp.float32)            # NCHW
    x_l = jax.random.normal(k_xl, (N, ci_l, H // 2, W // 2), jnp.float32)  # NCHW
    params = init_params(k_w, in_channels, out_channels, alpha_in, alpha_out, ksize)

    for stride in (1, 2):
        out_h, out_l = octave_conv_forward((x_h, x_l), params, alpha_out=alpha_out,
                                           stride=stride, padding=padding)
        out_h = jax.block_until_ready(out_h)
        out_l = jax.block_until_ready(out_l)
        assert out_h.shape == (N, co_h, H // stride, W // stride)
        assert out_l.shape == (N, co_l, H // (2 * stride), W // (2 * stride))

        ref_h, ref_l = octave_ref((x_h, x_l), params, stride=stride, padding=padding)
        # tolerance reflects bf16 operands (f32 accumulation) on both sides
        assert jnp.allclose(out_h, ref_h, atol=1e-2, rtol=1e-2), (
            f"stride={stride} high branch max err "
            f"{jnp.max(jnp.abs(out_h - ref_h))}")
        assert jnp.allclose(out_l, ref_l, atol=1e-2, rtol=1e-2), (
            f"stride={stride} low branch max err "
            f"{jnp.max(jnp.abs(out_l - ref_l))}")

    print("KERNEL_OK")
</pallas_src>

<mosaic_0001>
module attributes {stable_mosaic.version = 11 : i64} {
  func.func @kernel(%arg0: i32, %arg1: memref<1x18x18x4xbf16, #tpu.memory_space<vmem>>, %arg2: memref<1x10x10x4xbf16, #tpu.memory_space<vmem>>, %arg3: memref<36x128xbf16, #tpu.memory_space<vmem>>, %arg4: memref<36x128xbf16, #tpu.memory_space<vmem>>, %arg5: memref<1x16x16x128xf32, #tpu.memory_space<vmem>>, %arg6: memref<256x36xbf16, #tpu.memory_space<vmem>>, %arg7: memref<64x36xbf16, #tpu.memory_space<vmem>>) attributes {dimension_semantics = [#tpu.dimension_semantics<parallel>], iteration_bounds = array<i64: 2>, scalar_prefetch = 0 : i64, scratch_operands = 2 : i64, tpu.core_type = #tpu.core_type<tc>, window_params = [{transform_indices = @transform_0, window_bounds = array<i64: 1, 18, 18, 4>}, {transform_indices = @transform_1, window_bounds = array<i64: 1, 10, 10, 4>}, {pipeline_mode = #tpu.pipeline_mode<synchronous>, transform_indices = @transform_2, window_bounds = array<i64: 36, 128>}, {pipeline_mode = #tpu.pipeline_mode<synchronous>, transform_indices = @transform_3, window_bounds = array<i64: 36, 128>}, {transform_indices = @transform_4, window_bounds = array<i64: 1, 16, 16, 128>}]} {
    %c0 = arith.constant 0 : index
    %c0_0 = arith.constant 0 : index
    %0 = vector.load %arg3[%c0, %c0_0] : memref<36x128xbf16, #tpu.memory_space<vmem>>, vector<36x128xbf16>
    %c0_1 = arith.constant 0 : index
    %c0_2 = arith.constant 0 : index
    %c0_3 = arith.constant 0 : index
    %c0_4 = arith.constant 0 : index
    %1 = vector.load %arg1[%c0_1, %c0_2, %c0_3, %c0_4] : memref<1x18x18x4xbf16, #tpu.memory_space<vmem>>, vector<1x16x16x4xbf16>
    %2 = vector.shape_cast %1 : vector<1x16x16x4xbf16> to vector<16x16x4xbf16>
    %3 = vector.shape_cast %2 : vector<16x16x4xbf16> to vector<256x4xbf16>
    %c0_5 = arith.constant 0 : index
    %c0_6 = arith.constant 0 : index
    %4 = vector.load %arg6[%c0_5, %c0_6] : memref<256x36xbf16, #tpu.memory_space<vmem>>, vector<256x4xbf16>
    tpu.vector_store %arg6[%c0_5, %c0_6], %3 {strides = array<i32>} : memref<256x36xbf16, #tpu.memory_space<vmem>>, vector<256x4xbf16>,
    %c0_7 = arith.constant 0 : index
    %c0_8 = arith.constant 0 : index
    %c1 = arith.constant 1 : index
    %c0_9 = arith.constant 0 : index
    %5 = vector.load %arg1[%c0_7, %c0_8, %c1, %c0_9] : memref<1x18x18x4xbf16, #tpu.memory_space<vmem>>, vector<1x16x16x4xbf16>
    %6 = vector.shape_cast %5 : vector<1x16x16x4xbf16> to vector<16x16x4xbf16>
    %7 = vector.shape_cast %6 : vector<16x16x4xbf16> to vector<256x4xbf16>
    %c0_10 = arith.constant 0 : index
    %c4 = arith.constant 4 : index
    %8 = vector.load %arg6[%c0_10, %c4] : memref<256x36xbf16, #tpu.memory_space<vmem>>, vector<256x4xbf16>
    tpu.vector_store %arg6[%c0_10, %c4], %7 {strides = array<i32>} : memref<256x36xbf16, #tpu.memory_space<vmem>>, vector<256x4xbf16>,
    %c0_11 = arith.constant 0 : index
    %c0_12 = arith.constant 0 : index
    %c2 = arith.constant 2 : index
    %c0_13 = arith.constant 0 : index
    %9 = vector.load %arg1[%c0_11, %c0_12, %c2, %c0_13] : memref<1x18x18x4xbf16, #tpu.memory_space<vmem>>, vector<1x16x16x4xbf16>
    %10 = vector.shape_cast %9 : vector<1x16x16x4xbf16> to vector<16x16x4xbf16>
    %11 = vector.shape_cast %10 : vector<16x16x4xbf16> to vector<256x4xbf16>
    %c0_14 = arith.constant 0 : index
    %c8 = arith.constant 8 : index
    %12 = vector.load %arg6[%c0_14, %c8] : memref<256x36xbf16, #tpu.memory_space<vmem>>, vector<256x4xbf16>
    tpu.vector_store %arg6[%c0_14, %c8], %11 {strides = array<i32>} : memref<256x36xbf16, #tpu.memory_space<vmem>>, vector<256x4xbf16>,
    %c0_15 = arith.constant 0 : index
    %c1_16 = arith.constant 1 : index
    %c0_17 = arith.constant 0 : index
    %c0_18 = arith.constant 0 : index
    %13 = vector.load %arg1[%c0_15, %c1_16, %c0_17, %c0_18] : memref<1x18x18x4xbf16, #tpu.memory_space<vmem>>, vector<1x16x16x4xbf16>
    %14 = vector.shape_cast %13 : vector<1x16x16x4xbf16> to vector<16x16x4xbf16>
    %15 = vector.shape_cast %14 : vector<16x16x4xbf16> to vector<256x4xbf16>
    %c0_19 = arith.constant 0 : index
    %c12 = arith.constant 12 : index
    %16 = vector.load %arg6[%c0_19, %c12] : memref<256x36xbf16, #tpu.memory_space<vmem>>, vector<256x4xbf16>
    tpu.vector_store %arg6[%c0_19, %c12], %15 {strides = array<i32>} : memref<256x36xbf16, #tpu.memory_space<vmem>>, vector<256x4xbf16>,
    %c0_20 = arith.constant 0 : index
    %c1_21 = arith.constant 1 : index
    %c1_22 = arith.constant 1 : index
    %c0_23 = arith.constant 0 : index
    %17 = vector.load %arg1[%c0_20, %c1_21, %c1_22, %c0_23] : memref<1x18x18x4xbf16, #tpu.memory_space<vmem>>, vector<1x16x16x4xbf16>
    %18 = vector.shape_cast %17 : vector<1x16x16x4xbf16> to vector<16x16x4xbf16>
    %19 = vector.shape_cast %18 : vector<16x16x4xbf16> to vector<256x4xbf16>
    %c0_24 = arith.constant 0 : index
    %c16 = arith.constant 16 : index
    %20 = vector.load %arg6[%c0_24, %c16] : memref<256x36xbf16, #tpu.memory_space<vmem>>, vector<256x4xbf16>
    tpu.vector_store %arg6[%c0_24, %c16], %19 {strides = array<i32>} : memref<256x36xbf16, #tpu.memory_space<vmem>>, vector<256x4xbf16>,
    %c0_25 = arith.constant 0 : index
    %c1_26 = arith.constant 1 : index
    %c2_27 = arith.constant 2 : index
    %c0_28 = arith.constant 0 : index
    %21 = vector.load %arg1[%c0_25, %c1_26, %c2_27, %c0_28] : memref<1x18x18x4xbf16, #tpu.memory_space<vmem>>, vector<1x16x16x4xbf16>
    %22 = vector.shape_cast %21 : vector<1x16x16x4xbf16> to vector<16x16x4xbf16>
    %23 = vector.shape_cast %22 : vector<16x16x4xbf16> to vector<256x4xbf16>
    %c0_29 = arith.constant 0 : index
    %c20 = arith.constant 20 : index
    %24 = vector.load %arg6[%c0_29, %c20] : memref<256x36xbf16, #tpu.memory_space<vmem>>, vector<256x4xbf16>
    tpu.vector_store %arg6[%c0_29, %c20], %23 {strides = array<i32>} : memref<256x36xbf16, #tpu.memory_space<vmem>>, vector<256x4xbf16>,
    %c0_30 = arith.constant 0 : index
    %c2_31 = arith.constant 2 : index
    %c0_32 = arith.constant 0 : index
    %c0_33 = arith.constant 0 : index
    %25 = vector.load %arg1[%c0_30, %c2_31, %c0_32, %c0_33] : memref<1x18x18x4xbf16, #tpu.memory_space<vmem>>, vector<1x16x16x4xbf16>
    %26 = vector.shape_cast %25 : vector<1x16x16x4xbf16> to vector<16x16x4xbf16>
    %27 = vector.shape_cast %26 : vector<16x16x4xbf16> to vector<256x4xbf16>
    %c0_34 = arith.constant 0 : index
    %c24 = arith.constant 24 : index
    %28 = vector.load %arg6[%c0_34, %c24] : memref<256x36xbf16, #tpu.memory_space<vmem>>, vector<256x4xbf16>
    tpu.vector_store %arg6[%c0_34, %c24], %27 {strides = array<i32>} : memref<256x36xbf16, #tpu.memory_space<vmem>>, vector<256x4xbf16>,
    %c0_35 = arith.constant 0 : index
    %c2_36 = arith.constant 2 : index
    %c1_37 = arith.constant 1 : index
    %c0_38 = arith.constant 0 : index
    %29 = vector.load %arg1[%c0_35, %c2_36, %c1_37, %c0_38] : memref<1x18x18x4xbf16, #tpu.memory_space<vmem>>, vector<1x16x16x4xbf16>
    %30 = vector.shape_cast %29 : vector<1x16x16x4xbf16> to vector<16x16x4xbf16>
    %31 = vector.shape_cast %30 : vector<16x16x4xbf16> to vector<256x4xbf16>
    %c0_39 = arith.constant 0 : index
    %c28 = arith.constant 28 : index
    %32 = vector.load %arg6[%c0_39, %c28] : memref<256x36xbf16, #tpu.memory_space<vmem>>, vector<256x4xbf16>
    tpu.vector_store %arg6[%c0_39, %c28], %31 {strides = array<i32>} : memref<256x36xbf16, #tpu.memory_space<vmem>>, vector<256x4xbf16>,
    %c0_40 = arith.constant 0 : index
    %c2_41 = arith.constant 2 : index
    %c2_42 = arith.constant 2 : index
    %c0_43 = arith.constant 0 : index
    %33 = vector.load %arg1[%c0_40, %c2_41, %c2_42, %c0_43] : memref<1x18x18x4xbf16, #tpu.memory_space<vmem>>, vector<1x16x16x4xbf16>
    %34 = vector.shape_cast %33 : vector<1x16x16x4xbf16> to vector<16x16x4xbf16>
    %35 = vector.shape_cast %34 : vector<16x16x4xbf16> to vector<256x4xbf16>
    %c0_44 = arith.constant 0 : index
    %c32 = arith.constant 32 : index
    %36 = vector.load %arg6[%c0_44, %c32] : memref<256x36xbf16, #tpu.memory_space<vmem>>, vector<256x4xbf16>
    tpu.vector_store %arg6[%c0_44, %c32], %35 {strides = array<i32>} : memref<256x36xbf16, #tpu.memory_space<vmem>>, vector<256x4xbf16>,
    %c0_45 = arith.constant 0 : index
    %c0_46 = arith.constant 0 : index
    %37 = vector.load %arg6[%c0_45, %c0_46] : memref<256x36xbf16, #tpu.memory_space<vmem>>, vector<256x36xbf16>
    %cst = arith.constant dense<0.000000e+00> : vector<256x128xf32>
    %38 = tpu.matmul %37, %0, %cst {dimension_numbers = #tpu.dot_dimension_numbers<[1], [0], [0], [1], [0, 0, 1, 1], [], []>} : vector<256x36xbf16>, vector<36x128xbf16>, vector<256x128xf32> -> vector<256x128xf32>
    %39 = vector.shape_cast %38 : vector<256x128xf32> to vector<16x16x128xf32>
    %c0_47 = arith.constant 0 : index
    %c0_48 = arith.constant 0 : index
    %40 = vector.load %arg4[%c0_47, %c0_48] : memref<36x128xbf16, #tpu.memory_space<vmem>>, vector<36x128xbf16>
    %c0_49 = arith.constant 0 : index
    %c0_50 = arith.constant 0 : index
    %c0_51 = arith.constant 0 : index
    %c0_52 = arith.constant 0 : index
    %41 = vector.load %arg2[%c0_49, %c0_50, %c0_51, %c0_52] : memref<1x10x10x4xbf16, #tpu.memory_space<vmem>>, vector<1x8x8x4xbf16>
    %42 = vector.shape_cast %41 : vector<1x8x8x4xbf16> to vector<8x8x4xbf16>
    %43 = vector.shape_cast %42 : vector<8x8x4xbf16> to vector<64x4xbf16>
    %c0_53 = arith.constant 0 : index
    %c0_54 = arith.constant 0 : index
    %44 = vector.load %arg7[%c0_53, %c0_54] : memref<64x36xbf16, #tpu.memory_space<vmem>>, vector<64x4xbf16>
    tpu.vector_store %arg7[%c0_53, %c0_54], %43 {strides = array<i32>} : memref<64x36xbf16, #tpu.memory_space<vmem>>, vector<64x4xbf16>,
    %c0_55 = arith.constant 0 : index
    %c0_56 = arith.constant 0 : index
    %c1_57 = arith.constant 1 : index
    %c0_58 = arith.constant 0 : index
    %45 = vector.load %arg2[%c0_55, %c0_56, %c1_57, %c0_58] : memref<1x10x10x4xbf16, #tpu.memory_space<vmem>>, vector<1x8x8x4xbf16>
    %46 = vector.shape_cast %45 : vector<1x8x8x4xbf16> to vector<8x8x4xbf16>
    %47 = vector.shape_cast %46 : vector<8x8x4xbf16> to vector<64x4xbf16>
    %c0_59 = arith.constant 0 : index
    %c4_60 = arith.constant 4 : index
    %48 = vector.load %arg7[%c0_59, %c4_60] : memref<64x36xbf16, #tpu.memory_space<vmem>>, vector<64x4xbf16>
    tpu.vector_store %arg7[%c0_59, %c4_60], %47 {strides = array<i32>} : memref<64x36xbf16, #tpu.memory_space<vmem>>, vector<64x4xbf16>,
    %c0_61 = arith.constant 0 : index
    %c0_62 = arith.constant 0 : index
    %c2_63 = arith.constant 2 : index
    %c0_64 = arith.constant 0 : index
    %49 = vector.load %arg2[%c0_61, %c0_62, %c2_63, %c0_64] : memref<1x10x10x4xbf16, #tpu.memory_space<vmem>>, vector<1x8x8x4xbf16>
    %50 = vector.shape_cast %49 : vector<1x8x8x4xbf16> to vector<8x8x4xbf16>
    %51 = vector.shape_cast %50 : vector<8x8x4xbf16> to vector<64x4xbf16>
    %c0_65 = arith.constant 0 : index
    %c8_66 = arith.constant 8 : index
    %52 = vector.load %arg7[%c0_65, %c8_66] : memref<64x36xbf16, #tpu.memory_space<vmem>>, vector<64x4xbf16>
    tpu.vector_store %arg7[%c0_65, %c8_66], %51 {strides = array<i32>} : memref<64x36xbf16, #tpu.memory_space<vmem>>, vector<64x4xbf16>,
    %c0_67 = arith.constant 0 : index
    %c1_68 = arith.constant 1 : index
    %c0_69 = arith.constant 0 : index
    %c0_70 = arith.constant 0 : index
    %53 = vector.load %arg2[%c0_67, %c1_68, %c0_69, %c0_70] : memref<1x10x10x4xbf16, #tpu.memory_space<vmem>>, vector<1x8x8x4xbf16>
    %54 = vector.shape_cast %53 : vector<1x8x8x4xbf16> to vector<8x8x4xbf16>
    %55 = vector.shape_cast %54 : vector<8x8x4xbf16> to vector<64x4xbf16>
    %c0_71 = arith.constant 0 : index
    %c12_72 = arith.constant 12 : index
    %56 = vector.load %arg7[%c0_71, %c12_72] : memref<64x36xbf16, #tpu.memory_space<vmem>>, vector<64x4xbf16>
    tpu.vector_store %arg7[%c0_71, %c12_72], %55 {strides = array<i32>} : memref<64x36xbf16, #tpu.memory_space<vmem>>, vector<64x4xbf16>,
    %c0_73 = arith.constant 0 : index
    %c1_74 = arith.constant 1 : index
    %c1_75 = arith.constant 1 : index
    %c0_76 = arith.constant 0 : index
    %57 = vector.load %arg2[%c0_73, %c1_74, %c1_75, %c0_76] : memref<1x10x10x4xbf16, #tpu.memory_space<vmem>>, vector<1x8x8x4xbf16>
    %58 = vector.shape_cast %57 : vector<1x8x8x4xbf16> to vector<8x8x4xbf16>
    %59 = vector.shape_cast %58 : vector<8x8x4xbf16> to vector<64x4xbf16>
    %c0_77 = arith.constant 0 : index
    %c16_78 = arith.constant 16 : index
    %60 = vector.load %arg7[%c0_77, %c16_78] : memref<64x36xbf16, #tpu.memory_space<vmem>>, vector<64x4xbf16>
    tpu.vector_store %arg7[%c0_77, %c16_78], %59 {strides = array<i32>} : memref<64x36xbf16, #tpu.memory_space<vmem>>, vector<64x4xbf16>,
    %c0_79 = arith.constant 0 : index
    %c1_80 = arith.constant 1 : index
    %c2_81 = arith.constant 2 : index
    %c0_82 = arith.constant 0 : index
    %61 = vector.load %arg2[%c0_79, %c1_80, %c2_81, %c0_82] : memref<1x10x10x4xbf16, #tpu.memory_space<vmem>>, vector<1x8x8x4xbf16>
    %62 = vector.shape_cast %61 : vector<1x8x8x4xbf16> to vector<8x8x4xbf16>
    %63 = vector.shape_cast %62 : vector<8x8x4xbf16> to vector<64x4xbf16>
    %c0_83 = arith.constant 0 : index
    %c20_84 = arith.constant 20 : index
    %64 = vector.load %arg7[%c0_83, %c20_84] : memref<64x36xbf16, #tpu.memory_space<vmem>>, vector<64x4xbf16>
    tpu.vector_store %arg7[%c0_83, %c20_84], %63 {strides = array<i32>} : memref<64x36xbf16, #tpu.memory_space<vmem>>, vector<64x4xbf16>,
    %c0_85 = arith.constant 0 : index
    %c2_86 = arith.constant 2 : index
    %c0_87 = arith.constant 0 : index
    %c0_88 = arith.constant 0 : index
    %65 = vector.load %arg2[%c0_85, %c2_86, %c0_87, %c0_88] : memref<1x10x10x4xbf16, #tpu.memory_space<vmem>>, vector<1x8x8x4xbf16>
    %66 = vector.shape_cast %65 : vector<1x8x8x4xbf16> to vector<8x8x4xbf16>
    %67 = vector.shape_cast %66 : vector<8x8x4xbf16> to vector<64x4xbf16>
    %c0_89 = arith.constant 0 : index
    %c24_90 = arith.constant 24 : index
    %68 = vector.load %arg7[%c0_89, %c24_90] : memref<64x36xbf16, #tpu.memory_space<vmem>>, vector<64x4xbf16>
    tpu.vector_store %arg7[%c0_89, %c24_90], %67 {strides = array<i32>} : memref<64x36xbf16, #tpu.memory_space<vmem>>, vector<64x4xbf16>,
    %c0_91 = arith.constant 0 : index
    %c2_92 = arith.constant 2 : index
    %c1_93 = arith.constant 1 : index
    %c0_94 = arith.constant 0 : index
    %69 = vector.load %arg2[%c0_91, %c2_92, %c1_93, %c0_94] : memref<1x10x10x4xbf16, #tpu.memory_space<vmem>>, vector<1x8x8x4xbf16>
    %70 = vector.shape_cast %69 : vector<1x8x8x4xbf16> to vector<8x8x4xbf16>
    %71 = vector.shape_cast %70 : vector<8x8x4xbf16> to vector<64x4xbf16>
    %c0_95 = arith.constant 0 : index
    %c28_96 = arith.constant 28 : index
    %72 = vector.load %arg7[%c0_95, %c28_96] : memref<64x36xbf16, #tpu.memory_space<vmem>>, vector<64x4xbf16>
    tpu.vector_store %arg7[%c0_95, %c28_96], %71 {strides = array<i32>} : memref<64x36xbf16, #tpu.memory_space<vmem>>, vector<64x4xbf16>,
    %c0_97 = arith.constant 0 : index
    %c2_98 = arith.constant 2 : index
    %c2_99 = arith.constant 2 : index
    %c0_100 = arith.constant 0 : index
    %73 = vector.load %arg2[%c0_97, %c2_98, %c2_99, %c0_100] : memref<1x10x10x4xbf16, #tpu.memory_space<vmem>>, vector<1x8x8x4xbf16>
    %74 = vector.shape_cast %73 : vector<1x8x8x4xbf16> to vector<8x8x4xbf16>
    %75 = vector.shape_cast %74 : vector<8x8x4xbf16> to vector<64x4xbf16>
    %c0_101 = arith.constant 0 : index
    %c32_102 = arith.constant 32 : index
    %76 = vector.load %arg7[%c0_101, %c32_102] : memref<64x36xbf16, #tpu.memory_space<vmem>>, vector<64x4xbf16>
    tpu.vector_store %arg7[%c0_101, %c32_102], %75 {strides = array<i32>} : memref<64x36xbf16, #tpu.memory_space<vmem>>, vector<64x4xbf16>,
    %c0_103 = arith.constant 0 : index
    %c0_104 = arith.constant 0 : index
    %77 = vector.load %arg7[%c0_103, %c0_104] : memref<64x36xbf16, #tpu.memory_space<vmem>>, vector<64x36xbf16>
    %cst_105 = arith.constant dense<0.000000e+00> : vector<64x128xf32>
    %78 = tpu.matmul %77, %40, %cst_105 {dimension_numbers = #tpu.dot_dimension_numbers<[1], [0], [0], [1], [0, 0, 1, 1], [], []>} : vector<64x36xbf16>, vector<36x128xbf16>, vector<64x128xf32> -> vector<64x128xf32>
    %79 = vector.shape_cast %78 : vector<64x128xf32> to vector<8x8x128xf32>
    %80 = vector.shape_cast %79 : vector<8x8x128xf32> to vector<8x1x8x128xf32>
    %81 = vector.broadcast %80 : vector<8x1x8x128xf32> to vector<8x2x8x128xf32>
    %82 = vector.shape_cast %81 : vector<8x2x8x128xf32> to vector<16x8x128xf32>
    %83 = vector.shape_cast %82 : vector<16x8x128xf32> to vector<16x8x1x128xf32>
    %84 = vector.broadcast %83 : vector<16x8x1x128xf32> to vector<16x8x2x128xf32>
    %85 = vector.shape_cast %84 : vector<16x8x2x128xf32> to vector<16x16x128xf32>
    %86 = arith.addf %39, %85 : vector<16x16x128xf32>
    %c0_106 = arith.constant 0 : index
    %c0_107 = arith.constant 0 : index
    %c0_108 = arith.constant 0 : index
    %c0_109 = arith.constant 0 : index
    %87 = vector.load %arg5[%c0_106, %c0_107, %c0_108, %c0_109] : memref<1x16x16x128xf32, #tpu.memory_space<vmem>>, vector<1x16x16x128xf32>
    %88 = vector.shape_cast %87 : vector<1x16x16x128xf32> to vector<16x16x128xf32>
    %89 = vector.shape_cast %86 : vector<16x16x128xf32> to vector<1x16x16x128xf32>
    tpu.vector_store %arg5[%c0_106, %c0_107, %c0_108, %c0_109], %89 {strides = array<i32>} : memref<1x16x16x128xf32, #tpu.memory_space<vmem>>, vector<1x16x16x128xf32>,
    return
  }
  func.func @transform_0(%arg0: i32) -> (i32, i32, i32, i32) {
    %c0_i32 = arith.constant 0 : i32
    %c0_i32_0 = arith.constant 0 : i32
    %c0_i32_1 = arith.constant 0 : i32
    %c0_i32_2 = arith.constant 0 : i32
    return %arg0, %c0_i32, %c0_i32_0, %c0_i32_1 : i32, i32, i32, i32
  }
  func.func @transform_1(%arg0: i32) -> (i32, i32, i32, i32) {
    %c0_i32 = arith.constant 0 : i32
    %c0_i32_0 = arith.constant 0 : i32
    %c0_i32_1 = arith.constant 0 : i32
    %c0_i32_2 = arith.constant 0 : i32
    return %arg0, %c0_i32, %c0_i32_0, %c0_i32_1 : i32, i32, i32, i32
  }
  func.func @transform_2(%arg0: i32) -> (i32, i32) {
    %c0_i32 = arith.constant 0 : i32
    %c0_i32_0 = arith.constant 0 : i32
    %c0_i32_1 = arith.constant 0 : i32
    return %c0_i32, %c0_i32_0 : i32, i32
  }
  func.func @transform_3(%arg0: i32) -> (i32, i32) {
    %c0_i32 = arith.constant 0 : i32
    %c0_i32_0 = arith.constant 0 : i32
    %c0_i32_1 = arith.constant 0 : i32
    return %c0_i32, %c0_i32_0 : i32, i32
  }
  func.func @transform_4(%arg0: i32) -> (i32, i32, i32, i32) {
    %c0_i32 = arith.constant 0 : i32
    %c0_i32_0 = arith.constant 0 : i32
    %c0_i32_1 = arith.constant 0 : i32
    %c0_i32_2 = arith.constant 0 : i32
    return %arg0, %c0_i32, %c0_i32_0, %c0_i32_1 : i32, i32, i32, i32
  }
}

</mosaic_0001>

<bundles_post_ra>
// kernel: tpu_custom_call.1
= control target key start
LH: loop header
LB: loop body
LE: loop exit
PB: predicated region body
PF: predicated region fallthrough
CT: control target
= control target key end

     0   :  { %9 = vsyncpa [#allocation5], 0  ;;  %s7821_s0 = inlined_call_operand.vmem [shape: bf16[2,18,18,4], index: 0, kind: input, shape index: {}]   ;;  %s7822_s1 = inlined_call_operand.vmem [shape: bf16[2,10,10,4], index: 1, kind: input, shape index: {}]   ;;  %s7823_s2 = inlined_call_operand.vmem [shape: bf16[36,128], index: 2, kind: input, shape index: {}]   ;;  %s7824_s3 = inlined_call_operand.vmem [shape: bf16[36,128], index: 3, kind: input, shape index: {}]   ;;  %s7825_s4 = inlined_call_operand.hbm [shape: f32[2,16,16,128], index: 4, kind: output, shape index: {}]  }
   0x1   :  { %11 = vsyncpa [#allocation5 + $0x1], 0  ;;  %s5818_s15 = smov 0   ;;  %s5820_s16 = smov 0  }
   0x2   :  { %s5822_s17 = smov 0   ;;  %s5824_s18 = smov 0  }
   0x3 LB: > { %s5839_s19 = sadd.s32 4294967295, %s5782_s18   ;;  %s5099_s20 = sadd.s32 4294967294, %s5782_s18   ;;  %s5782_s18 = sphi %s5824_s18, %s7835_s18   ;;  %s5778_s17 = sphi %s5822_s17, %s7834_s17   ;;  %s5774_s16 = sphi %s5820_s16, %s7833_s16   ;;  %s5770_s15 = sphi %s5818_s15, %s7832_s15  }
   0x4   : > { %s5843_s21 = sadd.s32 1, %s5782_s18   ;;  %s118_s22 = sadd.s32 1, %s5778_s17 }
   0x5   : > { %s115_s23 = ssub.s32 %s5782_s18, %s5843_s21  ;;  %p128_p0 = scmp.ne.s32.totalorder %s5778_s17, %s5774_s16 }
   0x6   : > { %p116_p1 = scmp.eq.s32.totalorder %s115_s23, 0  ;;  %p129_p2 = scmp.eq.s32.totalorder %s5839_s19, 1 }
   0x7   : > { %p134_p3 = scmp.ne.s32.totalorder %s5774_s16, %s5770_s15  ;;  %p135_p4 = scmp.eq.s32.totalorder %s5099_s20, 1 }
   0x8   : > { %s5854_s24 = scalar_select %p116_p1, %s5778_s17, %s118_s22  }
   0x9   : > { %p5856_p5 = por %p129_p2, %p128_p0  ;;  %p5860_p6 = por %p135_p4, %p134_p3 }
   0xa   : > { %p5102_p7 = scmp.ge.s32.totalorder %s5782_s18, 1  ;;  %p175_p8 = scmp.lt.s32.totalorder %s5782_s18, 3 }
   0xc   : > { %p176_p9 = pnand %p5102_p7, %p175_p8 }
   0xd   : > { %p206_p10 = scmp.lt.s32.totalorder (!%p176_p9), %s5839_s19, 1  ;;  %s5784_s6 = smov (!%p176_p9), 4  }
   0xe   : > { %179 = sbr.rel (%p176_p9) target bundleno = 1160 (0x488), region = 36  ;;  %s5785_s7 = smov (!%p176_p9), 8  }
   0xf   : > { %s5786_s8 = smov (!%p176_p9), 12   ;;  %s5787_s9 = smov (!%p176_p9), 16  }
  0x10   : > { %s5788_s10 = smov (!%p176_p9), 20   ;;  %s5789_s11 = smov (!%p176_p9), 24  }
  0x11   : > { %s5790_s12 = smov (!%p176_p9), 28   ;;  %s5791_s23 = smov (!%p176_p9), 32  }
  0x12   : > { %s5740_s29 = scalar_lea.hbm (!%p176_p9), %s7825_s4, 512 }
  0x13   : > { %s5868_s27 = scalar_select %p206_p10, %s5839_s19, 1  ;;  %vm335_vm0 = vsmask.f32 3328  ;;  %vm336_vm1 = vsmask.f32 7440  ;;  %vm947_vm3 = vcmask 1042432  }
  0x14   : > { %vm5885_vm2 = vmor %vm335_vm0, %vm336_vm1  ;;  %vm948_vm4 = vcmask 1046532   ;;  %vm254_vm5 = vcmask 27648   ;;  %vm818_vm7 = vcmask 60448   ;;  %vm1158_vm8 = vcmask 93248  }
  0x15   : > { %s5669_s28 = smul.u32 216, %s5868_s27  ;;  %vm6060_vm6 = vmor %vm947_vm3, %vm948_vm4  ;;  %vm1352_vm9 = vcmask 126048   ;;  %vm1913_vm10 = vcmask 158848   ;;  %vm2250_vm11 = vcmask 191648   ;;  %vm2444_vm12 = vcmask 224448  }
  0x16   : > { %s5670_s13 = smul.u32 80, %s5868_s27  ;;  %vm3005_vm13 = vcmask 257248   ;;  %vm3551_vm14 = vcmask 1041408   ;;  %vm3342_vm15 = vcmask 290048   ;;  %vm3502_vm0 = vcmask 293888  }
  0x17   : > { %s5874_s5 = scalar_lea.vmem %s7821_s0, %s5669_s28 }
  0x18   : > { %v290_v0 = vld [vmem:[%s5874_s5 + $0xc] sm:$0xf]  ;;  %v291_v1 = vld [vmem:[%s5874_s5 + $0x10] sm:$0xf]  ;;  %v287_v2 = vld [vmem:[%s5874_s5] sm:$0xf]  ;;  %s6993_s22 = scalar_lea.vmem %s7822_s1, %s5670_s13 }
  0x19   : > { %v363_v3 = vshrl.u32 %v290_v0, 16  ;;  %v366_v4 = vshll.u32 %v290_v0, 16  ;;  %v372_v5 = vshll.u32 %v291_v1, 16  ;;  %v376_v6 = vshrl.u32 %v291_v1, 16  ;;  %v288_v7 = vld [vmem:[%s5874_s5 + $0x4] sm:$0xf] }
  0x1a   : > { %v339_v8 = vshrl.u32 %v287_v2, 16  ;;  %v342_v9 = vshll.u32 %v287_v2, 16  ;;  %v348_v10 = vshll.u32 %v288_v7, 16  ;;  %v352_v11 = vshrl.u32 %v288_v7, 16  ;;  %v292_v12 = vld [vmem:[%s5874_s5 + $0x14] sm:$0x1] }
  0x1b   : > { %v365_v13 = vrot.slane %v363_v3, 4  ;;  %v368_v14 = vrot.slane %v366_v4, 5  ;;  %v374_v15 = vrot.slane %v372_v5, 5  ;;  %v378_v16 = vrot.slane %v376_v6, 4  ;;  %v289_v17 = vld [vmem:[%s5874_s5 + $0x8] sm:$0x1] }
  0x1c   : > { %v341_v18 = vrot.slane %v339_v8, 4  ;;  %v344_v19 = vrot.slane %v342_v9, 5  ;;  %v354_v20 = vrot.slane %v352_v11, 4  ;;  %v297_v21 = vld [vmem:[%s5874_s5 + $0x28] sm:$0xf]  ;;  %v382_v24 = vshll.u32 %v292_v12, 16 }
  0x1d   : > { %v369_v22 = vor.u32 %v368_v14, %v365_v13  ;;  %v379_v23 = vor.u32 %v378_v16, %v374_v15  ;;  %v350_v27 = vrot.slane %v348_v10, 5  ;;  %v420_v28 = vshll.u32 %v297_v21, 16  ;;  %v296_v30 = vld [vmem:[%s5874_s5 + $0x24] sm:$0xf]  ;;  %v293_v35 = vld [vmem:[%s5874_s5 + $0x18] sm:$0xf] }
  0x1e   : > { %v345_v26 = vor.u32 %v344_v19, %v341_v18  ;;  %v424_v29 = vshrl.u32 %v297_v21, 16  ;;  %v358_v32 = vshll.u32 %v289_v17, 16  ;;  %v384_v38 = vrot.slane %v382_v24, 5  ;;  %v294_v40 = vld [vmem:[%s5874_s5 + $0x1c] sm:$0xf] }
  0x1f   : > { %v370_v31 = vrot.slane %v369_v22, 4  ;;  %v355_v34 = vor.u32 %v354_v20, %v350_v27  ;;  %v380_v37 = vrot.slane %v379_v23, 4  ;;  %v411_v39 = vshrl.u32 %v296_v30, 16  ;;  %v298_v42 = vld [vmem:[%s5874_s5 + $0x2c] sm:$0x1] }
  0x20   : > { %v346_v33 = vrot.slane %v345_v26, 4  ;;  %v5898_v43 = vrot.slane %v420_v28, 5  ;;  %v426_v44 = vrot.slane %v424_v29, 4  ;;  %v414_v45 = vshll.u32 %v296_v30, 16  ;;  %v302_v50 = vld [vmem:[%s5874_s5 + $0x3c] sm:$0xf] }
  0x21   : > { %v375_v36 = vsel %vm5885_vm2, %v370_v31, %v374_v15  ;;  %v360_v46 = vrot.slane %v358_v32, 5  ;;  %v413_v47 = vrot.slane %v411_v39, 4  ;;  %v387_v48 = vshrl.u32 %v293_v35, 16  ;;  %v300_v58 = vld [vmem:[%s5874_s5 + $0x34] sm:$0xf] }
  0x22   : > { %726 = vrot.lane.b32.xlu1 %v375_v36, %s5784_s6  ;;  %v351_v41 = vsel %vm5885_vm2, %v346_v33, %v350_v27  ;;  %v390_v49 = vshll.u32 %v293_v35, 16  ;;  %v356_v51 = vrot.slane %v355_v34, 4  ;;  %v416_v52 = vrot.slane %v414_v45, 5  ;;  %v295_v6 = vld [vmem:[%s5874_s5 + $0x20] sm:$0x1] }
  0x23   : > { %722 = vrot.lane.b32.xlu0 %v351_v41, %s5784_s6  ;;  %v396_v53 = vshll.u32 %v294_v40, 16  ;;  %v400_v54 = vshrl.u32 %v294_v40, 16  ;;  %v430_v55 = vshll.u32 %v298_v42, 16  ;;  %v389_v56 = vrot.slane %v387_v48, 4  ;;  %v303_v15 = vld [vmem:[%s5874_s5 + $0x40] sm:$0xf] }
  0x24   : > { %v392_v57 = vrot.slane %v390_v49, 5  ;;  %v427_v59 = vor.u32 %v426_v44, %v5898_v43  ;;  %v459_v61 = vshrl.u32 %v302_v50, 16  ;;  %v462_v62 = vshll.u32 %v302_v50, 16  ;;  %v301_v16 = vld [vmem:[%s5874_s5 + $0x38] sm:$0x1] }
  0x25   : > { %v402_v60 = vrot.slane %v400_v54, 4  ;;  %v385_v63 = vsel %vm5885_vm2, %v380_v37, %v384_v38  ;;  %v417_v0 = vor.u32 %v416_v52, %v413_v47  ;;  %v398_v2 = vrot.slane %v396_v53, 5  ;;  %v306_v20 = vld [vmem:[%s5874_s5 + $0x4c] sm:$0xf]  ;;  %v299_v21 = vld [vmem:[%s5874_s5 + $0x30] sm:$0xf] }
  0x26   : > { %v393_v1 = vor.u32 %v392_v57, %v389_v56  ;;  %v361_v3 = vsel %vm5885_vm2, %v356_v51, %v360_v46  ;;  %v444_v4 = vshll.u32 %v300_v58, 16  ;;  %v448_v5 = vshrl.u32 %v300_v58, 16  ;;  %v305_v24 = vld [vmem:[%s5874_s5 + $0x48] sm:$0xf]  ;;  %v311_v47 = vld [vmem:[%s5874_s5 + $0x60] sm:$0xf] }
  0x27   : > { %v432_v7 = vrot.slane %v430_v55, 5  ;;  %v428_v9 = vrot.slane %v427_v59, 4  ;;  %v461_v10 = vrot.slane %v459_v61, 4  ;;  %v464_v11 = vrot.slane %v462_v62, 5  ;;  %v307_v49 = vld [vmem:[%s5874_s5 + $0x50] sm:$0x1] }
  0x28   : > { %v394_v8 = vrot.slane %v393_v1, 4  ;;  %v403_v12 = vor.u32 %v402_v60, %v398_v2  ;;  %v418_v13 = vrot.slane %v417_v0, 4  ;;  %v406_v17 = vshll.u32 %v295_v6, 16  ;;  %v309_v53 = vld [vmem:[%s5874_s5 + $0x58] sm:$0xf] }
  0x29   : > { %v5916_v18 = vrot.slane %v444_v4, 5  ;;  %v450_v19 = vrot.slane %v448_v5, 4  ;;  %v433_v26 = vsel %vm5885_vm2, %v428_v9, %v432_v7  ;;  %v465_v27 = vor.u32 %v464_v11, %v461_v10  ;;  %v304_v58 = vld [vmem:[%s5874_s5 + $0x44] sm:$0x1]  ;;  %v315_v11 = vld [vmem:[%s5874_s5 + $0x70] sm:$0xf] }
  0x2a   : > { %728 = vrot.lane.b32.xlu1 %v385_v63, %s5784_s6  ;;  %v399_v14 = vsel %vm5885_vm2, %v394_v8, %v398_v2  ;;  %v404_v22 = vrot.slane %v403_v12, 4  ;;  %v408_v23 = vrot.slane %v406_v17, 5  ;;  %v468_v28 = vshll.u32 %v303_v15, 16  ;;  %v308_v2 = vld [vmem:[%s5874_s5 + $0x54] sm:$0xf] }
  0x2b   : > { %724 = vrot.lane.b32.xlu0 %v361_v3, %s5784_s6  ;;  %730 = vrot.lane.b32.xlu2 %v399_v14, %s5784_s6  ;;  %v454_v29 = vshll.u32 %v301_v16, 16  ;;  %v423_v30 = vsel %vm5885_vm2, %v418_v13, %v5898_v43  ;;  %v492_v31 = vshll.u32 %v306_v20, 16  ;;  %v496_v32 = vshrl.u32 %v306_v20, 16  ;;  %v312_v6 = vld [vmem:[%s5874_s5 + $0x64] sm:$0xf] }
  0x2c   : > { %v435_v33 = vshrl.u32 %v299_v21, 16  ;;  %v451_v34 = vor.u32 %v450_v19, %v5916_v18  ;;  %v483_v35 = vshrl.u32 %v305_v24, 16  ;;  %v486_v36 = vshll.u32 %v305_v24, 16  ;;  %v314_v20 = vld [vmem:[%s5874_s5 + $0x6c] sm:$0xf] }
  0x2d   : > { %v438_v37 = vshll.u32 %v299_v21, 16  ;;  %v472_v38 = vshrl.u32 %v303_v15, 16  ;;  %v409_v39 = vsel %vm5885_vm2, %v404_v22, %v408_v23  ;;  %v470_v41 = vrot.slane %v468_v28, 5  ;;  %v310_v15 = vld [vmem:[%s5874_s5 + $0x5c] sm:$0x1] }
  0x2e   : > { %v437_v40 = vrot.slane %v435_v33, 4  ;;  %v466_v43 = vrot.slane %v465_v27, 4  ;;  %v456_v44 = vrot.slane %v454_v29, 5  ;;  %v5931_v45 = vrot.slane %v492_v31, 5 }
  0x2f   : > { %v440_v42 = vrot.slane %v438_v37, 5  ;;  %v498_v46 = vrot.slane %v496_v32, 4  ;;  %v452_v48 = vrot.slane %v451_v34, 4  ;;  %v485_v50 = vrot.slane %v483_v35, 4 }
  0x30   : > { %v488_v51 = vrot.slane %v486_v36, 5  ;;  %v474_v54 = vrot.slane %v472_v38, 4  ;;  %v531_v56 = vshrl.u32 %v311_v47, 16  ;;  %v534_v57 = vshll.u32 %v311_v47, 16  ;;  %v318_v47 = vld [vmem:[%s5874_s5 + $0x7c] sm:$0xf] }
  0x31   : > { %v441_v52 = vor.u32 %v440_v42, %v437_v40  ;;  %v471_v59 = vsel %vm5885_vm2, %v466_v43, %v470_v41  ;;  %v499_v60 = vor.u32 %v498_v46, %v5931_v45  ;;  %v502_v61 = vshll.u32 %v307_v49, 16  ;;  %v320_v42 = vld [vmem:[%s5874_s5 + $0x84] sm:$0xf]  ;;  %v313_v49 = vld [vmem:[%s5874_s5 + $0x68] sm:$0x1] }
  0x32   : > { %736 = vrot.lane.b32.xlu1 %v433_v26, %s5784_s6  ;;  %v457_v62 = vsel %vm5885_vm2, %v452_v48, %v456_v44  ;;  %v489_v63 = vor.u32 %v488_v51, %v485_v50  ;;  %v516_v0 = vshll.u32 %v309_v53, 16  ;;  %v520_v1 = vshrl.u32 %v309_v53, 16 }
  0x33   : > { %734 = vrot.lane.b32.xlu0 %v423_v30, %s5784_s6  ;;  %732 = vrot.lane.b32.xlu2 %v409_v39, %s5784_s6  ;;  %v442_v55 = vrot.slane %v441_v52, 4  ;;  %v475_v4 = vor.u32 %v474_v54, %v470_v41  ;;  %v478_v5 = vshll.u32 %v304_v58, 16  ;;  %v533_v7 = vrot.slane %v531_v56, 4  ;;  %v316_v41 = vld [vmem:[%s5874_s5 + $0x74] sm:$0x1] }
  0x34   : > { %v536_v8 = vrot.slane %v534_v57, 5  ;;  %v500_v9 = vrot.slane %v499_v60, 4  ;;  %v504_v10 = vrot.slane %v502_v61, 5  ;;  %v507_v12 = vshrl.u32 %v308_v2, 16  ;;  %v317_v54 = vld [vmem:[%s5874_s5 + $0x78] sm:$0xf] }
  0x35   : > { %v447_v3 = vsel %vm5885_vm2, %v442_v55, %v5916_v18  ;;  %v510_v13 = vshll.u32 %v308_v2, 16  ;;  %v490_v14 = vrot.slane %v489_v63, 4  ;;  %v5953_v16 = vrot.slane %v516_v0, 5 }
  0x36   : > { %v522_v17 = vrot.slane %v520_v1, 4  ;;  %v476_v18 = vrot.slane %v475_v4, 4  ;;  %v480_v19 = vrot.slane %v478_v5, 5  ;;  %v509_v21 = vrot.slane %v507_v12, 4  ;;  %v321_v4 = vld [vmem:[%s5874_s5 + $0x88] sm:$0xf] }
  0x37   : > { %v512_v22 = vrot.slane %v510_v13, 5  ;;  %v537_v23 = vor.u32 %v536_v8, %v533_v7  ;;  %v540_v24 = vshll.u32 %v312_v6, 16  ;;  %v564_v26 = vshll.u32 %v315_v11, 16 }
  0x38   : > { %v568_v27 = vshrl.u32 %v315_v11, 16  ;;  %v505_v28 = vsel %vm5885_vm2, %v500_v9, %v504_v10  ;;  %v526_v29 = vshll.u32 %v310_v15, 16  ;;  %v495_v30 = vsel %vm5885_vm2, %v490_v14, %v5931_v45  ;;  %v324_v9 = vld [vmem:[%s5874_s5 + $0x94] sm:$0xf]  ;;  %v319_v11 = vld [vmem:[%s5874_s5 + $0x80] sm:$0x1] }
  0x39   : > { %v523_v31 = vor.u32 %v522_v17, %v5953_v16  ;;  %v555_v32 = vshrl.u32 %v314_v20, 16  ;;  %v558_v33 = vshll.u32 %v314_v20, 16  ;;  %v544_v34 = vshrl.u32 %v312_v6, 16  ;;  %v323_v14 = vld [vmem:[%s5874_s5 + $0x90] sm:$0xf] }
  0x3a   : > { %742 = vrot.lane.b32.xlu1 %v471_v59, %s5784_s6  ;;  %v481_v35 = vsel %vm5885_vm2, %v476_v18, %v480_v19  ;;  %v513_v36 = vor.u32 %v512_v22, %v509_v21  ;;  %v538_v37 = vrot.slane %v537_v23, 4  ;;  %v542_v38 = vrot.slane %v540_v24, 5 }
  0x3b   : > { %740 = vrot.lane.b32.xlu0 %v457_v62, %s5784_s6  ;;  %738 = vrot.lane.b32.xlu2 %v447_v3, %s5784_s6  ;;  %v5965_v39 = vrot.slane %v564_v26, 5  ;;  %v570_v40 = vrot.slane %v568_v27, 4  ;;  %v524_v43 = vrot.slane %v523_v31, 4  ;;  %v528_v44 = vrot.slane %v526_v29, 5 }
  0x3c   : > { %v557_v45 = vrot.slane %v555_v32, 4  ;;  %v560_v46 = vrot.slane %v558_v33, 5  ;;  %v514_v48 = vrot.slane %v513_v36, 4  ;;  %v546_v50 = vrot.slane %v544_v34, 4 }
  0x3d   : > { %v543_v51 = vsel %vm5885_vm2, %v538_v37, %v542_v38  ;;  %v571_v52 = vor.u32 %v570_v40, %v5965_v39  ;;  %v574_v53 = vshll.u32 %v316_v41, 16  ;;  %v603_v55 = vshrl.u32 %v320_v42, 16  ;;  %v325_v37 = vld [vmem:[%s5874_s5 + $0x98] sm:$0x1]  ;;  %v329_v40 = vld [vmem:[%s5874_s5 + $0xa8] sm:$0xf] }
  0x3e   : > { %v606_v56 = vshll.u32 %v320_v42, 16  ;;  %v588_v57 = vshll.u32 %v318_v47, 16  ;;  %v592_v58 = vshrl.u32 %v318_v47, 16  ;;  %v529_v59 = vsel %vm5885_vm2, %v524_v43, %v528_v44  ;;  %v327_v42 = vld [vmem:[%s5874_s5 + $0xa0] sm:$0xf] }
  0x3f   : > { %v561_v60 = vor.u32 %v560_v46, %v557_v45  ;;  %v550_v61 = vshll.u32 %v313_v49, 16  ;;  %v519_v62 = vsel %vm5885_vm2, %v514_v48, %v5953_v16  ;;  %v547_v63 = vor.u32 %v546_v50, %v542_v38  ;;  %v322_v43 = vld [vmem:[%s5874_s5 + $0x8c] sm:$0x1]  ;;  %v326_v47 = vld [vmem:[%s5874_s5 + $0x9c] sm:$0xf] }
  0x40   : > { %v579_v0 = vshrl.u32 %v317_v54, 16  ;;  %v582_v1 = vshll.u32 %v317_v54, 16  ;;  %v572_v2 = vrot.slane %v571_v52, 4  ;;  %v576_v3 = vrot.slane %v574_v53, 5 }
  0x41   : > { %v605_v5 = vrot.slane %v603_v55, 4  ;;  %v608_v6 = vrot.slane %v606_v56, 5  ;;  %v5985_v7 = vrot.slane %v588_v57, 5  ;;  %v594_v8 = vrot.slane %v592_v58, 4 }
  0x42   : > { %748 = vrot.lane.b32.xlu1 %v505_v28, %s5784_s6  ;;  %v562_v10 = vrot.slane %v561_v60, 4  ;;  %v548_v12 = vrot.slane %v547_v63, 4  ;;  %v552_v13 = vrot.slane %v550_v61, 5  ;;  %v581_v15 = vrot.slane %v579_v0, 4 }
  0x43   : > { %746 = vrot.lane.b32.xlu0 %v495_v30, %s5784_s6  ;;  %744 = vrot.lane.b32.xlu2 %v481_v35, %s5784_s6  ;;  %v584_v16 = vrot.slane %v582_v1, 5  ;;  %v612_v17 = vshll.u32 %v321_v4, 16  ;;  %v636_v18 = vshll.u32 %v324_v9, 16  ;;  %v640_v19 = vshrl.u32 %v324_v9, 16  ;;  %v328_v1 = vld [vmem:[%s5874_s5 + $0xa4] sm:$0x1] }
  0x44   : > { %v577_v20 = vsel %vm5885_vm2, %v572_v2, %v576_v3  ;;  %v609_v21 = vor.u32 %v608_v6, %v605_v5  ;;  %v595_v22 = vor.u32 %v594_v8, %v5985_v7  ;;  %v598_v23 = vshll.u32 %v319_v11, 16  ;;  %v333_v5 = vld [vmem:[%s5874_s5 + $0xb8] sm:$0xf]  ;;  %v332_v8 = vld [vmem:[%s5874_s5 + $0xb4] sm:$0xf] }
  0x45   : > { %v567_v24 = vsel %vm5885_vm2, %v562_v10, %v5965_v39  ;;  %v627_v26 = vshrl.u32 %v323_v14, 16  ;;  %v630_v27 = vshll.u32 %v323_v14, 16  ;;  %v616_v28 = vshrl.u32 %v321_v4, 16 }
  0x46   : > { %v553_v29 = vsel %vm5885_vm2, %v548_v12, %v552_v13  ;;  %v585_v30 = vor.u32 %v584_v16, %v581_v15  ;;  %v6000_v31 = vrot.slane %v636_v18, 5  ;;  %v642_v32 = vrot.slane %v640_v19, 4 }
  0x47   : > { %v610_v33 = vrot.slane %v609_v21, 4  ;;  %v614_v34 = vrot.slane %v612_v17, 5  ;;  %v596_v35 = vrot.slane %v595_v22, 4  ;;  %v600_v36 = vrot.slane %v598_v23, 5 }
  0x48   : > { %v629_v38 = vrot.slane %v627_v26, 4  ;;  %v632_v39 = vrot.slane %v630_v27, 5  ;;  %v586_v41 = vrot.slane %v585_v30, 4  ;;  %v618_v44 = vrot.slane %v616_v28, 4 }
  0x49   : > { %v643_v45 = vor.u32 %v642_v32, %v6000_v31  ;;  %v646_v46 = vshll.u32 %v325_v37, 16  ;;  %v615_v48 = vsel %vm5885_vm2, %v610_v33, %v614_v34  ;;  %v601_v49 = vsel %vm5885_vm2, %v596_v35, %v600_v36  ;;  %v331_v36 = vld [vmem:[%s5874_s5 + $0xb0] sm:$0x1] }
  0x4a   : > { %754 = vrot.lane.b32.xlu1 %v543_v51, %s5784_s6  ;;  %v675_v50 = vshrl.u32 %v329_v40, 16  ;;  %v678_v51 = vshll.u32 %v329_v40, 16  ;;  %v633_v52 = vor.u32 %v632_v39, %v629_v38  ;;  %v660_v53 = vshll.u32 %v327_v42, 16 }
  0x4b   : > { %752 = vrot.lane.b32.xlu0 %v529_v59, %s5784_s6  ;;  %750 = vrot.lane.b32.xlu2 %v519_v62, %s5784_s6  ;;  %v664_v54 = vshrl.u32 %v327_v42, 16  ;;  %v622_v55 = vshll.u32 %v322_v43, 16  ;;  %v591_v56 = vsel %vm5885_vm2, %v586_v41, %v5985_v7  ;;  %v619_v57 = vor.u32 %v618_v44, %v614_v34  ;;  %v330_v62 = vld [vmem:[%s5874_s5 + $0xac] sm:$0xf] }
  0x4c   : > { %v651_v58 = vshrl.u32 %v326_v47, 16  ;;  %v654_v59 = vshll.u32 %v326_v47, 16  ;;  %v644_v60 = vrot.slane %v643_v45, 4  ;;  %v648_v61 = vrot.slane %v646_v46, 5 }
  0x4d   : > { %v677_v63 = vrot.slane %v675_v50, 4  ;;  %v680_v0 = vrot.slane %v678_v51, 5  ;;  %v634_v2 = vrot.slane %v633_v52, 4  ;;  %v662_v3 = vrot.slane %v660_v53, 5  ;;  %v854_v51 = vld [vmem:[%s5874_s5 + $0xc] sm:$0xe] }
  0x4e   : > { %v666_v4 = vrot.slane %v664_v54, 4  ;;  %v620_v6 = vrot.slane %v619_v57, 4  ;;  %v624_v7 = vrot.slane %v622_v55, 5  ;;  %v653_v9 = vrot.slane %v651_v58, 4  ;;  %v855_v53 = vld [vmem:[%s5874_s5 + $0x10] sm:$0xf] }
  0x4f   : > { %v656_v10 = vrot.slane %v654_v59, 5  ;;  %v649_v11 = vsel %vm5885_vm2, %v644_v60, %v648_v61  ;;  %v684_v12 = vshll.u32 %v330_v62, 16  ;;  %v681_v13 = vor.u32 %v680_v0, %v677_v63  ;;  %v853_v54 = vld [vmem:[%s5874_s5 + $0x8] sm:$0x1]  ;;  %v851_v61 = vld [vmem:[%s5874_s5] sm:$0xe] }
  0x50   : > { %v670_v14 = vshll.u32 %v328_v1, 16  ;;  %v708_v15 = vshll.u32 %v333_v5, 16  ;;  %v712_v16 = vshrl.u32 %v333_v5, 16  ;;  %v639_v17 = vsel %vm5885_vm2, %v634_v2, %v6000_v31  ;;  %v334_v31 = vld [vmem:[%s5874_s5 + $0xbc] sm:$0x1] }
  0x51   : > { %v667_v18 = vor.u32 %v666_v4, %v662_v3  ;;  %v699_v19 = vshrl.u32 %v332_v8, 16  ;;  %v688_v21 = vshrl.u32 %v330_v62, 16  ;;  %v625_v22 = vsel %vm5885_vm2, %v620_v6, %v624_v7  ;;  %v858_v63 = vld [vmem:[%s5874_s5 + $0x1c] sm:$0xf]  ;;  %v226_v0 = vld [vmem:[%s5874_s5 + $0x18] sm:$0xf] }
  0x52   : > { %760 = vrot.lane.b32.xlu1 %v577_v20, %s5784_s6  ;;  %v702_v20 = vshll.u32 %v332_v8, 16  ;;  %v657_v23 = vor.u32 %v656_v10, %v653_v9  ;;  %v686_v26 = vrot.slane %v684_v12, 5  ;;  %v710_v27 = vrot.slane %v708_v15, 5  ;;  %259 = vst.msk [vmem:[#allocation2 + $0x10] sm:$0xf] %vm254_vm5, %v226_v0 }
  0x53   : > { %758 = vrot.lane.b32.xlu0 %v567_v24, %s5784_s6  ;;  %756 = vrot.lane.b32.xlu2 %v553_v29, %s5784_s6  ;;  %v682_v24 = vrot.slane %v681_v13, 4  ;;  %v714_v28 = vrot.slane %v712_v16, 4  ;;  %v668_v29 = vrot.slane %v667_v18, 4  ;;  %v672_v30 = vrot.slane %v670_v14, 5  ;;  %v224_v2 = vld [vmem:[%s5874_s5 + $0xc] sm:$0xf] }
  0x54   : > { %v701_v32 = vrot.slane %v699_v19, 4  ;;  %v704_v33 = vrot.slane %v702_v20, 5  ;;  %v658_v34 = vrot.slane %v657_v23, 4  ;;  %v690_v35 = vrot.slane %v688_v21, 4  ;;  %257 = vst.msk [vmem:[#allocation2 + $0x8] sm:$0xf] %vm254_vm5, %v224_v2 }
  0x55   : > { %v687_v37 = vsel %vm5885_vm2, %v682_v24, %v686_v26  ;;  %v715_v38 = vor.u32 %v714_v28, %v710_v27  ;;  %v718_v39 = vshll.u32 %v334_v31, 16  ;;  %v673_v40 = vsel %vm5885_vm2, %v668_v29, %v672_v30  ;;  %v859_v6 = vld [vmem:[%s5874_s5 + $0x20] sm:$0x1]  ;;  %v857_v9 = vld [vmem:[%s5874_s5 + $0x18] sm:$0xe] }
  0x56   : > { %v705_v41 = vor.u32 %v704_v33, %v701_v32  ;;  %v663_v42 = vsel %vm5885_vm2, %v658_v34, %v662_v3  ;;  %v691_v43 = vor.u32 %v690_v35, %v686_v26  ;;  %v694_v44 = vshll.u32 %v331_v36, 16  ;;  %v222_v3 = vld [vmem:[%s5874_s5] sm:$0xf]  ;;  %v856_v12 = vld [vmem:[%s5874_s5 + $0x14] sm:$0x1] }
  0x57   : > { %v716_v45 = vrot.slane %v715_v38, 4  ;;  %v720_v46 = vrot.slane %v718_v39, 5  ;;  %v5107_v58 = vrot.slane %v854_v51, 9  ;;  %v959_v59 = vrot.slane %v855_v53, 5  ;;  %255 = vst.msk [vmem:[#allocation2] sm:$0xf] %vm254_vm5, %v222_v3 }
  0x58   : > { %v706_v47 = vrot.slane %v705_v41, 4  ;;  %v696_v50 = vrot.slane %v694_v44, 5  ;;  %v955_v60 = vrot.slane %v853_v54, 5  ;;  %v5106_v4 = vrot.slane %v851_v61, 9  ;;  %v861_v15 = vld [vmem:[%s5874_s5 + $0x28] sm:$0xf] }
  0x59   : > { %v721_v52 = vsel %vm5885_vm2, %v716_v45, %v720_v46  ;;  %v960_v5 = vsel %vm6060_vm6, %v5107_v58, %v959_v59  ;;  %v966_v7 = vrot.slane %v858_v63, 5  ;;  %v5108_v14 = vrot.slane %v857_v9, 9  ;;  %v227_v16 = vld [vmem:[%s5874_s5 + $0x1c] sm:$0xf]  ;;  %v223_v18 = vld [vmem:[%s5874_s5 + $0x4] sm:$0xf] }
  0x5a   : > { %766 = vrot.lane.b32.xlu1 %v615_v48, %s5784_s6  ;;  %v852_v48 = vld [vmem:[%s5874_s5 + $0x4] sm:$0xf]  ;;  %260 = vst.msk [vmem:[#allocation2 + $0x14] sm:$0xf] %vm254_vm5, %v227_v16  ;;  %v961_v19 = vrot.slane %v959_v59, 4  ;;  %v962_v20 = vrot.slane %v856_v12, 5 }
  0x5b   : > { %764 = vrot.lane.b32.xlu0 %v601_v49, %s5784_s6  ;;  %762 = vrot.lane.b32.xlu2 %v591_v56, %s5784_s6  ;;  %v692_v49 = vrot.slane %v691_v43, 4  ;;  %v952_v55 = vrot.slane %v852_v48, 5  ;;  %v711_v56 = vsel %vm5885_vm2, %v706_v47, %v710_v27  ;;  %v968_v13 = vrot.slane %v966_v7, 4  ;;  %256 = vst.msk [vmem:[#allocation2 + $0x4] sm:$0xf] %vm254_vm5, %v223_v18 }
  0x5c   : > { %v864_v23 = vld [vmem:[%s5874_s5 + $0x34] sm:$0xf]  ;;  %v973_v24 = vrot.slane %v861_v15, 5  ;;  %v967_v26 = vsel %vm6060_vm6, %v5108_v14, %v966_v7  ;;  %v862_v27 = vld [vmem:[%s5874_s5 + $0x2c] sm:$0x1]  ;;  %v963_v28 = vsel %vm6060_vm6, %v961_v19, %v962_v20 }
  0x5d   : > { %v697_v57 = vsel %vm5885_vm2, %v692_v49, %v696_v50  ;;  %v954_v62 = vrot.slane %v952_v55, 4  ;;  %v953_v10 = vsel %vm6060_vm6, %v5106_v4, %v952_v55  ;;  %v980_v30 = vrot.slane %v864_v23, 5  ;;  %v860_v31 = vld [vmem:[%s5874_s5 + $0x24] sm:$0xe]  ;;  %v867_v34 = vld [vmem:[%s5874_s5 + $0x40] sm:$0xf] }
  0x5e   : > { %v975_v32 = vrot.slane %v973_v24, 4  ;;  %v976_v33 = vrot.slane %v862_v27, 5  ;;  %v230_v35 = vld [vmem:[%s5874_s5 + $0x30] sm:$0xf]  ;;  %v229_v36 = vld [vmem:[%s5874_s5 + $0x28] sm:$0xf] }
  0x5f   : > { %v956_v8 = vsel %vm6060_vm6, %v954_v62, %v955_v60  ;;  %263 = vst.msk [vmem:[#allocation2 + $0x20] sm:$0xf] %vm254_vm5, %v230_v35  ;;  %v5109_v38 = vrot.slane %v860_v31, 9  ;;  %v987_v41 = vrot.slane %v867_v34, 5  ;;  %v868_v43 = vld [vmem:[%s5874_s5 + $0x44] sm:$0x1] }
  0x60   : > { %262 = vst.msk [vmem:[#allocation2 + $0x1c] sm:$0xf] %vm254_vm5, %v229_v36  ;;  %v866_v44 = vld [vmem:[%s5874_s5 + $0x3c] sm:$0xe]  ;;  %v865_v46 = vld [vmem:[%s5874_s5 + $0x38] sm:$0x1] }
  0x61   : > { %v974_v45 = vsel %vm6060_vm6, %v5109_v38, %v973_v24  ;;  %v989_v47 = vrot.slane %v987_v41, 4  ;;  %v990_v48 = vrot.slane %v868_v43, 5  ;;  %v5111_v49 = vrot.slane %v866_v44, 9  ;;  %v233_v50 = vld [vmem:[%s5874_s5 + $0x40] sm:$0xf] }
  0x62   : > { %772 = vrot.lane.b32.xlu1 %v649_v11, %s5784_s6  ;;  %v969_v11 = vrot.slane %v859_v6, 5  ;;  %266 = vst.msk [vmem:[#allocation2 + $0x2c] sm:$0xf] %vm254_vm5, %v233_v50  ;;  %v232_v51 = vld [vmem:[%s5874_s5 + $0x3c] sm:$0xf]  ;;  %v982_v54 = vrot.slane %v980_v30, 4 }
  0x63   : > { %770 = vrot.lane.b32.xlu0 %v639_v17, %s5784_s6  ;;  %768 = vrot.lane.b32.xlu2 %v625_v22, %s5784_s6  ;;  %v225_v17 = vld [vmem:[%s5874_s5 + $0x10] sm:$0xf]  ;;  %v870_v53 = vld [vmem:[%s5874_s5 + $0x4c] sm:$0xf]  ;;  %v983_v55 = vrot.slane %v865_v46, 5  ;;  %v988_v58 = vsel %vm6060_vm6, %v5111_v49, %v987_v41 }
  0x64   : > { %258 = vst.msk [vmem:[#allocation2 + $0xc] sm:$0xf] %vm254_vm5, %v225_v17  ;;  %v970_v21 = vsel %vm6060_vm6, %v968_v13, %v969_v11  ;;  %v863_v22 = vld [vmem:[%s5874_s5 + $0x30] sm:$0xe]  ;;  %v872_v59 = vld [vmem:[%s5874_s5 + $0x54] sm:$0xe] }
  0x65   : > { %v5110_v29 = vrot.slane %v863_v22, 9  ;;  %265 = vst.msk [vmem:[#allocation2 + $0x28] sm:$0xf] %vm254_vm5, %v232_v51  ;;  %v873_v60 = vld [vmem:[%s5874_s5 + $0x58] sm:$0xf]  ;;  %v994_v61 = vrot.slane %v870_v53, 5  ;;  %v984_v63 = vsel %vm6060_vm6, %v982_v54, %v983_v55 }
  0x66   : > { %v871_v62 = vld [vmem:[%s5874_s5 + $0x50] sm:$0x1]  ;;  %v869_v0 = vld [vmem:[%s5874_s5 + $0x48] sm:$0xe]  ;;  %v5113_v2 = vrot.slane %v872_v59, 9  ;;  %v1001_v3 = vrot.slane %v873_v60, 5 }
  0x67   : > { %v236_v4 = vld [vmem:[%s5874_s5 + $0x54] sm:$0xf]  ;;  %v996_v6 = vrot.slane %v994_v61, 4  ;;  %v997_v7 = vrot.slane %v871_v62, 5  ;;  %v235_v11 = vld [vmem:[%s5874_s5 + $0x4c] sm:$0xf] }
  0x68   : > { %269 = vst.msk [vmem:[#allocation2 + $0x38] sm:$0xf] %vm254_vm5, %v236_v4  ;;  %v234_v13 = vld [vmem:[%s5874_s5 + $0x48] sm:$0xf]  ;;  %v1002_v14 = vsel %vm6060_vm6, %v5113_v2, %v1001_v3  ;;  %v875_v18 = vld [vmem:[%s5874_s5 + $0x60] sm:$0xe] }
  0x69   : > { %v998_v16 = vsel %vm6060_vm6, %v996_v6, %v997_v7  ;;  %v877_v17 = vld [vmem:[%s5874_s5 + $0x68] sm:$0x1]  ;;  %268 = vst.msk [vmem:[#allocation2 + $0x34] sm:$0xf] %vm254_vm5, %v235_v11  ;;  %v874_v20 = vld [vmem:[%s5874_s5 + $0x5c] sm:$0x1] }
  0x6a   : > { %778 = vrot.lane.b32.xlu1 %v687_v37, %s5784_s6  ;;  %v228_v37 = vld [vmem:[%s5874_s5 + $0x24] sm:$0xf]  ;;  %267 = vst.msk [vmem:[#allocation2 + $0x30] sm:$0xf] %vm254_vm5, %v234_v13  ;;  %v1011_v22 = vrot.slane %v877_v17, 5 }
  0x6b   : > { %776 = vrot.lane.b32.xlu0 %v673_v40, %s5784_s6  ;;  %774 = vrot.lane.b32.xlu2 %v663_v42, %s5784_s6  ;;  %261 = vst.msk [vmem:[#allocation2 + $0x18] sm:$0xf] %vm254_vm5, %v228_v37  ;;  %v981_v40 = vsel %vm6060_vm6, %v5110_v29, %v980_v30  ;;  %v977_v42 = vsel %vm6060_vm6, %v975_v32, %v976_v33  ;;  %v239_v23 = vld [vmem:[%s5874_s5 + $0x64] sm:$0xf]  ;;  %v879_v27 = vld [vmem:[%s5874_s5 + $0x70] sm:$0xf] }
  0x6c   : > { %272 = vst.msk [vmem:[#allocation2 + $0x44] sm:$0xf] %vm254_vm5, %v239_v23  ;;  %v1003_v29 = vrot.slane %v1001_v3, 4  ;;  %v1004_v30 = vrot.slane %v874_v20, 5  ;;  %v238_v31 = vld [vmem:[%s5874_s5 + $0x60] sm:$0xf] }
  0x6d   : > { %v237_v33 = vld [vmem:[%s5874_s5 + $0x58] sm:$0xf]  ;;  %v882_v37 = vld [vmem:[%s5874_s5 + $0x7c] sm:$0xf]  ;;  %v1015_v38 = vrot.slane %v879_v27, 5 }
  0x6e   : > { %v881_v35 = vld [vmem:[%s5874_s5 + $0x78] sm:$0xe]  ;;  %271 = vst.msk [vmem:[#allocation2 + $0x40] sm:$0xf] %vm254_vm5, %v238_v31  ;;  %v878_v41 = vld [vmem:[%s5874_s5 + $0x6c] sm:$0xe] }
  0x6f   : > { %270 = vst.msk [vmem:[#allocation2 + $0x3c] sm:$0xf] %vm254_vm5, %v237_v33  ;;  %v1022_v43 = vrot.slane %v882_v37, 5  ;;  %v242_v44 = vld [vmem:[%s5874_s5 + $0x78] sm:$0xf]  ;;  %v1017_v46 = vrot.slane %v1015_v38, 4 }
  0x70   : > { %275 = vst.msk [vmem:[#allocation2 + $0x50] sm:$0xf] %vm254_vm5, %v242_v44  ;;  %v5115_v50 = vrot.slane %v878_v41, 9  ;;  %v241_v51 = vld [vmem:[%s5874_s5 + $0x70] sm:$0xf] }
  0x71   : > { %v240_v53 = vld [vmem:[%s5874_s5 + $0x6c] sm:$0xf]  ;;  %274 = vst.msk [vmem:[#allocation2 + $0x4c] sm:$0xf] %vm254_vm5, %v241_v51  ;;  %v883_v60 = vld [vmem:[%s5874_s5 + $0x80] sm:$0x1] }
  0x72   : > { %784 = vrot.lane.b32.xlu1 %v721_v52, %s5784_s6  ;;  %v231_v52 = vld [vmem:[%s5874_s5 + $0x34] sm:$0xf]  ;;  %v1016_v59 = vsel %vm6060_vm6, %v5115_v50, %v1015_v38  ;;  %273 = vst.msk [vmem:[#allocation2 + $0x48] sm:$0xf] %vm254_vm5, %v240_v53  ;;  %v1025_v6 = vrot.slane %v883_v60, 5 }
  0x73   : > { %782 = vrot.lane.b32.xlu0 %v711_v56, %s5784_s6  ;;  %780 = vrot.lane.b32.xlu2 %v697_v57, %s5784_s6  ;;  %264 = vst.msk [vmem:[#allocation2 + $0x24] sm:$0xf] %vm254_vm5, %v231_v52  ;;  %v991_v57 = vsel %vm6060_vm6, %v989_v47, %v990_v48  ;;  %v885_v48 = vld [vmem:[%s5874_s5 + $0x88] sm:$0xf]  ;;  %v888_v3 = vld [vmem:[%s5874_s5 + $0x94] sm:$0xf] }
  0x74   : > { %v1029_v55 = vrot.slane %v885_v48, 5  ;;  %v244_v7 = vld [vmem:[%s5874_s5 + $0x84] sm:$0xf]  ;;  %v890_v11 = vld [vmem:[%s5874_s5 + $0x9c] sm:$0xe] }
  0x75   : > { %v891_v13 = vld [vmem:[%s5874_s5 + $0xa0] sm:$0xf]  ;;  %277 = vst.msk [vmem:[#allocation2 + $0x58] sm:$0xf] %vm254_vm5, %v244_v7  ;;  %v887_v17 = vld [vmem:[%s5874_s5 + $0x90] sm:$0xe] }
  0x76   : > { %v248_v20 = vld [vmem:[%s5874_s5 + $0x9c] sm:$0xf]  ;;  %v5118_v27 = vrot.slane %v887_v17, 9  ;;  %v892_v37 = vld [vmem:[%s5874_s5 + $0xa4] sm:$0x1] }
  0x77   : > { %281 = vst.msk [vmem:[#allocation2 + $0x68] sm:$0xf] %vm254_vm5, %v248_v20  ;;  %v898_v53 = vld [vmem:[%s5874_s5 + $0xbc] sm:$0x1] }
  0x78   : > { %v5125_v7 = vld [vmem:[%s5874_s5 + $0x1c] sm:$0xf] }
  0x79   : > { %v5130_v20 = vld [vmem:[%s5874_s5 + $0x3c] sm:$0xf] }
  0x7a   : > { %1066 = vrot.lane.b32.xlu1 %v960_v5, %s5785_s7 }
  0x7b   : > { %1064 = vrot.lane.b32.xlu0 %v956_v8, %s5785_s7  ;;  %1062 = vrot.lane.b32.xlu2 %v953_v10, %s5785_s7  ;;  %v876_v8 = vld [vmem:[%s5874_s5 + $0x64] sm:$0xf]  ;;  %v5112_v10 = vrot.slane %v869_v0, 9 }
  0x7c   : > { %v1008_v15 = vrot.slane %v876_v8, 5 }
  0x7d   : > { %v995_v19 = vsel %vm6060_vm6, %v5112_v10, %v994_v61  ;;  %v1031_v61 = vrot.slane %v1029_v55, 4 }
  0x82   : > { %1072 = vrot.lane.b32.xlu1 %v970_v21, %s5785_s7  ;;  %v1010_v21 = vrot.slane %v1008_v15, 4 }
  0x83   : > { %1070 = vrot.lane.b32.xlu0 %v967_v26, %s5785_s7  ;;  %1068 = vrot.lane.b32.xlu2 %v963_v28, %s5785_s7  ;;  %v5114_v26 = vrot.slane %v875_v18, 9  ;;  %v5119_v18 = vrot.slane %v890_v11, 9 }
  0x84   : > { %v1012_v34 = vsel %vm6060_vm6, %v1010_v21, %v1011_v22 }
  0x85   : > { %v731_v39 = vpop.permute.xlu2 %730  ;;  %v1009_v36 = vsel %vm6060_vm6, %v5114_v26, %v1008_v15  ;;  %v889_v15 = vld [vmem:[%s5874_s5 + $0x98] sm:$0x1] }
  0x86   : > { %823 = vst.msk [vmem:[#allocation2 + $0x10] sm:$0xf] %vm818_vm7, %v731_v39  ;;  %v880_v39 = vld [vmem:[%s5874_s5 + $0x74] sm:$0x1]  ;;  %v1039_v23 = vrot.slane %v889_v15, 5 }
  0x87   : > { %v1018_v47 = vrot.slane %v880_v39, 5  ;;  %v5126_v15 = vld [vmem:[%s5874_s5 + $0x24] sm:$0xf] }
  0x8a   : > { %1078 = vrot.lane.b32.xlu1 %v981_v40, %s5785_s7  ;;  %v1005_v40 = vsel %vm6060_vm6, %v1003_v29, %v1004_v30  ;;  %v246_v30 = vld [vmem:[%s5874_s5 + $0x90] sm:$0xf] }
  0x8b   : > { %1076 = vrot.lane.b32.xlu0 %v977_v42, %s5785_s7  ;;  %1074 = vrot.lane.b32.xlu2 %v974_v45, %s5785_s7  ;;  %v5116_v42 = vrot.slane %v881_v35, 9  ;;  %v893_v35 = vld [vmem:[%s5874_s5 + $0xa8] sm:$0xe]  ;;  %279 = vst.msk [vmem:[#allocation2 + $0x60] sm:$0xf] %vm254_vm5, %v246_v30 }
  0x8d   : > { %v733_v56 = vpop.permute.xlu2 %732  ;;  %v1023_v54 = vsel %vm6060_vm6, %v5116_v42, %v1022_v43  ;;  %v5120_v42 = vrot.slane %v893_v35, 9 }
  0x8e   : > { %824 = vst.msk [vmem:[#allocation2 + $0x14] sm:$0xf] %vm818_vm7, %v733_v56  ;;  %v1019_v56 = vsel %vm6060_vm6, %v1017_v46, %v1018_v47  ;;  %v1046_v46 = vrot.slane %v892_v37, 5  ;;  %v250_v47 = vld [vmem:[%s5874_s5 + $0xa8] sm:$0xf] }
  0x8f   : > { %283 = vst.msk [vmem:[#allocation2 + $0x70] sm:$0xf] %vm254_vm5, %v250_v47 }
  0x92   : > { %1084 = vrot.lane.b32.xlu1 %v991_v57, %s5785_s7  ;;  %v886_v57 = vld [vmem:[%s5874_s5 + $0x8c] sm:$0x1] }
  0x93   : > { %1082 = vrot.lane.b32.xlu0 %v988_v58, %s5785_s7  ;;  %1080 = vrot.lane.b32.xlu2 %v984_v63, %s5785_s7  ;;  %v884_v58 = vld [vmem:[%s5874_s5 + $0x84] sm:$0xe]  ;;  %v1032_v62 = vrot.slane %v886_v57, 5  ;;  %v245_v63 = vld [vmem:[%s5874_s5 + $0x88] sm:$0xf] }
  0x94   : > { %v727_v5 = vpop.permute.xlu1 %726  ;;  %v5117_v2 = vrot.slane %v884_v58, 9  ;;  %278 = vst.msk [vmem:[#allocation2 + $0x5c] sm:$0xf] %vm254_vm5, %v245_v63  ;;  %v1060_v58 = vrot.slane %v898_v53, 5  ;;  %v252_v63 = vld [vmem:[%s5874_s5 + $0xb4] sm:$0xf] }
  0x95   : > { %821 = vst.msk [vmem:[#allocation2 + $0x8] sm:$0xf] %vm818_vm7, %v727_v5  ;;  %v723_v9 = vpop.permute.xlu0 %722  ;;  %v739_v12 = vpop.permute.xlu2 %738  ;;  %v1024_v5 = vrot.slane %v1022_v43, 4  ;;  %v1033_v10 = vsel %vm6060_vm6, %v1031_v61, %v1032_v62  ;;  %v897_v43 = vld [vmem:[%s5874_s5 + $0xb8] sm:$0xf] }
  0x96   : > { %819 = vst.msk [vmem:[#allocation2] sm:$0xf] %vm818_vm7, %v723_v9  ;;  %v243_v9 = vld [vmem:[%s5874_s5 + $0x7c] sm:$0xf]  ;;  %v253_v61 = vld [vmem:[%s5874_s5 + $0xb8] sm:$0xf] }
  0x97   : > { %827 = vst.msk [vmem:[#allocation2 + $0x20] sm:$0xf] %vm818_vm7, %v739_v12  ;;  %v1030_v12 = vsel %vm6060_vm6, %v5117_v2, %v1029_v55  ;;  %v896_v55 = vld [vmem:[%s5874_s5 + $0xb4] sm:$0xe] }
  0x98   : > { %276 = vst.msk [vmem:[#allocation2 + $0x54] sm:$0xf] %vm254_vm5, %v243_v9  ;;  %v5121_v60 = vrot.slane %v896_v55, 9  ;;  %v5123_v9 = vld [vmem:[%s5874_s5 + $0x10] sm:$0xf] }
  0x99   : > { %286 = vst.msk [vmem:[#allocation2 + $0x7c] sm:$0xf] %vm254_vm5, %v253_v61  ;;  %v5148_v61 = vld [vmem:[%s5874_s5 + $0xa8] sm:$0xf] }
  0x9a   : > { %1090 = vrot.lane.b32.xlu1 %v1002_v14, %s5785_s7  ;;  %v1036_v14 = vrot.slane %v888_v3, 5  ;;  %285 = vst.msk [vmem:[#allocation2 + $0x78] sm:$0xf] %vm254_vm5, %v252_v63 }
  0x9b   : > { %1088 = vrot.lane.b32.xlu0 %v998_v16, %s5785_s7  ;;  %1086 = vrot.lane.b32.xlu2 %v995_v19, %s5785_s7  ;;  %v1026_v16 = vsel %vm6060_vm6, %v1024_v5, %v1025_v6  ;;  %v1043_v19 = vrot.slane %v891_v13, 5  ;;  %v5128_v13 = vld [vmem:[%s5874_s5 + $0x30] sm:$0xf] }
  0x9c   : > { %v729_v24 = vpop.permute.xlu1 %728  ;;  %v1038_v22 = vrot.slane %v1036_v14, 4 }
  0x9d   : > { %822 = vst.msk [vmem:[#allocation2 + $0xc] sm:$0xf] %vm818_vm7, %v729_v24  ;;  %v725_v28 = vpop.permute.xlu0 %724  ;;  %v745_v32 = vpop.permute.xlu2 %744  ;;  %v894_v24 = vld [vmem:[%s5874_s5 + $0xac] sm:$0xf]  ;;  %v1044_v31 = vsel %vm6060_vm6, %v5119_v18, %v1043_v19 }
  0x9e   : > { %820 = vst.msk [vmem:[#allocation2 + $0x4] sm:$0xf] %vm818_vm7, %v725_v28  ;;  %v247_v28 = vld [vmem:[%s5874_s5 + $0x94] sm:$0xf]  ;;  %v1040_v33 = vsel %vm6060_vm6, %v1038_v22, %v1039_v23 }
  0x9f   : > { %830 = vst.msk [vmem:[#allocation2 + $0x2c] sm:$0xf] %vm818_vm7, %v745_v32  ;;  %v1050_v32 = vrot.slane %v894_v24, 5 }
  0xa0   : > { %280 = vst.msk [vmem:[#allocation2 + $0x64] sm:$0xf] %vm254_vm5, %v247_v28  ;;  %v5132_v28 = vld [vmem:[%s5874_s5 + $0x48] sm:$0xf] }
  0xa1   : > { %v1052_v38 = vrot.slane %v1050_v32, 4  ;;  %v1051_v51 = vsel %vm6060_vm6, %v5120_v42, %v1050_v32  ;;  %v5137_v32 = vld [vmem:[%s5874_s5 + $0x64] sm:$0xf] }
  0xa2   : > { %1096 = vrot.lane.b32.xlu1 %v1012_v34, %s5785_s7  ;;  %v895_v34 = vld [vmem:[%s5874_s5 + $0xb0] sm:$0x1] }
  0xa3   : > { %1094 = vrot.lane.b32.xlu0 %v1009_v36, %s5785_s7  ;;  %1092 = vrot.lane.b32.xlu2 %v1005_v40, %s5785_s7  ;;  %v1037_v36 = vsel %vm6060_vm6, %v5118_v27, %v1036_v14  ;;  %v1053_v39 = vrot.slane %v895_v34, 5  ;;  %v251_v40 = vld [vmem:[%s5874_s5 + $0xac] sm:$0xf]  ;;  %v5127_v14 = vld [vmem:[%s5874_s5 + $0x28] sm:$0xf] }
  0xa4   : > { %v737_v45 = vpop.permute.xlu1 %736  ;;  %284 = vst.msk [vmem:[#allocation2 + $0x74] sm:$0xf] %vm254_vm5, %v251_v40  ;;  %v5133_v27 = vld [vmem:[%s5874_s5 + $0x4c] sm:$0xf]  ;;  %v5135_v34 = vld [vmem:[%s5874_s5 + $0x58] sm:$0xf] }
  0xa5   : > { %826 = vst.msk [vmem:[#allocation2 + $0x1c] sm:$0xf] %vm818_vm7, %v737_v45  ;;  %v735_v49 = vpop.permute.xlu0 %734  ;;  %v751_v52 = vpop.permute.xlu2 %750  ;;  %v1045_v45 = vrot.slane %v1043_v19, 4  ;;  %v1054_v50 = vsel %vm6060_vm6, %v1052_v38, %v1053_v39  ;;  %v5131_v19 = vld [vmem:[%s5874_s5 + $0x40] sm:$0xf] }
  0xa6   : > { %825 = vst.msk [vmem:[#allocation2 + $0x18] sm:$0xf] %vm818_vm7, %v735_v49  ;;  %v249_v49 = vld [vmem:[%s5874_s5 + $0xa0] sm:$0xf]  ;;  %v5140_v38 = vld [vmem:[%s5874_s5 + $0x78] sm:$0xf] }
  0xa7   : > { %833 = vst.msk [vmem:[#allocation2 + $0x38] sm:$0xf] %vm818_vm7, %v751_v52  ;;  %v1057_v52 = vrot.slane %v897_v43, 5  ;;  %v5139_v39 = vld [vmem:[%s5874_s5 + $0x70] sm:$0xf] }
  0xa8   : > { %282 = vst.msk [vmem:[#allocation2 + $0x6c] sm:$0xf] %vm254_vm5, %v249_v49  ;;  %v5138_v40 = vld [vmem:[%s5874_s5 + $0x6c] sm:$0xf] }
  0xa9   : > { %v1059_v57 = vrot.slane %v1057_v52, 4  ;;  %v1058_v3 = vsel %vm6060_vm6, %v5121_v60, %v1057_v52  ;;  %v5144_v52 = vld [vmem:[%s5874_s5 + $0x90] sm:$0xf] }
  0xaa   : > { %1102 = vrot.lane.b32.xlu1 %v1023_v54, %s5785_s7  ;;  %v1047_v54 = vsel %vm6060_vm6, %v1045_v45, %v1046_v46  ;;  %v5142_v45 = vld [vmem:[%s5874_s5 + $0x84] sm:$0xf]  ;;  %v5141_v46 = vld [vmem:[%s5874_s5 + $0x7c] sm:$0xf] }
  0xab   : > { %1100 = vrot.lane.b32.xlu0 %v1019_v56, %s5785_s7  ;;  %1098 = vrot.lane.b32.xlu2 %v1016_v59, %s5785_s7  ;;  %v1061_v2 = vsel %vm6060_vm6, %v1059_v57, %v1060_v58  ;;  %v5149_v58 = vld [vmem:[%s5874_s5 + $0xac] sm:$0xf] }
  0xac   : > { %v743_v0 = vpop.permute.xlu1 %742 }
  0xad   : > { %829 = vst.msk [vmem:[#allocation2 + $0x28] sm:$0xf] %vm818_vm7, %v743_v0  ;;  %v741_v4 = vpop.permute.xlu0 %740  ;;  %v757_v8 = vpop.permute.xlu2 %756  ;;  %v5122_v0 = vld [vmem:[%s5874_s5 + $0xc] sm:$0xf] }
  0xae   : > { %828 = vst.msk [vmem:[#allocation2 + $0x24] sm:$0xf] %vm818_vm7, %v741_v4 }
  0xaf   : > { %836 = vst.msk [vmem:[#allocation2 + $0x44] sm:$0xf] %vm818_vm7, %v757_v8  ;;  %v5124_v8 = vld [vmem:[%s5874_s5 + $0x18] sm:$0xf] }
  0xb2   : > { %1108 = vrot.lane.b32.xlu1 %v1033_v10, %s5785_s7 }
  0xb3   : > { %1106 = vrot.lane.b32.xlu0 %v1030_v12, %s5785_s7  ;;  %1104 = vrot.lane.b32.xlu2 %v1026_v16, %s5785_s7 }
  0xb4   : > { %v749_v21 = vpop.permute.xlu1 %748 }
  0xb5   : > { %832 = vst.msk [vmem:[#allocation2 + $0x34] sm:$0xf] %vm818_vm7, %v749_v21  ;;  %v747_v26 = vpop.permute.xlu0 %746  ;;  %v763_v29 = vpop.permute.xlu2 %762  ;;  %v5129_v21 = vld [vmem:[%s5874_s5 + $0x34] sm:$0xf] }
  0xb6   : > { %831 = vst.msk [vmem:[#allocation2 + $0x30] sm:$0xf] %vm818_vm7, %v747_v26  ;;  %v5134_v26 = vld [vmem:[%s5874_s5 + $0x54] sm:$0xf] }
  0xb7   : > { %839 = vst.msk [vmem:[#allocation2 + $0x50] sm:$0xf] %vm818_vm7, %v763_v29 }
  0xba   : > { %1114 = vrot.lane.b32.xlu1 %v1044_v31, %s5785_s7 }
  0xbb   : > { %1112 = vrot.lane.b32.xlu0 %v1040_v33, %s5785_s7  ;;  %1110 = vrot.lane.b32.xlu2 %v1037_v36, %s5785_s7  ;;  %v5136_v33 = vld [vmem:[%s5874_s5 + $0x60] sm:$0xf] }
  0xbc   : > { %v755_v41 = vpop.permute.xlu1 %754 }
  0xbd   : > { %835 = vst.msk [vmem:[#allocation2 + $0x40] sm:$0xf] %vm818_vm7, %v755_v41  ;;  %v753_v44 = vpop.permute.xlu0 %752  ;;  %v769_v48 = vpop.permute.xlu2 %768 }
  0xbe   : > { %834 = vst.msk [vmem:[#allocation2 + $0x3c] sm:$0xf] %vm818_vm7, %v753_v44  ;;  %v5143_v44 = vld [vmem:[%s5874_s5 + $0x88] sm:$0xf] }
  0xbf   : > { %842 = vst.msk [vmem:[#allocation2 + $0x5c] sm:$0xf] %vm818_vm7, %v769_v48 }
  0xc2   : > { %1120 = vrot.lane.b32.xlu1 %v1054_v50, %s5785_s7  ;;  %v5146_v50 = vld [vmem:[%s5874_s5 + $0x9c] sm:$0xf] }
  0xc3   : > { %1118 = vrot.lane.b32.xlu0 %v1051_v51, %s5785_s7  ;;  %1116 = vrot.lane.b32.xlu2 %v1047_v54, %s5785_s7  ;;  %v5145_v51 = vld [vmem:[%s5874_s5 + $0x94] sm:$0xf]  ;;  %v5155_v54 = vld [vmem:[%s5874_s5 + $0x10] sm:$0xf] }
  0xc4   : > { %v761_v56 = vpop.permute.xlu1 %760  ;;  %v1447_v60 = vshrl.u32 %v5155_v54, 16 }
  0xc5   : > { %838 = vst.msk [vmem:[#allocation2 + $0x4c] sm:$0xf] %vm818_vm7, %v761_v56  ;;  %v759_v59 = vpop.permute.xlu0 %758  ;;  %v775_v62 = vpop.permute.xlu2 %774  ;;  %v5154_v56 = vld [vmem:[%s5874_s5 + $0xc] sm:$0xf] }
  0xc6   : > { %837 = vst.msk [vmem:[#allocation2 + $0x48] sm:$0xf] %vm818_vm7, %v759_v59  ;;  %v1443_v59 = vshll.u32 %v5155_v54, 16  ;;  %v1437_v63 = vshll.u32 %v5154_v56, 16 }
  0xc7   : > { %845 = vst.msk [vmem:[#allocation2 + $0x68] sm:$0xf] %vm818_vm7, %v775_v62  ;;  %v1434_v62 = vshrl.u32 %v5154_v56, 16 }
  0xca   : > { %1256 = vrot.lane.b32.xlu1 %v5122_v0, %s5786_s8  ;;  %v5147_v0 = vld [vmem:[%s5874_s5 + $0xa0] sm:$0xf] }
  0xcb   : > { %1124 = vrot.lane.b32.xlu0 %v1061_v2, %s5785_s7  ;;  %1122 = vrot.lane.b32.xlu2 %v1058_v3, %s5785_s7  ;;  %v5160_v2 = vld [vmem:[%s5874_s5 + $0x24] sm:$0xf]  ;;  %v6374_v3 = vrot.slane %v1443_v59, 5 }
  0xcc   : > { %v767_v4 = vpop.permute.xlu1 %766 }
  0xcd   : > { %841 = vst.msk [vmem:[#allocation2 + $0x58] sm:$0xf] %vm818_vm7, %v767_v4  ;;  %v765_v5 = vpop.permute.xlu0 %764  ;;  %v781_v6 = vpop.permute.xlu2 %780  ;;  %v1449_v4 = vrot.slane %v1447_v60, 4 }
  0xce   : > { %840 = vst.msk [vmem:[#allocation2 + $0x54] sm:$0xf] %vm818_vm7, %v765_v5 }
  0xcf   : > { %848 = vst.msk [vmem:[#allocation2 + $0x74] sm:$0xf] %vm818_vm7, %v781_v6  ;;  %v5156_v6 = vld [vmem:[%s5874_s5 + $0x14] sm:$0x1] }
  0xd2   : > { %1262 = vrot.lane.b32.xlu1 %v5125_v7, %s5786_s8  ;;  %v1436_v7 = vrot.slane %v1434_v62, 4 }
  0xd3   : > { %1260 = vrot.lane.b32.xlu0 %v5124_v8, %s5786_s8  ;;  %1258 = vrot.lane.b32.xlu2 %v5123_v9, %s5786_s8  ;;  %v1439_v8 = vrot.slane %v1437_v63, 5 }
  0xd4   : > { %v773_v10 = vpop.permute.xlu1 %772 }
  0xd5   : > { %844 = vst.msk [vmem:[#allocation2 + $0x64] sm:$0xf] %vm818_vm7, %v773_v10  ;;  %v771_v11 = vpop.permute.xlu0 %770  ;;  %v1063_v12 = vpop.permute.xlu2 %1062  ;;  %v1482_v10 = vshrl.u32 %v5160_v2, 16 }
  0xd6   : > { %843 = vst.msk [vmem:[#allocation2 + $0x60] sm:$0xf] %vm818_vm7, %v771_v11  ;;  %v1485_v11 = vshll.u32 %v5160_v2, 16  ;;  %v5169_v2 = vld [vmem:[%s5874_s5 + $0x48] sm:$0xf] }
  0xd7   : > { %1159 = vst.msk [vmem:[#allocation2] sm:$0xf] %vm1158_vm8, %v1063_v12  ;;  %v5158_v12 = vld [vmem:[%s5874_s5 + $0x1c] sm:$0xf] }
  0xda   : > { %1268 = vrot.lane.b32.xlu1 %v5128_v13, %s5786_s8 }
  0xdb   : > { %1266 = vrot.lane.b32.xlu0 %v5127_v14, %s5786_s8  ;;  %1264 = vrot.lane.b32.xlu2 %v5126_v15, %s5786_s8  ;;  %v5157_v14 = vld [vmem:[%s5874_s5 + $0x18] sm:$0xf]  ;;  %v5152_v15 = vld [vmem:[%s5874_s5 + $0xc0] sm:$0xf] }
  0xdc   : > { %v779_v16 = vpop.permute.xlu1 %778 }
  0xdd   : > { %847 = vst.msk [vmem:[#allocation2 + $0x70] sm:$0xf] %vm818_vm7, %v779_v16  ;;  %v777_v17 = vpop.permute.xlu0 %776  ;;  %v1069_v18 = vpop.permute.xlu2 %1068  ;;  %v1450_v16 = vor.u32 %v1449_v4, %v6374_v3 }
  0xde   : > { %846 = vst.msk [vmem:[#allocation2 + $0x6c] sm:$0xf] %vm818_vm7, %v777_v17  ;;  %v1453_v17 = vshll.u32 %v5156_v6, 16 }
  0xdf   : > { %1162 = vst.msk [vmem:[#allocation2 + $0xc] sm:$0xf] %vm1158_vm8, %v1069_v18  ;;  %v5151_v18 = vld [vmem:[%s5874_s5 + $0xb8] sm:$0xf] }
  0xe2   : > { %1274 = vrot.lane.b32.xlu1 %v5131_v19, %s5786_s8  ;;  %v1440_v19 = vor.u32 %v1439_v8, %v1436_v7  ;;  %v5166_v7 = vld [vmem:[%s5874_s5 + $0x3c] sm:$0xf] }
  0xe3   : > { %1272 = vrot.lane.b32.xlu0 %v5130_v20, %s5786_s8  ;;  %1270 = vrot.lane.b32.xlu2 %v5129_v21, %s5786_s8  ;;  %v1467_v20 = vshll.u32 %v5158_v12, 16  ;;  %v1471_v21 = vshrl.u32 %v5158_v12, 16 }
  0xe4   : > { %v785_v22 = vpop.permute.xlu1 %784 }
  0xe5   : > { %850 = vst.msk [vmem:[#allocation2 + $0x7c] sm:$0xf] %vm818_vm7, %v785_v22  ;;  %v783_v23 = vpop.permute.xlu0 %782  ;;  %v1075_v24 = vpop.permute.xlu2 %1074  ;;  %v5150_v22 = vld [vmem:[%s5874_s5 + $0xb4] sm:$0xf] }
  0xe6   : > { %849 = vst.msk [vmem:[#allocation2 + $0x78] sm:$0xf] %vm818_vm7, %v783_v23  ;;  %v1484_v23 = vrot.slane %v1482_v10, 4 }
  0xe7   : > { %1165 = vst.msk [vmem:[#allocation2 + $0x18] sm:$0xf] %vm1158_vm8, %v1075_v24  ;;  %v1487_v24 = vrot.slane %v1485_v11, 5 }
  0xea   : > { %1280 = vrot.lane.b32.xlu1 %v5134_v26, %s5786_s8  ;;  %v1458_v26 = vshrl.u32 %v5157_v14, 16 }
  0xeb   : > { %1278 = vrot.lane.b32.xlu0 %v5133_v27, %s5786_s8  ;;  %1276 = vrot.lane.b32.xlu2 %v5132_v28, %s5786_s8  ;;  %v1461_v27 = vshll.u32 %v5157_v14, 16  ;;  %v5161_v28 = vld [vmem:[%s5874_s5 + $0x28] sm:$0xf]  ;;  %v1554_v14 = vshrl.u32 %v5169_v2, 16 }
  0xec   : > { %v1067_v29 = vpop.permute.xlu1 %1066  ;;  %v1495_v54 = vshrl.u32 %v5161_v28, 16 }
  0xed   : > { %1161 = vst.msk [vmem:[#allocation2 + $0x8] sm:$0xf] %vm1158_vm8, %v1067_v29  ;;  %v1065_v30 = vpop.permute.xlu0 %1064  ;;  %v1081_v31 = vpop.permute.xlu2 %1080  ;;  %v1451_v29 = vrot.slane %v1450_v16, 4 }
  0xee   : > { %1160 = vst.msk [vmem:[#allocation2 + $0x4] sm:$0xf] %vm1158_vm8, %v1065_v30  ;;  %v1455_v30 = vrot.slane %v1453_v17, 5  ;;  %v1497_v6 = vrot.slane %v1495_v54, 4 }
  0xef   : > { %1168 = vst.msk [vmem:[#allocation2 + $0x24] sm:$0xf] %vm1158_vm8, %v1081_v31  ;;  %v5164_v31 = vld [vmem:[%s5874_s5 + $0x34] sm:$0xf] }
  0xf2   : > { %1286 = vrot.lane.b32.xlu1 %v5137_v32, %s5786_s8  ;;  %v5163_v32 = vld [vmem:[%s5874_s5 + $0x30] sm:$0xf] }
  0xf3   : > { %1284 = vrot.lane.b32.xlu0 %v5136_v33, %s5786_s8  ;;  %1282 = vrot.lane.b32.xlu2 %v5135_v34, %s5786_s8  ;;  %v1441_v34 = vrot.slane %v1440_v19, 4  ;;  %v1530_v19 = vshrl.u32 %v5166_v7, 16 }
  0xf4   : > { %v1073_v35 = vpop.permute.xlu1 %1072 }
  0xf5   : > { %1164 = vst.msk [vmem:[#allocation2 + $0x14] sm:$0xf] %vm1158_vm8, %v1073_v35  ;;  %v1071_v36 = vpop.permute.xlu0 %1070  ;;  %v1087_v37 = vpop.permute.xlu2 %1086  ;;  %v5159_v35 = vld [vmem:[%s5874_s5 + $0x20] sm:$0x1] }
  0xf6   : > { %1163 = vst.msk [vmem:[#allocation2 + $0x10] sm:$0xf] %vm1158_vm8, %v1071_v36  ;;  %v6394_v36 = vrot.slane %v1467_v20, 5  ;;  %v1533_v20 = vshll.u32 %v5166_v7, 16  ;;  %v5176_v7 = vld [vmem:[%s5874_s5 + $0x64] sm:$0xf] }
  0xf7   : > { %1171 = vst.msk [vmem:[#allocation2 + $0x30] sm:$0xf] %vm1158_vm8, %v1087_v37  ;;  %v1473_v37 = vrot.slane %v1471_v21, 4 }
  0xfa   : > { %1292 = vrot.lane.b32.xlu1 %v5140_v38, %s5786_s8 }
  0xfb   : > { %1290 = vrot.lane.b32.xlu0 %v5139_v39, %s5786_s8  ;;  %1288 = vrot.lane.b32.xlu2 %v5138_v40, %s5786_s8  ;;  %v1488_v39 = vor.u32 %v1487_v24, %v1484_v23  ;;  %v1491_v40 = vshll.u32 %v5161_v28, 16  ;;  %v5173_v24 = vld [vmem:[%s5874_s5 + $0x58] sm:$0xf] }
  0xfc   : > { %v1079_v41 = vpop.permute.xlu1 %1078 }
  0xfd   : > { %1167 = vst.msk [vmem:[#allocation2 + $0x20] sm:$0xf] %vm1158_vm8, %v1079_v41  ;;  %v1077_v42 = vpop.permute.xlu0 %1076  ;;  %v1093_v43 = vpop.permute.xlu2 %1092  ;;  %v1460_v41 = vrot.slane %v1458_v26, 4 }
  0xfe   : > { %1166 = vst.msk [vmem:[#allocation2 + $0x1c] sm:$0xf] %vm1158_vm8, %v1077_v42  ;;  %v1463_v42 = vrot.slane %v1461_v27, 5 }
  0xff   : > { %1174 = vst.msk [vmem:[#allocation2 + $0x3c] sm:$0xf] %vm1158_vm8, %v1093_v43 }
 0x100   : > { %v1464_v56 = vor.u32 %v1463_v42, %v1460_v41 }
 0x102   : > { %1298 = vrot.lane.b32.xlu1 %v5143_v44, %s5786_s8  ;;  %v1515_v44 = vshll.u32 %v5164_v31, 16 }
 0x103   : > { %1296 = vrot.lane.b32.xlu0 %v5142_v45, %s5786_s8  ;;  %1294 = vrot.lane.b32.xlu2 %v5141_v46, %s5786_s8  ;;  %v1519_v45 = vshrl.u32 %v5164_v31, 16  ;;  %v1506_v46 = vshrl.u32 %v5163_v32, 16 }
 0x104   : > { %v1085_v47 = vpop.permute.xlu1 %1084 }
 0x105   : > { %1170 = vst.msk [vmem:[#allocation2 + $0x2c] sm:$0xf] %vm1158_vm8, %v1085_v47  ;;  %v1083_v48 = vpop.permute.xlu0 %1082  ;;  %v1099_v49 = vpop.permute.xlu2 %1098  ;;  %v1509_v47 = vshll.u32 %v5163_v32, 16  ;;  %v1508_v59 = vrot.slane %v1506_v46, 4  ;;  %v5168_v32 = vld [vmem:[%s5874_s5 + $0x44] sm:$0x1] }
 0x106   : > { %1169 = vst.msk [vmem:[#allocation2 + $0x28] sm:$0xf] %vm1158_vm8, %v1083_v48  ;;  %v1456_v48 = vsel %vm5885_vm2, %v1451_v29, %v1455_v30  ;;  %v5170_v29 = vld [vmem:[%s5874_s5 + $0x4c] sm:$0xf]  ;;  %v1556_v30 = vrot.slane %v1554_v14, 4 }
 0x107   : > { %1177 = vst.msk [vmem:[#allocation2 + $0x48] sm:$0xf] %vm1158_vm8, %v1099_v49  ;;  %v1446_v49 = vsel %vm5885_vm2, %v1441_v34, %v6374_v3  ;;  %v1511_v60 = vrot.slane %v1509_v47, 5  ;;  %v5167_v3 = vld [vmem:[%s5874_s5 + $0x40] sm:$0xf]  ;;  %v1563_v46 = vshll.u32 %v5170_v29, 16 }
 0x108   : > { %v1539_v16 = vshll.u32 %v5167_v3, 16  ;;  %v1543_v17 = vshrl.u32 %v5167_v3, 16  ;;  %v5175_v14 = vld [vmem:[%s5874_s5 + $0x60] sm:$0xf] }
 0x109   : > { %v1512_v11 = vor.u32 %v1511_v60, %v1508_v59  ;;  %v1565_v59 = vrot.slane %v1563_v46, 5  ;;  %v5178_v60 = vld [vmem:[%s5874_s5 + $0x6c] sm:$0xf] }
 0x10a   : > { %1304 = vrot.lane.b32.xlu1 %v5146_v50, %s5786_s8  ;;  %v1474_v50 = vor.u32 %v1473_v37, %v6394_v36  ;;  %v1545_v34 = vrot.slane %v1543_v17, 4  ;;  %v1591_v37 = vshrl.u32 %v5173_v24, 16  ;;  %v1611_v17 = vshll.u32 %v5176_v7, 16 }
 0x10b   : > { %1302 = vrot.lane.b32.xlu0 %v5145_v51, %s5786_s8  ;;  %1300 = vrot.lane.b32.xlu2 %v5144_v52, %s5786_s8  ;;  %v1477_v51 = vshll.u32 %v5159_v35, 16  ;;  %v1489_v52 = vrot.slane %v1488_v39, 4  ;;  %v1513_v28 = vrot.slane %v1512_v11, 4  ;;  %v1532_v39 = vrot.slane %v1530_v19, 4 }
 0x10c   : > { %v1091_v53 = vpop.permute.xlu1 %1090  ;;  %v1475_v63 = vrot.slane %v1474_v50, 4  ;;  %v1549_v50 = vshll.u32 %v5168_v32, 16  ;;  %v5182_v32 = vld [vmem:[%s5874_s5 + $0x7c] sm:$0xf] }
 0x10d   : > { %1173 = vst.msk [vmem:[#allocation2 + $0x38] sm:$0xf] %vm1158_vm8, %v1091_v53  ;;  %v1089_v55 = vpop.permute.xlu0 %1088  ;;  %v1105_v57 = vpop.permute.xlu2 %1104  ;;  %v1493_v53 = vrot.slane %v1491_v40, 5  ;;  %v1535_v40 = vrot.slane %v1533_v20, 5  ;;  %v1663_v46 = vshrl.u32 %v5182_v32, 16 }
 0x10e   : > { %1172 = vst.msk [vmem:[#allocation2 + $0x34] sm:$0xf] %vm1158_vm8, %v1089_v55  ;;  %v5153_v55 = vld [vmem:[%s5874_s5 + $0xc4] sm:$0xf] }
 0x10f   : > { %1180 = vst.msk [vmem:[#allocation2 + $0x54] sm:$0xf] %vm1158_vm8, %v1105_v57  ;;  %v6407_v57 = vrot.slane %v1515_v44, 5  ;;  %v1494_v8 = vsel %vm5885_vm2, %v1489_v52, %v1493_v53 }
 0x112   : > { %1310 = vrot.lane.b32.xlu1 %v5149_v58, %s5786_s8  ;;  %v1521_v58 = vrot.slane %v1519_v45, 4  ;;  %v1518_v45 = vsel %vm5885_vm2, %v1513_v28, %v6407_v57 }
 0x113   : > { %1308 = vrot.lane.b32.xlu0 %v5148_v61, %s5786_s8  ;;  %1306 = vrot.lane.b32.xlu2 %v5147_v0, %s5786_s8  ;;  %v5165_v61 = vld [vmem:[%s5874_s5 + $0x38] sm:$0x1]  ;;  %v1479_v0 = vrot.slane %v1477_v51, 5 }
 0x114   : > { %v1097_v5 = vpop.permute.xlu1 %1096  ;;  %v1525_v10 = vshll.u32 %v5165_v61, 16 }
 0x115   : > { %1176 = vst.msk [vmem:[#allocation2 + $0x44] sm:$0xf] %vm1158_vm8, %v1097_v5  ;;  %v1095_v9 = vpop.permute.xlu0 %1094  ;;  %v1111_v13 = vpop.permute.xlu2 %1110  ;;  %v1465_v5 = vrot.slane %v1464_v56, 4  ;;  %v1567_v56 = vshrl.u32 %v5170_v29, 16 }
 0x116   : > { %1175 = vst.msk [vmem:[#allocation2 + $0x40] sm:$0xf] %vm1158_vm8, %v1095_v9  ;;  %v1522_v9 = vor.u32 %v1521_v58, %v6407_v57  ;;  %v1527_v27 = vrot.slane %v1525_v10, 5  ;;  %v5174_v58 = vld [vmem:[%s5874_s5 + $0x5c] sm:$0x1]  ;;  %v1629_v10 = vshll.u32 %v5178_v60, 16 }
 0x117   : > { %1183 = vst.msk [vmem:[#allocation2 + $0x60] sm:$0xf] %vm1158_vm8, %v1111_v13  ;;  %v5162_v13 = vld [vmem:[%s5874_s5 + $0x2c] sm:$0x1]  ;;  %v1470_v21 = vsel %vm5885_vm2, %v1465_v5, %v6394_v36  ;;  %v1587_v36 = vshll.u32 %v5173_v24, 16  ;;  %v1569_v11 = vrot.slane %v1567_v56, 4 }
 0x118   : > { %v1501_v23 = vshll.u32 %v5162_v13, 16  ;;  %v1523_v26 = vrot.slane %v1522_v9, 4  ;;  %v1626_v9 = vshrl.u32 %v5178_v60, 16  ;;  %v5171_v13 = vld [vmem:[%s5874_s5 + $0x50] sm:$0x1]  ;;  %v1631_v29 = vrot.slane %v1629_v10, 5 }
 0x119   : > { %v6445_v52 = vrot.slane %v1587_v36, 5  ;;  %v1573_v24 = vshll.u32 %v5171_v13, 16 }
 0x11a   : > { %1316 = vrot.lane.b32.xlu1 %v5152_v15, %s5786_s8  ;;  %v1557_v15 = vshll.u32 %v5169_v2, 16  ;;  %v1528_v44 = vsel %vm5885_vm2, %v1523_v26, %v1527_v27  ;;  %v1602_v26 = vshrl.u32 %v5175_v14, 16  ;;  %v1605_v27 = vshll.u32 %v5175_v14, 16  ;;  %v5180_v14 = vld [vmem:[%s5874_s5 + $0x74] sm:$0x1] }
 0x11b   : > { %1314 = vrot.lane.b32.xlu0 %v5151_v18, %s5786_s8  ;;  %1312 = vrot.lane.b32.xlu2 %v5150_v22, %s5786_s8  ;;  %v1480_v18 = vsel %vm5885_vm2, %v1475_v63, %v1479_v0  ;;  %v1498_v22 = vor.u32 %v1497_v6, %v1493_v53  ;;  %v1593_v53 = vrot.slane %v1591_v37, 4  ;;  %v1551_v63 = vrot.slane %v1549_v50, 5  ;;  %v5179_v37 = vld [vmem:[%s5874_s5 + $0x70] sm:$0xf] }
 0x11c   : > { %v1103_v33 = vpop.permute.xlu1 %1102  ;;  %v1559_v31 = vrot.slane %v1557_v15, 5  ;;  %v1628_v28 = vrot.slane %v1626_v9, 4  ;;  %v1635_v50 = vshll.u32 %v5179_v37, 16  ;;  %v5184_v9 = vld [vmem:[%s5874_s5 + $0x84] sm:$0xf] }
 0x11d   : > { %1179 = vst.msk [vmem:[#allocation2 + $0x50] sm:$0xf] %vm1158_vm8, %v1103_v33  ;;  %v1101_v38 = vpop.permute.xlu0 %1100  ;;  %v1117_v43 = vpop.permute.xlu2 %1116  ;;  %v6432_v33 = vrot.slane %v1539_v16, 5  ;;  %v1499_v42 = vrot.slane %v1498_v22, 4  ;;  %v1594_v3 = vor.u32 %v1593_v53, %v6445_v52 }
 0x11e   : > { %1178 = vst.msk [vmem:[#allocation2 + $0x4c] sm:$0xf] %vm1158_vm8, %v1101_v38  ;;  %v5172_v38 = vld [vmem:[%s5874_s5 + $0x54] sm:$0xf] }
 0x11f   : > { %1186 = vst.msk [vmem:[#allocation2 + $0x6c] sm:$0xf] %vm1158_vm8, %v1117_v43  ;;  %v1503_v43 = vrot.slane %v1501_v23, 5  ;;  %v1578_v51 = vshrl.u32 %v5172_v38, 16  ;;  %v1581_v54 = vshll.u32 %v5172_v38, 16  ;;  %v1595_v19 = vrot.slane %v1594_v3, 4 }
 0x120   : > { %v1570_v23 = vor.u32 %v1569_v11, %v1565_v59  ;;  %v5177_v38 = vld [vmem:[%s5874_s5 + $0x68] sm:$0x1] }
 0x121   : > { %v1504_v57 = vsel %vm5885_vm2, %v1499_v42, %v1503_v43  ;;  %v1580_v0 = vrot.slane %v1578_v51, 4  ;;  %v1583_v5 = vrot.slane %v1581_v54, 5  ;;  %v1604_v42 = vrot.slane %v1602_v26, 4 }
 0x122   : > { %1819 = vrot.lane.b32.xlu1 %v1456_v48, %s5787_s9  ;;  %v1560_v48 = vor.u32 %v1559_v31, %v1556_v30  ;;  %v6470_v30 = vrot.slane %v1611_v17, 5  ;;  %v1607_v43 = vrot.slane %v1605_v27, 5  ;;  %v1621_v53 = vshll.u32 %v5177_v38, 16 }
 0x123   : > { %1817 = vrot.lane.b32.xlu0 %v1446_v49, %s5787_s9  ;;  %1318 = vrot.lane.b32.xlu2 %v5153_v55, %s5786_s8  ;;  %v1546_v49 = vor.u32 %v1545_v34, %v6432_v33  ;;  %v1536_v55 = vor.u32 %v1535_v40, %v1532_v39  ;;  %v5181_v34 = vld [vmem:[%s5874_s5 + $0x78] sm:$0xf]  ;;  %v1571_v40 = vrot.slane %v1570_v23, 4  ;;  %v1645_v26 = vshll.u32 %v5180_v14, 16 }
 0x124   : > { %v1109_v62 = vpop.permute.xlu1 %1108  ;;  %v1561_v61 = vrot.slane %v1560_v48, 4  ;;  %v1653_v48 = vshll.u32 %v5181_v34, 16  ;;  %v5189_v14 = vld [vmem:[%s5874_s5 + $0x98] sm:$0x1] }
 0x125   : > { %1182 = vst.msk [vmem:[#allocation2 + $0x5c] sm:$0xf] %vm1158_vm8, %v1109_v62  ;;  %v1107_v4 = vpop.permute.xlu0 %1106  ;;  %v1123_v12 = vpop.permute.xlu2 %1122  ;;  %v1547_v62 = vrot.slane %v1546_v49, 4  ;;  %v1537_v6 = vrot.slane %v1536_v55, 4  ;;  %v1632_v49 = vor.u32 %v1631_v29, %v1628_v28  ;;  %v1639_v55 = vshrl.u32 %v5179_v37, 16 }
 0x126   : > { %1181 = vst.msk [vmem:[#allocation2 + $0x58] sm:$0xf] %vm1158_vm8, %v1107_v4  ;;  %v1597_v4 = vshll.u32 %v5174_v58, 16  ;;  %v1566_v15 = vsel %vm5885_vm2, %v1561_v61, %v1565_v59  ;;  %v1665_v59 = vrot.slane %v1663_v46, 4  ;;  %v1655_v61 = vrot.slane %v1653_v48, 5 }
 0x127   : > { %1189 = vst.msk [vmem:[#allocation2 + $0x78] sm:$0xf] %vm1158_vm8, %v1123_v12  ;;  %v1552_v16 = vsel %vm5885_vm2, %v1547_v62, %v1551_v63  ;;  %v1542_v22 = vsel %vm5885_vm2, %v1537_v6, %v6432_v33  ;;  %v1633_v62 = vrot.slane %v1632_v49, 4  ;;  %v1637_v63 = vrot.slane %v1635_v50, 5 }
 0x128   : > { %v1599_v20 = vrot.slane %v1597_v4, 5  ;;  %v5187_v4 = vld [vmem:[%s5874_s5 + $0x90] sm:$0xf] }
 0x129   : > { %v1698_v17 = vshrl.u32 %v5187_v4, 16 }
 0x12a   : > { %1825 = vrot.lane.b32.xlu1 %v1494_v8, %s5787_s9  ;;  %v1600_v33 = vsel %vm5885_vm2, %v1595_v19, %v1599_v20 }
 0x12b   : > { %1823 = vrot.lane.b32.xlu0 %v1480_v18, %s5787_s9  ;;  %1821 = vrot.lane.b32.xlu2 %v1470_v21, %s5787_s9  ;;  %v1615_v18 = vshrl.u32 %v5176_v7, 16  ;;  %v1584_v21 = vor.u32 %v1583_v5, %v1580_v0  ;;  %v1623_v0 = vrot.slane %v1621_v53, 5  ;;  %v5185_v5 = vld [vmem:[%s5874_s5 + $0x88] sm:$0xf] }
 0x12c   : > { %v1115_v35 = vpop.permute.xlu1 %1114  ;;  %v1683_v19 = vshll.u32 %v5185_v5, 16  ;;  %v1687_v20 = vshrl.u32 %v5185_v5, 16 }
 0x12d   : > { %1185 = vst.msk [vmem:[#allocation2 + $0x68] sm:$0xf] %vm1158_vm8, %v1115_v35  ;;  %v1113_v41 = vpop.permute.xlu0 %1112  ;;  %v1259_v47 = vpop.permute.xlu2 %1258  ;;  %v1617_v31 = vrot.slane %v1615_v18, 4  ;;  %v1585_v36 = vrot.slane %v1584_v21, 4  ;;  %v1701_v18 = vshll.u32 %v5187_v4, 16  ;;  %v1674_v21 = vshrl.u32 %v5184_v9, 16 }
 0x12e   : > { %1184 = vst.msk [vmem:[#allocation2 + $0x64] sm:$0xf] %vm1158_vm8, %v1113_v41  ;;  %v1575_v41 = vrot.slane %v1573_v24, 5  ;;  %v6515_v37 = vrot.slane %v1683_v19, 5 }
 0x12f   : > { %1354 = vst.msk [vmem:[#allocation2 + $0x4] sm:$0xf] %vm1352_vm9, %v1259_v47  ;;  %v1650_v47 = vshrl.u32 %v5181_v34, 16  ;;  %v1618_v51 = vor.u32 %v1617_v31, %v6470_v30  ;;  %v1590_v54 = vsel %vm5885_vm2, %v1585_v36, %v6445_v52  ;;  %v1700_v31 = vrot.slane %v1698_v17, 4  ;;  %v5191_v34 = vld [vmem:[%s5874_s5 + $0xa0] sm:$0xf] }
 0x130   : > { %v1576_v56 = vsel %vm5885_vm2, %v1571_v40, %v1575_v41  ;;  %v5188_v36 = vld [vmem:[%s5874_s5 + $0x94] sm:$0xf]  ;;  %v1676_v38 = vrot.slane %v1674_v21, 4  ;;  %v5186_v41 = vld [vmem:[%s5874_s5 + $0x8c] sm:$0x1]  ;;  %v1735_v46 = vshrl.u32 %v5191_v34, 16 }
 0x131   : > { %v1652_v60 = vrot.slane %v1650_v47, 4  ;;  %v1619_v52 = vrot.slane %v1618_v51, 4  ;;  %v1707_v51 = vshll.u32 %v5188_v36, 16 }
 0x132   : > { %1831 = vrot.lane.b32.xlu1 %v1528_v44, %s5787_s9 }
 0x133   : > { %1829 = vrot.lane.b32.xlu0 %v1518_v45, %s5787_s9  ;;  %1827 = vrot.lane.b32.xlu2 %v1504_v57, %s5787_s9  ;;  %v1659_v45 = vshll.u32 %v5182_v32, 16  ;;  %v1608_v57 = vor.u32 %v1607_v43, %v1604_v42  ;;  %v1703_v32 = vrot.slane %v1701_v18, 5  ;;  %v1647_v43 = vrot.slane %v1645_v26, 5 }
 0x134   : > { %v1121_v2 = vpop.permute.xlu1 %1120 }
 0x135   : > { %1188 = vst.msk [vmem:[#allocation2 + $0x74] sm:$0xf] %vm1158_vm8, %v1121_v2  ;;  %v1119_v8 = vpop.permute.xlu0 %1118  ;;  %v1265_v12 = vpop.permute.xlu2 %1264  ;;  %v6489_v58 = vrot.slane %v1659_v45, 5  ;;  %v5183_v2 = vld [vmem:[%s5874_s5 + $0x80] sm:$0x1]  ;;  %v1609_v7 = vrot.slane %v1608_v57, 4  ;;  %v1704_v50 = vor.u32 %v1703_v32, %v1700_v31 }
 0x136   : > { %1187 = vst.msk [vmem:[#allocation2 + $0x70] sm:$0xf] %vm1158_vm8, %v1119_v8  ;;  %v1641_v8 = vrot.slane %v1639_v55, 4  ;;  %v1669_v11 = vshll.u32 %v5183_v2, 16  ;;  %v1731_v45 = vshll.u32 %v5191_v34, 16  ;;  %v1693_v55 = vshll.u32 %v5186_v41, 16 }
 0x137   : > { %1357 = vst.msk [vmem:[#allocation2 + $0x10] sm:$0xf] %vm1352_vm9, %v1265_v12  ;;  %v1666_v10 = vor.u32 %v1665_v59, %v6489_v58  ;;  %v1656_v12 = vor.u32 %v1655_v61, %v1652_v60  ;;  %v1614_v23 = vsel %vm5885_vm2, %v1609_v7, %v6470_v30  ;;  %v1689_v30 = vrot.slane %v1687_v20, 4  ;;  %v5192_v60 = vld [vmem:[%s5874_s5 + $0xa4] sm:$0x1] }
 0x138   : > { %v1642_v24 = vor.u32 %v1641_v8, %v1637_v63  ;;  %v1671_v28 = vrot.slane %v1669_v11, 5  ;;  %v1711_v57 = vshrl.u32 %v5188_v36, 16  ;;  %v6531_v61 = vrot.slane %v1731_v45, 5  ;;  %v5197_v32 = vld [vmem:[%s5874_s5 + $0xb8] sm:$0xf] }
 0x139   : > { %v1667_v27 = vrot.slane %v1666_v10, 4  ;;  %v1657_v29 = vrot.slane %v1656_v12, 4  ;;  %v1695_v4 = vrot.slane %v1693_v55, 5  ;;  %v1741_v8 = vshll.u32 %v5192_v60, 16 }
 0x13a   : > { %1837 = vrot.lane.b32.xlu1 %v1566_v15, %s5787_s9  ;;  %v1638_v15 = vsel %vm5885_vm2, %v1633_v62, %v1637_v63  ;;  %v1643_v42 = vrot.slane %v1642_v24, 4  ;;  %v1737_v62 = vrot.slane %v1735_v46, 4  ;;  %v1713_v10 = vrot.slane %v1711_v57, 4 }
 0x13b   : > { %1835 = vrot.lane.b32.xlu0 %v1552_v16, %s5787_s9  ;;  %1833 = vrot.lane.b32.xlu2 %v1542_v22, %s5787_s9  ;;  %v1624_v16 = vsel %vm5885_vm2, %v1619_v52, %v1623_v0  ;;  %v1677_v22 = vshll.u32 %v5184_v9, 16  ;;  %v1672_v49 = vsel %vm5885_vm2, %v1667_v27, %v1671_v28  ;;  %v1662_v53 = vsel %vm5885_vm2, %v1657_v29, %v6489_v58  ;;  %v5194_v9 = vld [vmem:[%s5874_s5 + $0xac] sm:$0xf] }
 0x13c   : > { %v1257_v35 = vpop.permute.xlu1 %1256  ;;  %v1648_v59 = vsel %vm5885_vm2, %v1643_v42, %v1647_v43  ;;  %v1705_v58 = vrot.slane %v1704_v50, 4  ;;  %v1709_v0 = vrot.slane %v1707_v51, 5  ;;  %v1738_v11 = vor.u32 %v1737_v62, %v6531_v61 }
 0x13d   : > { %1353 = vst.msk [vmem:[#allocation2] sm:$0xf] %vm1352_vm9, %v1257_v35  ;;  %v1125_v39 = vpop.permute.xlu0 %1124  ;;  %v1271_v44 = vpop.permute.xlu2 %1270  ;;  %v5190_v35 = vld [vmem:[%s5874_s5 + $0x9c] sm:$0xf]  ;;  %v1755_v21 = vshll.u32 %v5194_v9, 16  ;;  %v1717_v24 = vshll.u32 %v5189_v14, 16 }
 0x13e   : > { %1190 = vst.msk [vmem:[#allocation2 + $0x7c] sm:$0xf] %vm1158_vm8, %v1125_v39  ;;  %v1679_v39 = vrot.slane %v1677_v22, 5  ;;  %v1722_v47 = vshrl.u32 %v5190_v35, 16  ;;  %v1725_v48 = vshll.u32 %v5190_v35, 16  ;;  %v1759_v22 = vshrl.u32 %v5194_v9, 16 }
 0x13f   : > { %1360 = vst.msk [vmem:[#allocation2 + $0x1c] sm:$0xf] %vm1352_vm9, %v1271_v44  ;;  %v1739_v28 = vrot.slane %v1738_v11, 4  ;;  %v1743_v29 = vrot.slane %v1741_v8, 5  ;;  %v1719_v42 = vrot.slane %v1717_v24, 5  ;;  %v1783_v57 = vshrl.u32 %v5197_v32, 16 }
 0x140   : > { %v1724_v63 = vrot.slane %v1722_v47, 4  ;;  %v1727_v52 = vrot.slane %v1725_v48, 5  ;;  %v5203_v24 = vld [vmem:[%s5874_s5 + $0x10] sm:$0xf] }
 0x141   : > { %v1744_v45 = vsel %vm5885_vm2, %v1739_v28, %v1743_v29  ;;  %v1785_v8 = vrot.slane %v1783_v57, 4 }
 0x142   : > { %1843 = vrot.lane.b32.xlu1 %v1600_v33, %s5787_s9  ;;  %v1728_v12 = vor.u32 %v1727_v52, %v1724_v63 }
 0x143   : > { %1841 = vrot.lane.b32.xlu0 %v1590_v54, %s5787_s9  ;;  %1839 = vrot.lane.b32.xlu2 %v1576_v56, %s5787_s9  ;;  %v1690_v54 = vor.u32 %v1689_v30, %v6515_v37  ;;  %v1680_v56 = vor.u32 %v1679_v39, %v1676_v38  ;;  %v1761_v30 = vrot.slane %v1759_v22, 4  ;;  %v5200_v38 = vld [vmem:[%s5874_s5 + $0xc4] sm:$0xf]  ;;  %v5199_v39 = vld [vmem:[%s5874_s5 + $0xc0] sm:$0xf] }
 0x144   : > { %v1263_v3 = vpop.permute.xlu1 %1262  ;;  %v1729_v31 = vrot.slane %v1728_v12, 4  ;;  %v1803_v50 = vshll.u32 %v5200_v38, 16  ;;  %v1807_v51 = vshrl.u32 %v5200_v38, 16  ;;  %v1794_v55 = vshrl.u32 %v5199_v39, 16 }
 0x145   : > { %1356 = vst.msk [vmem:[#allocation2 + $0xc] sm:$0xf] %vm1352_vm9, %v1263_v3  ;;  %v1261_v6 = vpop.permute.xlu0 %1260  ;;  %v1277_v13 = vpop.permute.xlu2 %1276  ;;  %v1691_v3 = vrot.slane %v1690_v54, 4  ;;  %v1681_v5 = vrot.slane %v1680_v56, 4  ;;  %v1797_v56 = vshll.u32 %v5199_v39, 16 }
 0x146   : > { %1355 = vst.msk [vmem:[#allocation2 + $0x8] sm:$0xf] %vm1352_vm9, %v1261_v6  ;;  %v5196_v6 = vld [vmem:[%s5874_s5 + $0xb4] sm:$0xf]  ;;  %v1734_v46 = vsel %vm5885_vm2, %v1729_v31, %v6531_v61  ;;  %v1805_v63 = vrot.slane %v1803_v50, 5  ;;  %v1809_v52 = vrot.slane %v1807_v51, 4 }
 0x147   : > { %1363 = vst.msk [vmem:[#allocation2 + $0x28] sm:$0xf] %vm1352_vm9, %v1277_v13  ;;  %v1770_v17 = vshrl.u32 %v5196_v6, 16  ;;  %v1773_v18 = vshll.u32 %v5196_v6, 16  ;;  %v1696_v19 = vsel %vm5885_vm2, %v1691_v3, %v1695_v4  ;;  %v1686_v20 = vsel %vm5885_vm2, %v1681_v5, %v6515_v37  ;;  %v5201_v3 = vld [vmem:[%s5874_s5 + $0xc8] sm:$0x1] }
 0x148   : > { %v1757_v37 = vrot.slane %v1755_v21, 5  ;;  %v1796_v4 = vrot.slane %v1794_v55, 4  ;;  %v1799_v5 = vrot.slane %v1797_v56, 5  ;;  %v1810_v12 = vor.u32 %v1809_v52, %v1805_v63  ;;  %v5208_v50 = vld [vmem:[%s5874_s5 + $0x24] sm:$0xe] }
 0x149   : > { %v1772_v34 = vrot.slane %v1770_v17, 4  ;;  %v1775_v35 = vrot.slane %v1773_v18, 5  ;;  %v5252_v57 = vrot.slane %v5208_v50, 9 }
 0x14a   : > { %1849 = vrot.lane.b32.xlu1 %v1638_v15, %s5787_s9  ;;  %v5193_v15 = vld [vmem:[%s5874_s5 + $0xa8] sm:$0xf] }
 0x14b   : > { %1847 = vrot.lane.b32.xlu0 %v1624_v16, %s5787_s9  ;;  %1845 = vrot.lane.b32.xlu2 %v1614_v23, %s5787_s9  ;;  %v1710_v16 = vsel %vm5885_vm2, %v1705_v58, %v1709_v0  ;;  %v1714_v23 = vor.u32 %v1713_v10, %v1709_v0  ;;  %v1746_v26 = vshrl.u32 %v5193_v15, 16  ;;  %v1749_v27 = vshll.u32 %v5193_v15, 16  ;;  %v5198_v10 = vld [vmem:[%s5874_s5 + $0xbc] sm:$0x1] }
 0x14c   : > { %v1269_v33 = vpop.permute.xlu1 %1268  ;;  %v1776_v48 = vor.u32 %v1775_v35, %v1772_v34  ;;  %v1800_v15 = vor.u32 %v1799_v5, %v1796_v4  ;;  %v1789_v18 = vshll.u32 %v5198_v10, 16  ;;  %v5206_v34 = vld [vmem:[%s5874_s5 + $0x1c] sm:$0xf]  ;;  %v2044_v35 = vrot.slane %v5203_v24, 5  ;;  %v5213_v4 = vld [vmem:[%s5874_s5 + $0x38] sm:$0x1] }
 0x14d   : > { %1359 = vst.msk [vmem:[#allocation2 + $0x18] sm:$0xf] %vm1352_vm9, %v1269_v33  ;;  %v1267_v40 = vpop.permute.xlu0 %1266  ;;  %v1283_v44 = vpop.permute.xlu2 %1282  ;;  %v5195_v33 = vld [vmem:[%s5874_s5 + $0xb0] sm:$0x1]  ;;  %v1715_v41 = vrot.slane %v1714_v23, 4  ;;  %v1748_v43 = vrot.slane %v1746_v26, 4 }
 0x14e   : > { %1358 = vst.msk [vmem:[#allocation2 + $0x14] sm:$0xf] %vm1352_vm9, %v1267_v40  ;;  %v1765_v54 = vshll.u32 %v5195_v33, 16  ;;  %v1777_v61 = vrot.slane %v1776_v48, 4  ;;  %v1801_v22 = vrot.slane %v1800_v15, 4  ;;  %v2051_v38 = vrot.slane %v5206_v34, 5 }
 0x14f   : > { %1366 = vst.msk [vmem:[#allocation2 + $0x34] sm:$0xf] %vm1352_vm9, %v1283_v44  ;;  %v1751_v44 = vrot.slane %v1749_v27, 5  ;;  %v1791_v27 = vrot.slane %v1789_v18, 5  ;;  %v5204_v33 = vld [vmem:[%s5874_s5 + $0x14] sm:$0x1] }
 0x150   : > { %v1806_v31 = vsel %vm5885_vm2, %v1801_v22, %v1805_v63  ;;  %v5216_v22 = vld [vmem:[%s5874_s5 + $0x44] sm:$0x1] }
 0x151   : > { %v1752_v60 = vor.u32 %v1751_v44, %v1748_v43 }
 0x152   : > { %1855 = vrot.lane.b32.xlu1 %v1672_v49, %s5787_s9  ;;  %v1779_v49 = vshll.u32 %v5197_v32, 16  ;;  %v5205_v32 = vld [vmem:[%s5874_s5 + $0x18] sm:$0xe] }
 0x153   : > { %1853 = vrot.lane.b32.xlu0 %v1662_v53, %s5787_s9  ;;  %1851 = vrot.lane.b32.xlu2 %v1648_v59, %s5787_s9  ;;  %v1762_v53 = vor.u32 %v1761_v30, %v1757_v37  ;;  %v1720_v59 = vsel %vm5885_vm2, %v1715_v41, %v1719_v42  ;;  %v5251_v30 = vrot.slane %v5205_v32, 9  ;;  %v2047_v41 = vrot.slane %v5204_v33, 5  ;;  %v5209_v42 = vld [vmem:[%s5874_s5 + $0x28] sm:$0xf] }
 0x154   : > { %v1275_v2 = vpop.permute.xlu1 %1274  ;;  %v1781_v62 = vrot.slane %v1779_v49, 5  ;;  %v5210_v49 = vld [vmem:[%s5874_s5 + $0x2c] sm:$0x1]  ;;  %v2075_v32 = vrot.slane %v5216_v22, 5 }
 0x155   : > { %1362 = vst.msk [vmem:[#allocation2 + $0x24] sm:$0xf] %vm1352_vm9, %v1275_v2  ;;  %v1273_v7 = vpop.permute.xlu0 %1272  ;;  %v1289_v13 = vpop.permute.xlu2 %1288  ;;  %v1763_v0 = vrot.slane %v1762_v53, 4  ;;  %v1767_v2 = vrot.slane %v1765_v54, 5  ;;  %v5207_v53 = vld [vmem:[%s5874_s5 + $0x20] sm:$0x1] }
 0x156   : > { %1361 = vst.msk [vmem:[#allocation2 + $0x20] sm:$0xf] %vm1352_vm9, %v1273_v7  ;;  %v1753_v7 = vrot.slane %v1752_v60, 4  ;;  %v1782_v11 = vsel %vm5885_vm2, %v1777_v61, %v1781_v62  ;;  %v1786_v17 = vor.u32 %v1785_v8, %v1781_v62  ;;  %v2061_v55 = vrot.slane %v5210_v49, 5  ;;  %v5212_v60 = vld [vmem:[%s5874_s5 + $0x34] sm:$0xf] }
 0x157   : > { %1369 = vst.msk [vmem:[#allocation2 + $0x40] sm:$0xf] %vm1352_vm9, %v1289_v13  ;;  %v1813_v13 = vshll.u32 %v5201_v3, 16  ;;  %v1768_v14 = vsel %vm5885_vm2, %v1763_v0, %v1767_v2  ;;  %v2053_v61 = vrot.slane %v2051_v38, 4  ;;  %v2054_v62 = vrot.slane %v5207_v53, 5 }
 0x158   : > { %v1787_v26 = vrot.slane %v1786_v17, 4  ;;  %v5214_v0 = vld [vmem:[%s5874_s5 + $0x3c] sm:$0xe]  ;;  %v5215_v2 = vld [vmem:[%s5874_s5 + $0x40] sm:$0xf]  ;;  %v2065_v3 = vrot.slane %v5212_v60, 5 }
 0x159   : > { %v2055_v5 = vsel %vm6060_vm6, %v2053_v61, %v2054_v62  ;;  %v2072_v8 = vrot.slane %v5215_v2, 5 }
 0x15a   : > { %1861 = vrot.lane.b32.xlu1 %v1710_v16, %s5787_s9  ;;  %v1758_v16 = vsel %vm5885_vm2, %v1753_v7, %v1757_v37  ;;  %v5202_v37 = vld [vmem:[%s5874_s5 + $0xc] sm:$0xe]  ;;  %v5254_v7 = vrot.slane %v5214_v0, 9  ;;  %v2067_v10 = vrot.slane %v2065_v3, 4 }
 0x15b   : > { %1859 = vrot.lane.b32.xlu0 %v1696_v19, %s5787_s9  ;;  %1857 = vrot.lane.b32.xlu2 %v1686_v20, %s5787_s9  ;;  %v1811_v19 = vrot.slane %v1810_v12, 4  ;;  %v1815_v20 = vrot.slane %v1813_v13, 5  ;;  %v5250_v44 = vrot.slane %v5202_v37, 9  ;;  %v5218_v12 = vld [vmem:[%s5874_s5 + $0x4c] sm:$0xf] }
 0x15c   : > { %v1281_v36 = vpop.permute.xlu1 %1280  ;;  %v2079_v17 = vrot.slane %v5218_v12, 5  ;;  %v5224_v37 = vld [vmem:[%s5874_s5 + $0x64] sm:$0xf] }
 0x15d   : > { %1365 = vst.msk [vmem:[#allocation2 + $0x30] sm:$0xf] %vm1352_vm9, %v1281_v36  ;;  %v1279_v40 = vpop.permute.xlu0 %1278  ;;  %v1295_v47 = vpop.permute.xlu2 %1294  ;;  %v1816_v29 = vsel %vm5885_vm2, %v1811_v19, %v1815_v20  ;;  %v1792_v36 = vsel %vm5885_vm2, %v1787_v26, %v1791_v27  ;;  %v2045_v51 = vsel %vm6060_vm6, %v5250_v44, %v2044_v35  ;;  %v5219_v19 = vld [vmem:[%s5874_s5 + $0x50] sm:$0x1]  ;;  %v5217_v20 = vld [vmem:[%s5874_s5 + $0x48] sm:$0xe] }
 0x15e   : > { %1364 = vst.msk [vmem:[#allocation2 + $0x2c] sm:$0xf] %vm1352_vm9, %v1279_v40  ;;  %v2046_v40 = vrot.slane %v2044_v35, 4  ;;  %v2082_v24 = vrot.slane %v5219_v19, 5  ;;  %v5255_v27 = vrot.slane %v5217_v20, 9 }
 0x15f   : > { %1372 = vst.msk [vmem:[#allocation2 + $0x4c] sm:$0xf] %vm1352_vm9, %v1295_v47  ;;  %v2058_v47 = vrot.slane %v5209_v42, 5  ;;  %v2093_v42 = vrot.slane %v5224_v37, 5 }
 0x160   : > { %v2048_v48 = vsel %vm6060_vm6, %v2046_v40, %v2047_v41  ;;  %v2080_v33 = vsel %vm6060_vm6, %v5255_v27, %v2079_v17  ;;  %v5220_v40 = vld [vmem:[%s5874_s5 + $0x54] sm:$0xe]  ;;  %v5234_v27 = vld [vmem:[%s5874_s5 + $0x8c] sm:$0x1] }
 0x161   : > { %v2060_v54 = vrot.slane %v2058_v47, 4 }
 0x162   : > { %1867 = vrot.lane.b32.xlu1 %v1744_v45, %s5787_s9 }
 0x163   : > { %1865 = vrot.lane.b32.xlu0 %v1734_v46, %s5787_s9  ;;  %1863 = vrot.lane.b32.xlu2 %v1720_v59, %s5787_s9  ;;  %v2052_v46 = vsel %vm6060_vm6, %v5251_v30, %v2051_v38  ;;  %v2062_v52 = vsel %vm6060_vm6, %v2060_v54, %v2061_v55  ;;  %v5222_v38 = vld [vmem:[%s5874_s5 + $0x5c] sm:$0x1]  ;;  %v5228_v54 = vld [vmem:[%s5874_s5 + $0x74] sm:$0x1] }
 0x164   : > { %v1287_v58 = vpop.permute.xlu1 %1286  ;;  %v5226_v55 = vld [vmem:[%s5874_s5 + $0x6c] sm:$0xe]  ;;  %v2103_v60 = vrot.slane %v5228_v54, 5 }
 0x165   : > { %1368 = vst.msk [vmem:[#allocation2 + $0x3c] sm:$0xf] %vm1352_vm9, %v1287_v58  ;;  %v1285_v6 = vpop.permute.xlu0 %1284  ;;  %v1301_v9 = vpop.permute.xlu2 %1300  ;;  %v2059_v58 = vsel %vm6060_vm6, %v5252_v57, %v2058_v47  ;;  %v5225_v57 = vld [vmem:[%s5874_s5 + $0x68] sm:$0x1]  ;;  %v5258_v62 = vrot.slane %v5226_v55, 9 }
 0x166   : > { %1367 = vst.msk [vmem:[#allocation2 + $0x38] sm:$0xf] %vm1352_vm9, %v1285_v6  ;;  %v5211_v6 = vld [vmem:[%s5874_s5 + $0x30] sm:$0xe]  ;;  %v2096_v0 = vrot.slane %v5225_v57, 5 }
 0x167   : > { %1375 = vst.msk [vmem:[#allocation2 + $0x58] sm:$0xf] %vm1352_vm9, %v1301_v9 }
 0x16a   : > { %1873 = vrot.lane.b32.xlu1 %v1782_v11, %s5787_s9  ;;  %v2068_v11 = vrot.slane %v5213_v4, 5 }
 0x16b   : > { %1871 = vrot.lane.b32.xlu0 %v1768_v14, %s5787_s9  ;;  %1869 = vrot.lane.b32.xlu2 %v1758_v16, %s5787_s9  ;;  %v5253_v14 = vrot.slane %v5211_v6, 9  ;;  %v2073_v16 = vsel %vm6060_vm6, %v5254_v7, %v2072_v8  ;;  %v5233_v6 = vld [vmem:[%s5874_s5 + $0x88] sm:$0xf] }
 0x16c   : > { %v1293_v21 = vpop.permute.xlu1 %1292  ;;  %v2069_v18 = vsel %vm6060_vm6, %v2067_v10, %v2068_v11  ;;  %v5229_v10 = vld [vmem:[%s5874_s5 + $0x78] sm:$0xe]  ;;  %v2114_v12 = vrot.slane %v5233_v6, 5 }
 0x16d   : > { %1371 = vst.msk [vmem:[#allocation2 + $0x48] sm:$0xf] %vm1352_vm9, %v1293_v21  ;;  %v1291_v23 = vpop.permute.xlu0 %1290  ;;  %v1307_v28 = vpop.permute.xlu2 %1306  ;;  %v2066_v21 = vsel %vm6060_vm6, %v5253_v14, %v2065_v3 }
 0x16e   : > { %1370 = vst.msk [vmem:[#allocation2 + $0x44] sm:$0xf] %vm1352_vm9, %v1291_v23  ;;  %v2081_v23 = vrot.slane %v2079_v17, 4 }
 0x16f   : > { %1378 = vst.msk [vmem:[#allocation2 + $0x64] sm:$0xf] %vm1352_vm9, %v1307_v28 }
 0x170   : > { %v2083_v35 = vsel %vm6060_vm6, %v2081_v23, %v2082_v24  ;;  %v5237_v23 = vld [vmem:[%s5874_s5 + $0x98] sm:$0x1]  ;;  %v5235_v24 = vld [vmem:[%s5874_s5 + $0x90] sm:$0xe] }
 0x172   : > { %1879 = vrot.lane.b32.xlu1 %v1816_v29, %s5787_s9  ;;  %v5221_v29 = vld [vmem:[%s5874_s5 + $0x58] sm:$0xf] }
 0x173   : > { %1877 = vrot.lane.b32.xlu0 %v1806_v31, %s5787_s9  ;;  %1875 = vrot.lane.b32.xlu2 %v1792_v36, %s5787_s9  ;;  %v2074_v31 = vrot.slane %v2072_v8, 4  ;;  %v5223_v36 = vld [vmem:[%s5874_s5 + $0x60] sm:$0xe]  ;;  %v2086_v30 = vrot.slane %v5221_v29, 5  ;;  %v5231_v8 = vld [vmem:[%s5874_s5 + $0x80] sm:$0x1] }
 0x174   : > { %v1299_v39 = vpop.permute.xlu1 %1298  ;;  %v5257_v41 = vrot.slane %v5223_v36, 9  ;;  %v2124_v29 = vrot.slane %v5237_v23, 5  ;;  %v2117_v36 = vrot.slane %v5234_v27, 5  ;;  %v5268_v27 = vld [vmem:[%s5874_s5 + $0x24] sm:$0xf] }
 0x175   : > { %1374 = vst.msk [vmem:[#allocation2 + $0x54] sm:$0xf] %vm1352_vm9, %v1299_v39  ;;  %v1297_v43 = vpop.permute.xlu0 %1296  ;;  %v1313_v45 = vpop.permute.xlu2 %1312  ;;  %v2076_v39 = vsel %vm6060_vm6, %v2074_v31, %v2075_v32  ;;  %v2088_v44 = vrot.slane %v2086_v30, 4  ;;  %v5261_v32 = vrot.slane %v5235_v24, 9 }
 0x176   : > { %1373 = vst.msk [vmem:[#allocation2 + $0x50] sm:$0xf] %vm1352_vm9, %v1297_v43  ;;  %v2094_v50 = vsel %vm6060_vm6, %v5257_v41, %v2093_v42 }
 0x177   : > { %1381 = vst.msk [vmem:[#allocation2 + $0x70] sm:$0xf] %vm1352_vm9, %v1313_v45  ;;  %v2089_v45 = vrot.slane %v5222_v38, 5 }
 0x179   : > { %v2090_v53 = vsel %vm6060_vm6, %v2088_v44, %v2089_v45  ;;  %v5238_v44 = vld [vmem:[%s5874_s5 + $0x9c] sm:$0xe] }
 0x17a   : > { %2158 = vrot.lane.b32.xlu1 %v2052_v46, %s5788_s10  ;;  %v5227_v46 = vld [vmem:[%s5874_s5 + $0x70] sm:$0xf] }
 0x17b   : > { %2156 = vrot.lane.b32.xlu0 %v2048_v48, %s5788_s10  ;;  %2154 = vrot.lane.b32.xlu2 %v2045_v51, %s5788_s10  ;;  %v5256_v48 = vrot.slane %v5220_v40, 9  ;;  %v2100_v51 = vrot.slane %v5227_v46, 5  ;;  %v5242_v40 = vld [vmem:[%s5874_s5 + $0xac] sm:$0xf] }
 0x17c   : > { %v1305_v56 = vpop.permute.xlu1 %1304  ;;  %v2135_v46 = vrot.slane %v5242_v40, 5  ;;  %v5273_v40 = vld [vmem:[%s5874_s5 + $0x40] sm:$0xf] }
 0x17d   : > { %1377 = vst.msk [vmem:[#allocation2 + $0x60] sm:$0xf] %vm1352_vm9, %v1305_v56  ;;  %v1303_v59 = vpop.permute.xlu0 %1302  ;;  %v1319_v63 = vpop.permute.xlu2 %1318  ;;  %v2087_v56 = vsel %vm6060_vm6, %v5256_v48, %v2086_v30  ;;  %v2101_v4 = vsel %vm6060_vm6, %v5258_v62, %v2100_v51  ;;  %v5243_v62 = vld [vmem:[%s5874_s5 + $0xb0] sm:$0x1] }
 0x17e   : > { %1376 = vst.msk [vmem:[#allocation2 + $0x5c] sm:$0xf] %vm1352_vm9, %v1303_v59  ;;  %v2102_v59 = vrot.slane %v2100_v51, 4 }
 0x17f   : > { %1384 = vst.msk [vmem:[#allocation2 + $0x7c] sm:$0xf] %vm1352_vm9, %v1319_v63 }
 0x180   : > { %v2104_v3 = vsel %vm6060_vm6, %v2102_v59, %v2103_v60  ;;  %v5246_v59 = vld [vmem:[%s5874_s5 + $0xbc] sm:$0x1]  ;;  %v5244_v60 = vld [vmem:[%s5874_s5 + $0xb4] sm:$0xe] }
 0x182   : > { %2164 = vrot.lane.b32.xlu1 %v2062_v52, %s5788_s10  ;;  %v5230_v52 = vld [vmem:[%s5874_s5 + $0x7c] sm:$0xf] }
 0x183   : > { %2162 = vrot.lane.b32.xlu0 %v2059_v58, %s5788_s10  ;;  %2160 = vrot.lane.b32.xlu2 %v2055_v5, %s5788_s10  ;;  %v2095_v58 = vrot.slane %v2093_v42, 4  ;;  %v5232_v5 = vld [vmem:[%s5874_s5 + $0x84] sm:$0xe]  ;;  %v2107_v7 = vrot.slane %v5230_v52, 5  ;;  %v5240_v42 = vld [vmem:[%s5874_s5 + $0xa4] sm:$0x1] }
 0x184   : > { %v1311_v9 = vpop.permute.xlu1 %1310  ;;  %v5260_v11 = vrot.slane %v5232_v5, 9  ;;  %v2145_v52 = vrot.slane %v5246_v59, 5  ;;  %v2138_v5 = vrot.slane %v5243_v62, 5  ;;  %v5283_v59 = vld [vmem:[%s5874_s5 + $0x7c] sm:$0xf] }
 0x185   : > { %1380 = vst.msk [vmem:[#allocation2 + $0x6c] sm:$0xf] %vm1352_vm9, %v1311_v9  ;;  %v1309_v13 = vpop.permute.xlu0 %1308  ;;  %v1822_v15 = vpop.permute.xlu2 %1821  ;;  %v2097_v9 = vsel %vm6060_vm6, %v2095_v58, %v2096_v0  ;;  %v2109_v14 = vrot.slane %v2107_v7, 4  ;;  %v5264_v0 = vrot.slane %v5244_v60, 9  ;;  %v5282_v60 = vld [vmem:[%s5874_s5 + $0x78] sm:$0xf] }
 0x186   : > { %1379 = vst.msk [vmem:[#allocation2 + $0x68] sm:$0xf] %vm1352_vm9, %v1309_v13  ;;  %v2115_v20 = vsel %vm6060_vm6, %v5260_v11, %v2114_v12 }
 0x187   : > { %1916 = vst.msk [vmem:[#allocation2 + $0x8] sm:$0xf] %vm1913_vm10, %v1822_v15  ;;  %v2110_v15 = vrot.slane %v5231_v8, 5 }
 0x189   : > { %v2111_v22 = vsel %vm6060_vm6, %v2109_v14, %v2110_v15 }
 0x18a   : > { %2170 = vrot.lane.b32.xlu1 %v2073_v16, %s5788_s10  ;;  %v5236_v16 = vld [vmem:[%s5874_s5 + $0x94] sm:$0xf] }
 0x18b   : > { %2168 = vrot.lane.b32.xlu0 %v2069_v18, %s5788_s10  ;;  %2166 = vrot.lane.b32.xlu2 %v2066_v21, %s5788_s10  ;;  %v5259_v18 = vrot.slane %v5229_v10, 9  ;;  %v2121_v21 = vrot.slane %v5236_v16, 5  ;;  %v5249_v10 = vld [vmem:[%s5874_s5 + $0xc8] sm:$0x1] }
 0x18c   : > { %v1317_v26 = vpop.permute.xlu1 %1316  ;;  %v2152_v15 = vrot.slane %v5249_v10, 5 }
 0x18d   : > { %1383 = vst.msk [vmem:[#allocation2 + $0x78] sm:$0xf] %vm1352_vm9, %v1317_v26  ;;  %v1315_v28 = vpop.permute.xlu0 %1314  ;;  %v1828_v34 = vpop.permute.xlu2 %1827  ;;  %v2108_v26 = vsel %vm6060_vm6, %v5259_v18, %v2107_v7  ;;  %v2122_v38 = vsel %vm6060_vm6, %v5261_v32, %v2121_v21 }
 0x18e   : > { %1382 = vst.msk [vmem:[#allocation2 + $0x74] sm:$0xf] %vm1352_vm9, %v1315_v28  ;;  %v2123_v28 = vrot.slane %v2121_v21, 4 }
 0x18f   : > { %1919 = vst.msk [vmem:[#allocation2 + $0x14] sm:$0xf] %vm1913_vm10, %v1828_v34 }
 0x190   : > { %v2125_v30 = vsel %vm6060_vm6, %v2123_v28, %v2124_v29  ;;  %v5267_v28 = vld [vmem:[%s5874_s5 + $0x1c] sm:$0xf] }
 0x192   : > { %2176 = vrot.lane.b32.xlu1 %v2083_v35, %s5788_s10  ;;  %v5239_v35 = vld [vmem:[%s5874_s5 + $0xa0] sm:$0xf] }
 0x193   : > { %2174 = vrot.lane.b32.xlu0 %v2080_v33, %s5788_s10  ;;  %2172 = vrot.lane.b32.xlu2 %v2076_v39, %s5788_s10  ;;  %v2116_v33 = vrot.slane %v2114_v12, 4  ;;  %v5241_v39 = vld [vmem:[%s5874_s5 + $0xa8] sm:$0xe]  ;;  %v2128_v41 = vrot.slane %v5239_v35, 5  ;;  %v5247_v12 = vld [vmem:[%s5874_s5 + $0xc0] sm:$0xe] }
 0x194   : > { %v1820_v43 = vpop.permute.xlu1 %1819  ;;  %v5263_v45 = vrot.slane %v5241_v39, 9  ;;  %v5271_v35 = vld [vmem:[%s5874_s5 + $0x34] sm:$0xf]  ;;  %v5274_v39 = vld [vmem:[%s5874_s5 + $0x48] sm:$0xf] }
 0x195   : > { %1915 = vst.msk [vmem:[#allocation2 + $0x4] sm:$0xf] %vm1913_vm10, %v1820_v43  ;;  %v1818_v47 = vpop.permute.xlu0 %1817  ;;  %v1834_v49 = vpop.permute.xlu2 %1833  ;;  %v2118_v43 = vsel %vm6060_vm6, %v2116_v33, %v2117_v36  ;;  %v2130_v48 = vrot.slane %v2128_v41, 4  ;;  %v5270_v33 = vld [vmem:[%s5874_s5 + $0x30] sm:$0xf] }
 0x196   : > { %1914 = vst.msk [vmem:[#allocation2] sm:$0xf] %vm1913_vm10, %v1818_v47  ;;  %v2136_v55 = vsel %vm6060_vm6, %v5263_v45, %v2135_v46  ;;  %v5277_v45 = vld [vmem:[%s5874_s5 + $0x58] sm:$0xf] }
 0x197   : > { %1922 = vst.msk [vmem:[#allocation2 + $0x20] sm:$0xf] %vm1913_vm10, %v1834_v49  ;;  %v2131_v49 = vrot.slane %v5240_v42, 5 }
 0x199   : > { %v2132_v57 = vsel %vm6060_vm6, %v2130_v48, %v2131_v49 }
 0x19a   : > { %2182 = vrot.lane.b32.xlu1 %v2094_v50, %s5788_s10  ;;  %v5245_v50 = vld [vmem:[%s5874_s5 + $0xb8] sm:$0xf] }
 0x19b   : > { %2180 = vrot.lane.b32.xlu0 %v2090_v53, %s5788_s10  ;;  %2178 = vrot.lane.b32.xlu2 %v2087_v56, %s5788_s10  ;;  %v5262_v53 = vrot.slane %v5238_v44, 9  ;;  %v2142_v56 = vrot.slane %v5245_v50, 5  ;;  %v5278_v44 = vld [vmem:[%s5874_s5 + $0x60] sm:$0xf]  ;;  %v5281_v50 = vld [vmem:[%s5874_s5 + $0x70] sm:$0xf] }
 0x19c   : > { %v1826_v61 = vpop.permute.xlu1 %1825 }
 0x19d   : > { %1918 = vst.msk [vmem:[#allocation2 + $0x10] sm:$0xf] %vm1913_vm10, %v1826_v61  ;;  %v1824_v63 = vpop.permute.xlu0 %1823  ;;  %v1840_v2 = vpop.permute.xlu2 %1839  ;;  %v2129_v61 = vsel %vm6060_vm6, %v5262_v53, %v2128_v41  ;;  %v2143_v8 = vsel %vm6060_vm6, %v5264_v0, %v2142_v56  ;;  %v5279_v53 = vld [vmem:[%s5874_s5 + $0x64] sm:$0xf]  ;;  %v5285_v0 = vld [vmem:[%s5874_s5 + $0x88] sm:$0xf] }
 0x19e   : > { %1917 = vst.msk [vmem:[#allocation2 + $0xc] sm:$0xf] %vm1913_vm10, %v1824_v63  ;;  %v2144_v63 = vrot.slane %v2142_v56, 4 }
 0x19f   : > { %1925 = vst.msk [vmem:[#allocation2 + $0x2c] sm:$0xf] %vm1913_vm10, %v1840_v2 }
 0x1a0   : > { %v2146_v7 = vsel %vm6060_vm6, %v2144_v63, %v2145_v52  ;;  %v5287_v52 = vld [vmem:[%s5874_s5 + $0x94] sm:$0xf] }
 0x1a2   : > { %2188 = vrot.lane.b32.xlu1 %v2104_v3, %s5788_s10  ;;  %v5248_v3 = vld [vmem:[%s5874_s5 + $0xc4] sm:$0xf] }
 0x1a3   : > { %2186 = vrot.lane.b32.xlu0 %v2101_v4, %s5788_s10  ;;  %2184 = vrot.lane.b32.xlu2 %v2097_v9, %s5788_s10  ;;  %v2137_v4 = vrot.slane %v2135_v46, 4  ;;  %v2149_v9 = vrot.slane %v5248_v3, 5  ;;  %v5276_v46 = vld [vmem:[%s5874_s5 + $0x54] sm:$0xf] }
 0x1a4   : > { %v1832_v13 = vpop.permute.xlu1 %1831 }
 0x1a5   : > { %1921 = vst.msk [vmem:[#allocation2 + $0x1c] sm:$0xf] %vm1913_vm10, %v1832_v13  ;;  %v1830_v17 = vpop.permute.xlu0 %1829  ;;  %v1846_v19 = vpop.permute.xlu2 %1845  ;;  %v2139_v11 = vsel %vm6060_vm6, %v2137_v4, %v2138_v5  ;;  %v2151_v14 = vrot.slane %v2149_v9, 4  ;;  %v5290_v5 = vld [vmem:[%s5874_s5 + $0xa8] sm:$0xf] }
 0x1a6   : > { %1920 = vst.msk [vmem:[#allocation2 + $0x18] sm:$0xf] %vm1913_vm10, %v1830_v17  ;;  %v5265_v17 = vrot.slane %v5247_v12, 9 }
 0x1a7   : > { %1928 = vst.msk [vmem:[#allocation2 + $0x38] sm:$0xf] %vm1913_vm10, %v1846_v19  ;;  %v5266_v19 = vld [vmem:[%s5874_s5 + $0x18] sm:$0xf] }
 0x1a8   : > { %v2150_v21 = vsel %vm6060_vm6, %v5265_v17, %v2149_v9 }
 0x1aa   : > { %2194 = vrot.lane.b32.xlu1 %v2115_v20, %s5788_s10  ;;  %v2153_v20 = vsel %vm6060_vm6, %v2151_v14, %v2152_v15  ;;  %v5293_v15 = vld [vmem:[%s5874_s5 + $0xb8] sm:$0xf] }
 0x1ab   : > { %2192 = vrot.lane.b32.xlu0 %v2111_v22, %s5788_s10  ;;  %2190 = vrot.lane.b32.xlu2 %v2108_v26, %s5788_s10  ;;  %v5269_v26 = vld [vmem:[%s5874_s5 + $0x28] sm:$0xf] }
 0x1ac   : > { %v1838_v31 = vpop.permute.xlu1 %1837 }
 0x1ad   : > { %1924 = vst.msk [vmem:[#allocation2 + $0x28] sm:$0xf] %vm1913_vm10, %v1838_v31  ;;  %v1836_v34 = vpop.permute.xlu0 %1835  ;;  %v1852_v37 = vpop.permute.xlu2 %1851 }
 0x1ae   : > { %1923 = vst.msk [vmem:[#allocation2 + $0x24] sm:$0xf] %vm1913_vm10, %v1836_v34  ;;  %v5272_v34 = vld [vmem:[%s5874_s5 + $0x3c] sm:$0xf] }
 0x1af   : > { %1931 = vst.msk [vmem:[#allocation2 + $0x44] sm:$0xf] %vm1913_vm10, %v1852_v37 }
 0x1b2   : > { %2200 = vrot.lane.b32.xlu1 %v2125_v30, %s5788_s10 }
 0x1b3   : > { %2198 = vrot.lane.b32.xlu0 %v2122_v38, %s5788_s10  ;;  %2196 = vrot.lane.b32.xlu2 %v2118_v43, %s5788_s10  ;;  %v5275_v38 = vld [vmem:[%s5874_s5 + $0x4c] sm:$0xf] }
 0x1b4   : > { %v1844_v47 = vpop.permute.xlu1 %1843 }
 0x1b5   : > { %1927 = vst.msk [vmem:[#allocation2 + $0x34] sm:$0xf] %vm1913_vm10, %v1844_v47  ;;  %v1842_v51 = vpop.permute.xlu0 %1841  ;;  %v1858_v54 = vpop.permute.xlu2 %1857 }
 0x1b6   : > { %1926 = vst.msk [vmem:[#allocation2 + $0x30] sm:$0xf] %vm1913_vm10, %v1842_v51  ;;  %v5280_v51 = vld [vmem:[%s5874_s5 + $0x6c] sm:$0xf] }
 0x1b7   : > { %1934 = vst.msk [vmem:[#allocation2 + $0x50] sm:$0xf] %vm1913_vm10, %v1858_v54 }
 0x1ba   : > { %2206 = vrot.lane.b32.xlu1 %v2136_v55, %s5788_s10 }
 0x1bb   : > { %2204 = vrot.lane.b32.xlu0 %v2132_v57, %s5788_s10  ;;  %2202 = vrot.lane.b32.xlu2 %v2129_v61, %s5788_s10  ;;  %v5284_v57 = vld [vmem:[%s5874_s5 + $0x84] sm:$0xf] }
 0x1bc   : > { %v1850_v58 = vpop.permute.xlu1 %1849 }
 0x1bd   : > { %1930 = vst.msk [vmem:[#allocation2 + $0x40] sm:$0xf] %vm1913_vm10, %v1850_v58  ;;  %v1848_v2 = vpop.permute.xlu0 %1847  ;;  %v1864_v6 = vpop.permute.xlu2 %1863  ;;  %v5286_v58 = vld [vmem:[%s5874_s5 + $0x90] sm:$0xf] }
 0x1be   : > { %1929 = vst.msk [vmem:[#allocation2 + $0x3c] sm:$0xf] %vm1913_vm10, %v1848_v2 }
 0x1bf   : > { %1937 = vst.msk [vmem:[#allocation2 + $0x5c] sm:$0xf] %vm1913_vm10, %v1864_v6  ;;  %v5289_v6 = vld [vmem:[%s5874_s5 + $0xa0] sm:$0xf] }
 0x1c2   : > { %2212 = vrot.lane.b32.xlu1 %v2146_v7, %s5788_s10  ;;  %v5288_v7 = vld [vmem:[%s5874_s5 + $0x9c] sm:$0xf] }
 0x1c3   : > { %2210 = vrot.lane.b32.xlu0 %v2143_v8, %s5788_s10  ;;  %2208 = vrot.lane.b32.xlu2 %v2139_v11, %s5788_s10  ;;  %v5299_v8 = vld [vmem:[%s5874_s5 + $0x1c] sm:$0xf] }
 0x1c4   : > { %v1856_v13 = vpop.permute.xlu1 %1855  ;;  %v2535_v11 = vshll.u32 %v5299_v8, 16  ;;  %v2539_v12 = vshrl.u32 %v5299_v8, 16  ;;  %v5297_v8 = vld [vmem:[%s5874_s5 + $0xd0] sm:$0xf] }
 0x1c5   : > { %1933 = vst.msk [vmem:[#allocation2 + $0x4c] sm:$0xf] %vm1913_vm10, %v1856_v13  ;;  %v1854_v16 = vpop.permute.xlu0 %1853  ;;  %v1870_v18 = vpop.permute.xlu2 %1869  ;;  %v5298_v13 = vld [vmem:[%s5874_s5 + $0x18] sm:$0xf] }
 0x1c6   : > { %1932 = vst.msk [vmem:[#allocation2 + $0x48] sm:$0xf] %vm1913_vm10, %v1854_v16  ;;  %v5292_v16 = vld [vmem:[%s5874_s5 + $0xb4] sm:$0xf]  ;;  %v2526_v17 = vshrl.u32 %v5298_v13, 16 }
 0x1c7   : > { %1940 = vst.msk [vmem:[#allocation2 + $0x68] sm:$0xf] %vm1913_vm10, %v1870_v18  ;;  %v2529_v18 = vshll.u32 %v5298_v13, 16 }
 0x1ca   : > { %2348 = vrot.lane.b32.xlu1 %v5266_v19, %s5789_s11  ;;  %v5291_v19 = vld [vmem:[%s5874_s5 + $0xac] sm:$0xf] }
 0x1cb   : > { %2216 = vrot.lane.b32.xlu0 %v2153_v20, %s5788_s10  ;;  %2214 = vrot.lane.b32.xlu2 %v2150_v21, %s5788_s10  ;;  %v6855_v20 = vrot.slane %v2535_v11, 5  ;;  %v2541_v21 = vrot.slane %v2539_v12, 4 }
 0x1cc   : > { %v1862_v22 = vpop.permute.xlu1 %1861 }
 0x1cd   : > { %1936 = vst.msk [vmem:[#allocation2 + $0x58] sm:$0xf] %vm1913_vm10, %v1862_v22  ;;  %v1860_v23 = vpop.permute.xlu0 %1859  ;;  %v1876_v24 = vpop.permute.xlu2 %1875  ;;  %v5300_v22 = vld [vmem:[%s5874_s5 + $0x20] sm:$0x1] }
 0x1ce   : > { %1935 = vst.msk [vmem:[#allocation2 + $0x54] sm:$0xf] %vm1913_vm10, %v1860_v23  ;;  %v5304_v23 = vld [vmem:[%s5874_s5 + $0x30] sm:$0xf] }
 0x1cf   : > { %1943 = vst.msk [vmem:[#allocation2 + $0x74] sm:$0xf] %vm1913_vm10, %v1876_v24 }
 0x1d2   : > { %2354 = vrot.lane.b32.xlu1 %v5269_v26, %s5789_s11  ;;  %v2528_v26 = vrot.slane %v2526_v17, 4 }
 0x1d3   : > { %2352 = vrot.lane.b32.xlu0 %v5268_v27, %s5789_s11  ;;  %2350 = vrot.lane.b32.xlu2 %v5267_v28, %s5789_s11  ;;  %v2531_v27 = vrot.slane %v2529_v18, 5  ;;  %v5302_v28 = vld [vmem:[%s5874_s5 + $0x28] sm:$0xf]  ;;  %v5309_v18 = vld [vmem:[%s5874_s5 + $0x44] sm:$0x1] }
 0x1d4   : > { %v1868_v29 = vpop.permute.xlu1 %1867 }
 0x1d5   : > { %1939 = vst.msk [vmem:[#allocation2 + $0x64] sm:$0xf] %vm1913_vm10, %v1868_v29  ;;  %v1866_v31 = vpop.permute.xlu0 %1865  ;;  %v2155_v32 = vpop.permute.xlu2 %2154 }
 0x1d6   : > { %1938 = vst.msk [vmem:[#allocation2 + $0x60] sm:$0xf] %vm1913_vm10, %v1866_v31  ;;  %v2542_v31 = vor.u32 %v2541_v21, %v6855_v20  ;;  %v5311_v21 = vld [vmem:[%s5874_s5 + $0x4c] sm:$0xf] }
 0x1d7   : > { %2251 = vst.msk [vmem:[#allocation2] sm:$0xf] %vm2250_vm11, %v2155_v32  ;;  %v2545_v32 = vshll.u32 %v5300_v22, 16 }
 0x1da   : > { %2360 = vrot.lane.b32.xlu1 %v5272_v34, %s5789_s11 }
 0x1db   : > { %2358 = vrot.lane.b32.xlu0 %v5271_v35, %s5789_s11  ;;  %2356 = vrot.lane.b32.xlu2 %v5270_v33, %s5789_s11  ;;  %v2574_v35 = vshrl.u32 %v5304_v23, 16  ;;  %v2577_v33 = vshll.u32 %v5304_v23, 16 }
 0x1dc   : > { %v1874_v36 = vpop.permute.xlu1 %1873 }
 0x1dd   : > { %1942 = vst.msk [vmem:[#allocation2 + $0x70] sm:$0xf] %vm1913_vm10, %v1874_v36  ;;  %v1872_v37 = vpop.permute.xlu0 %1871  ;;  %v2161_v30 = vpop.permute.xlu2 %2160  ;;  %v5301_v36 = vld [vmem:[%s5874_s5 + $0x24] sm:$0xf] }
 0x1de   : > { %1941 = vst.msk [vmem:[#allocation2 + $0x6c] sm:$0xf] %vm1913_vm10, %v1872_v37  ;;  %v5296_v37 = vld [vmem:[%s5874_s5 + $0xcc] sm:$0xf] }
 0x1df   : > { %2254 = vst.msk [vmem:[#allocation2 + $0xc] sm:$0xf] %vm2250_vm11, %v2161_v30  ;;  %v2559_v30 = vshll.u32 %v5302_v28, 16 }
 0x1e2   : > { %2366 = vrot.lane.b32.xlu1 %v5275_v38, %s5789_s11  ;;  %v2563_v38 = vshrl.u32 %v5302_v28, 16  ;;  %v2617_v28 = vshll.u32 %v5309_v18, 16 }
 0x1e3   : > { %2364 = vrot.lane.b32.xlu0 %v5274_v39, %s5789_s11  ;;  %2362 = vrot.lane.b32.xlu2 %v5273_v40, %s5789_s11  ;;  %v5295_v39 = vld [vmem:[%s5874_s5 + $0xc4] sm:$0xf]  ;;  %v2532_v40 = vor.u32 %v2531_v27, %v2528_v26  ;;  %v5310_v26 = vld [vmem:[%s5874_s5 + $0x48] sm:$0xf] }
 0x1e4   : > { %v1880_v41 = vpop.permute.xlu1 %1879 }
 0x1e5   : > { %1945 = vst.msk [vmem:[#allocation2 + $0x7c] sm:$0xf] %vm1913_vm10, %v1880_v41  ;;  %v1878_v42 = vpop.permute.xlu0 %1877  ;;  %v2167_v43 = vpop.permute.xlu2 %2166  ;;  %v2543_v41 = vrot.slane %v2542_v31, 4 }
 0x1e6   : > { %1944 = vst.msk [vmem:[#allocation2 + $0x78] sm:$0xf] %vm1913_vm10, %v1878_v42  ;;  %v2547_v42 = vrot.slane %v2545_v32, 5  ;;  %v5306_v32 = vld [vmem:[%s5874_s5 + $0x38] sm:$0x1] }
 0x1e7   : > { %2257 = vst.msk [vmem:[#allocation2 + $0x18] sm:$0xf] %vm2250_vm11, %v2167_v43  ;;  %v5294_v43 = vld [vmem:[%s5874_s5 + $0xc0] sm:$0xf] }
 0x1ea   : > { %2372 = vrot.lane.b32.xlu1 %v5278_v44, %s5789_s11  ;;  %v2550_v44 = vshrl.u32 %v5301_v36, 16 }
 0x1eb   : > { %2370 = vrot.lane.b32.xlu0 %v5277_v45, %s5789_s11  ;;  %2368 = vrot.lane.b32.xlu2 %v5276_v46, %s5789_s11  ;;  %v2553_v45 = vshll.u32 %v5301_v36, 16  ;;  %v2576_v46 = vrot.slane %v2574_v35, 4 }
 0x1ec   : > { %v2159_v47 = vpop.permute.xlu1 %2158 }
 0x1ed   : > { %2253 = vst.msk [vmem:[#allocation2 + $0x8] sm:$0xf] %vm2250_vm11, %v2159_v47  ;;  %v2157_v48 = vpop.permute.xlu0 %2156  ;;  %v2173_v49 = vpop.permute.xlu2 %2172  ;;  %v2579_v47 = vrot.slane %v2577_v33, 5 }
 0x1ee   : > { %2252 = vst.msk [vmem:[#allocation2 + $0x4] sm:$0xf] %vm2250_vm11, %v2157_v48  ;;  %v6873_v48 = vrot.slane %v2559_v30, 5  ;;  %v2635_v30 = vshrl.u32 %v5311_v21, 16 }
 0x1ef   : > { %2260 = vst.msk [vmem:[#allocation2 + $0x24] sm:$0xf] %vm2250_vm11, %v2173_v49  ;;  %v2565_v49 = vrot.slane %v2563_v38, 4  ;;  %v2622_v38 = vshrl.u32 %v5310_v26, 16 }
 0x1f2   : > { %2378 = vrot.lane.b32.xlu1 %v5281_v50, %s5789_s11  ;;  %v5308_v50 = vld [vmem:[%s5874_s5 + $0x40] sm:$0xf] }
 0x1f3   : > { %2376 = vrot.lane.b32.xlu0 %v5280_v51, %s5789_s11  ;;  %2374 = vrot.lane.b32.xlu2 %v5279_v53, %s5789_s11  ;;  %v5307_v51 = vld [vmem:[%s5874_s5 + $0x3c] sm:$0xf] }
 0x1f4   : > { %v2165_v54 = vpop.permute.xlu1 %2164 }
 0x1f5   : > { %2256 = vst.msk [vmem:[#allocation2 + $0x14] sm:$0xf] %vm2250_vm11, %v2165_v54  ;;  %v2163_v55 = vpop.permute.xlu0 %2162  ;;  %v2179_v56 = vpop.permute.xlu2 %2178  ;;  %v2533_v54 = vrot.slane %v2532_v40, 4 }
 0x1f6   : > { %2255 = vst.msk [vmem:[#allocation2 + $0x10] sm:$0xf] %vm2250_vm11, %v2163_v55  ;;  %v5305_v55 = vld [vmem:[%s5874_s5 + $0x34] sm:$0xf] }
 0x1f7   : > { %2263 = vst.msk [vmem:[#allocation2 + $0x30] sm:$0xf] %vm2250_vm11, %v2179_v56  ;;  %v5303_v56 = vld [vmem:[%s5874_s5 + $0x2c] sm:$0x1] }
 0x1fa   : > { %2384 = vrot.lane.b32.xlu1 %v5284_v57, %s5789_s11 }
 0x1fb   : > { %2382 = vrot.lane.b32.xlu0 %v5283_v59, %s5789_s11  ;;  %2380 = vrot.lane.b32.xlu2 %v5282_v60, %s5789_s11  ;;  %v2548_v59 = vsel %vm5885_vm2, %v2543_v41, %v2547_v42  ;;  %v2552_v60 = vrot.slane %v2550_v44, 4  ;;  %v2593_v42 = vshll.u32 %v5306_v32, 16  ;;  %v2619_v44 = vrot.slane %v2617_v28, 5 }
 0x1fc   : > { %v2171_v61 = vpop.permute.xlu1 %2170 }
 0x1fd   : > { %2259 = vst.msk [vmem:[#allocation2 + $0x20] sm:$0xf] %vm2250_vm11, %v2171_v61  ;;  %v2169_v62 = vpop.permute.xlu0 %2168  ;;  %v2185_v63 = vpop.permute.xlu2 %2184  ;;  %v2555_v61 = vrot.slane %v2553_v45, 5 }
 0x1fe   : > { %2258 = vst.msk [vmem:[#allocation2 + $0x1c] sm:$0xf] %vm2250_vm11, %v2169_v62 }
 0x1ff   : > { %2266 = vst.msk [vmem:[#allocation2 + $0x3c] sm:$0xf] %vm2250_vm11, %v2185_v63  ;;  %v2607_v63 = vshll.u32 %v5308_v50, 16 }
 0x202   : > { %2390 = vrot.lane.b32.xlu1 %v5287_v52, %s5789_s11  ;;  %v2611_v52 = vshrl.u32 %v5308_v50, 16  ;;  %v5317_v50 = vld [vmem:[%s5874_s5 + $0x64] sm:$0xf] }
 0x203   : > { %2388 = vrot.lane.b32.xlu0 %v5286_v58, %s5789_s11  ;;  %2386 = vrot.lane.b32.xlu2 %v5285_v0, %s5789_s11  ;;  %v2598_v58 = vshrl.u32 %v5307_v51, 16  ;;  %v2601_v0 = vshll.u32 %v5307_v51, 16 }
 0x204   : > { %v2177_v2 = vpop.permute.xlu1 %2176  ;;  %v2613_v11 = vrot.slane %v2611_v52, 4  ;;  %v2679_v52 = vshll.u32 %v5317_v50, 16 }
 0x205   : > { %2262 = vst.msk [vmem:[#allocation2 + $0x2c] sm:$0xf] %vm2250_vm11, %v2177_v2  ;;  %v2175_v3 = vpop.permute.xlu0 %2174  ;;  %v2191_v4 = vpop.permute.xlu2 %2190  ;;  %v2580_v2 = vor.u32 %v2579_v47, %v2576_v46  ;;  %v2600_v12 = vrot.slane %v2598_v58, 4  ;;  %v2603_v13 = vrot.slane %v2601_v0, 5  ;;  %v5314_v46 = vld [vmem:[%s5874_s5 + $0x58] sm:$0xf] }
 0x206   : > { %2261 = vst.msk [vmem:[#allocation2 + $0x28] sm:$0xf] %vm2250_vm11, %v2175_v3  ;;  %v2583_v3 = vshll.u32 %v5305_v55, 16  ;;  %v2683_v58 = vshrl.u32 %v5317_v50, 16  ;;  %v5323_v50 = vld [vmem:[%s5874_s5 + $0x7c] sm:$0xf] }
 0x207   : > { %2269 = vst.msk [vmem:[#allocation2 + $0x48] sm:$0xf] %vm2250_vm11, %v2191_v4  ;;  %v2566_v4 = vor.u32 %v2565_v49, %v6873_v48 }
 0x20a   : > { %2396 = vrot.lane.b32.xlu1 %v5290_v5, %s5789_s11  ;;  %v2569_v5 = vshll.u32 %v5303_v56, 16 }
 0x20b   : > { %2394 = vrot.lane.b32.xlu0 %v5289_v6, %s5789_s11  ;;  %2392 = vrot.lane.b32.xlu2 %v5288_v7, %s5789_s11  ;;  %v2538_v6 = vsel %vm5885_vm2, %v2533_v54, %v6855_v20  ;;  %v2587_v7 = vshrl.u32 %v5305_v55, 16  ;;  %v5313_v20 = vld [vmem:[%s5874_s5 + $0x54] sm:$0xf]  ;;  %v5316_v54 = vld [vmem:[%s5874_s5 + $0x60] sm:$0xf]  ;;  %v2624_v55 = vrot.slane %v2622_v38, 4 }
 0x20c   : > { %v2183_v9 = vpop.permute.xlu1 %2182  ;;  %v2571_v17 = vrot.slane %v2569_v5, 5  ;;  %v2646_v33 = vshrl.u32 %v5313_v20, 16  ;;  %v2649_v36 = vshll.u32 %v5313_v20, 16 }
 0x20d   : > { %2265 = vst.msk [vmem:[#allocation2 + $0x38] sm:$0xf] %vm2250_vm11, %v2183_v9  ;;  %v2181_v10 = vpop.permute.xlu0 %2180  ;;  %v2197_v14 = vpop.permute.xlu2 %2196  ;;  %v2556_v9 = vor.u32 %v2555_v61, %v2552_v60  ;;  %v2595_v61 = vrot.slane %v2593_v42, 5 }
 0x20e   : > { %2264 = vst.msk [vmem:[#allocation2 + $0x34] sm:$0xf] %vm2250_vm11, %v2181_v10  ;;  %v6891_v10 = vrot.slane %v2607_v63, 5  ;;  %v2648_v47 = vrot.slane %v2646_v33, 4  ;;  %v2651_v49 = vrot.slane %v2649_v36, 5 }
 0x20f   : > { %2272 = vst.msk [vmem:[#allocation2 + $0x54] sm:$0xf] %vm2250_vm11, %v2197_v14  ;;  %v2581_v14 = vrot.slane %v2580_v2, 4  ;;  %v2557_v23 = vrot.slane %v2556_v9, 4  ;;  %v2655_v2 = vshll.u32 %v5314_v46, 16  ;;  %v2659_v9 = vshrl.u32 %v5314_v46, 16 }
 0x210   : > { %v2614_v27 = vor.u32 %v2613_v11, %v6891_v10  ;;  %v2652_v0 = vor.u32 %v2651_v49, %v2648_v47 }
 0x211   : > { %v2562_v40 = vsel %vm5885_vm2, %v2557_v23, %v6873_v48  ;;  %v2637_v48 = vrot.slane %v2635_v30, 4  ;;  %v5320_v23 = vld [vmem:[%s5874_s5 + $0x70] sm:$0xf] }
 0x212   : > { %2402 = vrot.lane.b32.xlu1 %v5293_v15, %s5789_s11  ;;  %v2585_v15 = vrot.slane %v2583_v3, 5  ;;  %v2670_v3 = vshrl.u32 %v5316_v54, 16  ;;  %v2707_v30 = vshrl.u32 %v5320_v23, 16 }
 0x213   : > { %2400 = vrot.lane.b32.xlu0 %v5292_v16, %s5789_s11  ;;  %2398 = vrot.lane.b32.xlu2 %v5291_v19, %s5789_s11  ;;  %v2567_v16 = vrot.slane %v2566_v4, 4  ;;  %v2673_v4 = vshll.u32 %v5316_v54, 16  ;;  %v5321_v54 = vld [vmem:[%s5874_s5 + $0x74] sm:$0x1] }
 0x214   : > { %v2189_v24 = vpop.permute.xlu1 %2188 }
 0x215   : > { %2268 = vst.msk [vmem:[#allocation2 + $0x44] sm:$0xf] %vm2250_vm11, %v2189_v24  ;;  %v2187_v29 = vpop.permute.xlu0 %2186  ;;  %v2203_v34 = vpop.permute.xlu2 %2202  ;;  %v2589_v24 = vrot.slane %v2587_v7, 4  ;;  %v2572_v35 = vsel %vm5885_vm2, %v2567_v16, %v2571_v17  ;;  %v2653_v16 = vrot.slane %v2652_v0, 4  ;;  %v2672_v17 = vrot.slane %v2670_v3, 4 }
 0x216   : > { %2267 = vst.msk [vmem:[#allocation2 + $0x40] sm:$0xf] %vm2250_vm11, %v2187_v29  ;;  %v2604_v29 = vor.u32 %v2603_v13, %v2600_v12  ;;  %v5318_v12 = vld [vmem:[%s5874_s5 + $0x68] sm:$0x1]  ;;  %v6933_v13 = vrot.slane %v2679_v52, 5  ;;  %v2675_v18 = vrot.slane %v2673_v4, 5 }
 0x217   : > { %2275 = vst.msk [vmem:[#allocation2 + $0x60] sm:$0xf] %vm2250_vm11, %v2203_v34  ;;  %v2586_v34 = vsel %vm5885_vm2, %v2581_v14, %v2585_v15  ;;  %v2590_v41 = vor.u32 %v2589_v24, %v2585_v15  ;;  %v2685_v14 = vrot.slane %v2683_v58, 4  ;;  %v5322_v15 = vld [vmem:[%s5874_s5 + $0x78] sm:$0xf]  ;;  %v2727_v58 = vshll.u32 %v5323_v50, 16 }
 0x218   : > { %v2605_v45 = vrot.slane %v2604_v29, 4  ;;  %v2721_v28 = vshll.u32 %v5322_v15, 16  ;;  %v2661_v29 = vrot.slane %v2659_v9, 4  ;;  %v2676_v36 = vor.u32 %v2675_v18, %v2672_v17 }
 0x219   : > { %v2591_v60 = vrot.slane %v2590_v41, 4  ;;  %v2713_v3 = vshll.u32 %v5321_v54, 16  ;;  %v2731_v9 = vshrl.u32 %v5323_v50, 16 }
 0x21a   : > { %2408 = vrot.lane.b32.xlu1 %v5296_v37, %s5789_s11  ;;  %v2631_v37 = vshll.u32 %v5311_v21, 16  ;;  %v2610_v5 = vsel %vm5885_vm2, %v2605_v45, %v6891_v10  ;;  %v2657_v10 = vrot.slane %v2655_v2, 5  ;;  %v2723_v47 = vrot.slane %v2721_v28, 5 }
 0x21b   : > { %2406 = vrot.lane.b32.xlu0 %v5295_v39, %s5789_s11  ;;  %2404 = vrot.lane.b32.xlu2 %v5294_v43, %s5789_s11  ;;  %v2625_v39 = vshll.u32 %v5310_v26, 16  ;;  %v2615_v43 = vrot.slane %v2614_v27, 4  ;;  %v2596_v11 = vsel %vm5885_vm2, %v2591_v60, %v2595_v61  ;;  %v2689_v26 = vshll.u32 %v5318_v12, 16 }
 0x21c   : > { %v2195_v53 = vpop.permute.xlu1 %2194  ;;  %v2718_v27 = vshrl.u32 %v5322_v15, 16  ;;  %v2658_v33 = vsel %vm5885_vm2, %v2653_v16, %v2657_v10  ;;  %v2677_v49 = vrot.slane %v2676_v36, 4  ;;  %v2729_v15 = vrot.slane %v2727_v58, 5 }
 0x21d   : > { %2271 = vst.msk [vmem:[#allocation2 + $0x50] sm:$0xf] %vm2250_vm11, %v2195_v53  ;;  %v2193_v57 = vpop.permute.xlu0 %2192  ;;  %v2209_v62 = vpop.permute.xlu2 %2208  ;;  %v6916_v53 = vrot.slane %v2631_v37, 5  ;;  %v2627_v56 = vrot.slane %v2625_v39, 5  ;;  %v2703_v37 = vshll.u32 %v5320_v23, 16  ;;  %v2691_v45 = vrot.slane %v2689_v26, 5 }
 0x21e   : > { %2270 = vst.msk [vmem:[#allocation2 + $0x4c] sm:$0xf] %vm2250_vm11, %v2193_v57  ;;  %v2720_v46 = vrot.slane %v2718_v27, 4  ;;  %v2733_v26 = vrot.slane %v2731_v9, 4 }
 0x21f   : > { %2278 = vst.msk [vmem:[#allocation2 + $0x6c] sm:$0xf] %vm2250_vm11, %v2209_v62  ;;  %v2620_v62 = vsel %vm5885_vm2, %v2615_v43, %v2619_v44 }
 0x220   : > { %v2724_v52 = vor.u32 %v2723_v47, %v2720_v46  ;;  %v5362_v46 = vld [vmem:[%s5874_s5 + $0x58] sm:$0xf] }
 0x222   : > { %2911 = vrot.lane.b32.xlu1 %v2548_v59, %s5790_s12  ;;  %v5312_v59 = vld [vmem:[%s5874_s5 + $0x50] sm:$0x1] }
 0x223   : > { %2909 = vrot.lane.b32.xlu0 %v2538_v6, %s5790_s12  ;;  %2410 = vrot.lane.b32.xlu2 %v5297_v8, %s5789_s11  ;;  %v2638_v6 = vor.u32 %v2637_v48, %v6916_v53  ;;  %v2641_v7 = vshll.u32 %v5312_v59, 16  ;;  %v2628_v8 = vor.u32 %v2627_v56, %v2624_v55  ;;  %v5326_v55 = vld [vmem:[%s5874_s5 + $0x88] sm:$0xf]  ;;  %v5325_v56 = vld [vmem:[%s5874_s5 + $0x84] sm:$0xf] }
 0x224   : > { %v2201_v19 = vpop.permute.xlu1 %2200  ;;  %v2751_v4 = vshll.u32 %v5326_v55, 16 }
 0x225   : > { %2274 = vst.msk [vmem:[#allocation2 + $0x5c] sm:$0xf] %vm2250_vm11, %v2201_v19  ;;  %v2199_v22 = vpop.permute.xlu0 %2198  ;;  %v2215_v31 = vpop.permute.xlu2 %2214  ;;  %v2639_v20 = vrot.slane %v2638_v6, 4  ;;  %v2643_v21 = vrot.slane %v2641_v7, 5  ;;  %v2682_v6 = vsel %vm5885_vm2, %v2677_v49, %v6933_v13  ;;  %v2742_v7 = vshrl.u32 %v5325_v56, 16 }
 0x226   : > { %2273 = vst.msk [vmem:[#allocation2 + $0x58] sm:$0xf] %vm2250_vm11, %v2199_v22  ;;  %v2629_v22 = vrot.slane %v2628_v8, 4  ;;  %v2745_v8 = vshll.u32 %v5325_v56, 16  ;;  %v2753_v17 = vrot.slane %v2751_v4, 5 }
 0x227   : > { %2281 = vst.msk [vmem:[#allocation2 + $0x78] sm:$0xf] %vm2250_vm11, %v2215_v31  ;;  %v2686_v31 = vor.u32 %v2685_v14, %v6933_v13  ;;  %v2644_v38 = vsel %vm5885_vm2, %v2639_v20, %v2643_v21  ;;  %v2725_v14 = vrot.slane %v2724_v52, 4  ;;  %v2744_v20 = vrot.slane %v2742_v7, 4  ;;  %v3668_v7 = vld [vmem:[%s6993_s22 + $0xc] sm:$0x1] }
 0x228   : > { %v2634_v39 = vsel %vm5885_vm2, %v2629_v22, %v6916_v53  ;;  %v2709_v53 = vrot.slane %v2707_v30, 4  ;;  %v2747_v21 = vrot.slane %v2745_v8, 5  ;;  %v5328_v22 = vld [vmem:[%s5874_s5 + $0x90] sm:$0xf]  ;;  %v2734_v30 = vor.u32 %v2733_v26, %v2729_v15 }
 0x229   : > { %v2687_v44 = vrot.slane %v2686_v31, 4  ;;  %v2730_v27 = vsel %vm5885_vm2, %v2725_v14, %v2729_v15 }
 0x22a   : > { %2917 = vrot.lane.b32.xlu1 %v2586_v34, %s5790_s12  ;;  %v5315_v34 = vld [vmem:[%s5874_s5 + $0x5c] sm:$0x1]  ;;  %v2748_v36 = vor.u32 %v2747_v21, %v2744_v20  ;;  %v2735_v49 = vrot.slane %v2734_v30, 4  ;;  %v3705_v21 = vshll.u32 %v3668_v7, 16 }
 0x22b   : > { %2915 = vrot.lane.b32.xlu0 %v2572_v35, %s5790_s12  ;;  %2913 = vrot.lane.b32.xlu2 %v2562_v40, %s5790_s12  ;;  %v5319_v35 = vld [vmem:[%s5874_s5 + $0x6c] sm:$0xf]  ;;  %v2662_v40 = vor.u32 %v2661_v29, %v2657_v10  ;;  %v2665_v41 = vshll.u32 %v5315_v34, 16  ;;  %v2715_v10 = vrot.slane %v2713_v3, 5  ;;  %v5324_v29 = vld [vmem:[%s5874_s5 + $0x80] sm:$0x1] }
 0x22c   : > { %v2207_v51 = vpop.permute.xlu1 %2206  ;;  %v2694_v42 = vshrl.u32 %v5319_v35, 16  ;;  %v2697_v43 = vshll.u32 %v5319_v35, 16  ;;  %v2766_v34 = vshrl.u32 %v5328_v22, 16  ;;  %v2769_v35 = vshll.u32 %v5328_v22, 16 }
 0x22d   : > { %2277 = vst.msk [vmem:[#allocation2 + $0x68] sm:$0xf] %vm2250_vm11, %v2207_v51  ;;  %v2205_v57 = vpop.permute.xlu0 %2204  ;;  %v2351_v63 = vpop.permute.xlu2 %2350  ;;  %v6955_v51 = vrot.slane %v2703_v37, 5  ;;  %v2663_v59 = vrot.slane %v2662_v40, 4  ;;  %v2667_v60 = vrot.slane %v2665_v41, 5 }
 0x22e   : > { %2276 = vst.msk [vmem:[#allocation2 + $0x64] sm:$0xf] %vm2250_vm11, %v2205_v57  ;;  %v2696_v61 = vrot.slane %v2694_v42, 4  ;;  %v2768_v41 = vrot.slane %v2766_v34, 4  ;;  %v2771_v42 = vrot.slane %v2769_v35, 5 }
 0x22f   : > { %2446 = vst.msk [vmem:[#allocation2 + $0x4] sm:$0xf] %vm2444_vm12, %v2351_v63  ;;  %v2692_v63 = vsel %vm5885_vm2, %v2687_v44, %v2691_v45  ;;  %v2710_v2 = vor.u32 %v2709_v53, %v6955_v51  ;;  %v2749_v44 = vrot.slane %v2748_v36, 4  ;;  %v5329_v45 = vld [vmem:[%s5874_s5 + $0x94] sm:$0xf] }
 0x230   : > { %v2775_v56 = vshll.u32 %v5329_v45, 16  ;;  %v3828_v45 = vld [vmem:[%s6993_s22 + $0xc] sm:$0x1] }
 0x231   : > { %v2711_v16 = vrot.slane %v2710_v2, 4 }
 0x232   : > { %2923 = vrot.lane.b32.xlu1 %v2620_v62, %s5790_s12  ;;  %v2699_v62 = vrot.slane %v2697_v43, 5  ;;  %v7014_v3 = vrot.slane %v2775_v56, 5 }
 0x233   : > { %2921 = vrot.lane.b32.xlu0 %v2610_v5, %s5790_s12  ;;  %2919 = vrot.lane.b32.xlu2 %v2596_v11, %s5790_s12  ;;  %v2755_v5 = vshrl.u32 %v5326_v55, 16  ;;  %v2668_v11 = vsel %vm5885_vm2, %v2663_v59, %v2667_v60  ;;  %v2772_v55 = vor.u32 %v2771_v42, %v2768_v41  ;;  %v3171_v59 = vrot.slane %v5362_v46, 5 }
 0x234   : > { %v2213_v19 = vpop.permute.xlu1 %2212  ;;  %v2700_v12 = vor.u32 %v2699_v62, %v2696_v61  ;;  %v5363_v62 = vld [vmem:[%s5874_s5 + $0x5c] sm:$0x1] }
 0x235   : > { %2280 = vst.msk [vmem:[#allocation2 + $0x74] sm:$0xf] %vm2250_vm11, %v2213_v19  ;;  %v2211_v24 = vpop.permute.xlu0 %2210  ;;  %v2357_v32 = vpop.permute.xlu2 %2356  ;;  %v2757_v13 = vrot.slane %v2755_v5, 4  ;;  %v5327_v19 = vld [vmem:[%s5874_s5 + $0x8c] sm:$0x1]  ;;  %v2773_v2 = vrot.slane %v2772_v55, 4 }
 0x236   : > { %2279 = vst.msk [vmem:[#allocation2 + $0x70] sm:$0xf] %vm2250_vm11, %v2211_v24  ;;  %v2701_v24 = vrot.slane %v2700_v12, 4  ;;  %v3173_v5 = vrot.slane %v3171_v59, 4 }
 0x237   : > { %2449 = vst.msk [vmem:[#allocation2 + $0x10] sm:$0xf] %vm2444_vm12, %v2357_v32  ;;  %v2758_v31 = vor.u32 %v2757_v13, %v2753_v17  ;;  %v2761_v32 = vshll.u32 %v5327_v19, 16  ;;  %v3826_v19 = vld [vmem:[%s6993_s22 + $0x4] sm:$0x1] }
 0x238   : > { %v2706_v37 = vsel %vm5885_vm2, %v2701_v24, %v6955_v51  ;;  %v3667_v51 = vld [vmem:[%s6993_s22 + $0x8] sm:$0xf] }
 0x239   : > { %v2763_v40 = vrot.slane %v2761_v32, 5  ;;  %v3696_v60 = vshrl.u32 %v3667_v51, 16  ;;  %v3699_v61 = vshll.u32 %v3667_v51, 16 }
 0x23a   : > { %2929 = vrot.lane.b32.xlu1 %v2658_v33, %s5790_s12  ;;  %v2716_v33 = vsel %vm5885_vm2, %v2711_v16, %v2715_v10  ;;  %v3666_v10 = vld [vmem:[%s6993_s22 + $0x4] sm:$0x1] }
 0x23b   : > { %2927 = vrot.lane.b32.xlu0 %v2644_v38, %s5790_s12  ;;  %2925 = vrot.lane.b32.xlu2 %v2634_v39, %s5790_s12  ;;  %v2737_v38 = vshll.u32 %v5324_v29, 16  ;;  %v2759_v39 = vrot.slane %v2758_v31, 4  ;;  %v3698_v8 = vrot.slane %v3696_v60, 4  ;;  %v3701_v9 = vrot.slane %v3699_v61, 5  ;;  %v5506_v60 = vld [vmem:[%s6993_s22 + $0x8] sm:$0xf] }
 0x23c   : > { %v2349_v48 = vpop.permute.xlu1 %2348  ;;  %v3691_v24 = vshll.u32 %v3666_v10, 16  ;;  %v3707_v31 = vrot.slane %v3705_v21, 5  ;;  %v5530_v61 = vld [vmem:[%s6993_s22 + $0x8] sm:$0xe] }
 0x23d   : > { %2445 = vst.msk [vmem:[#allocation2] sm:$0xf] %vm2444_vm12, %v2349_v48  ;;  %v2217_v57 = vpop.permute.xlu0 %2216  ;;  %v2363_v0 = vpop.permute.xlu2 %2362  ;;  %v2739_v50 = vrot.slane %v2737_v38, 5  ;;  %v3665_v48 = vld [vmem:[%s6993_s22] sm:$0xf]  ;;  %v2764_v54 = vsel %vm5885_vm2, %v2759_v39, %v2763_v40  ;;  %v3702_v20 = vor.u32 %v3701_v9, %v3698_v8 }
 0x23e   : > { %2282 = vst.msk [vmem:[#allocation2 + $0x7c] sm:$0xf] %vm2250_vm11, %v2217_v57  ;;  %v2754_v57 = vsel %vm5885_vm2, %v2749_v44, %v2753_v17  ;;  %v3682_v52 = vshrl.u32 %v3665_v48, 16  ;;  %v3685_v58 = vshll.u32 %v3665_v48, 16  ;;  %v2778_v17 = vsel %vm5885_vm2, %v2773_v2, %v7014_v3  ;;  %v3827_v44 = vld [vmem:[%s6993_s22 + $0x8] sm:$0xe] }
 0x23f   : > { %2452 = vst.msk [vmem:[#allocation2 + $0x1c] sm:$0xf] %vm2444_vm12, %v2363_v0  ;;  %v5361_v0 = vld [vmem:[%s5874_s5 + $0x54] sm:$0xe]  ;;  %v3703_v29 = vrot.slane %v3702_v20, 4  ;;  %v3693_v35 = vrot.slane %v3691_v24, 5 }
 0x240   : > { %v5399_v12 = vrot.slane %v5361_v0, 9  ;;  %v3684_v14 = vrot.slane %v3682_v52, 4  ;;  %v3687_v15 = vrot.slane %v3685_v58, 5  ;;  %v3863_v48 = vrot.slane %v3828_v45, 5  ;;  %v5564_v9 = vld [vmem:[%s6993_s22 + $0x18] sm:$0xf] }
 0x241   : > { %v3708_v38 = vsel %vm5885_vm2, %v3703_v29, %v3707_v31  ;;  %v3671_v29 = vld [vmem:[%s6993_s22 + $0x18] sm:$0xf]  ;;  %v3669_v31 = vld [vmem:[%s6993_s22 + $0x10] sm:$0xf] }
 0x242   : > { %2935 = vrot.lane.b32.xlu1 %v2692_v63, %s5790_s12  ;;  %v2740_v63 = vsel %vm5885_vm2, %v2735_v49, %v2739_v50  ;;  %v3172_v22 = vsel %vm6060_vm6, %v5399_v12, %v3171_v59  ;;  %v5507_v59 = vld [vmem:[%s6993_s22 + $0x10] sm:$0xf] }
 0x243   : > { %2933 = vrot.lane.b32.xlu0 %v2682_v6, %s5790_s12  ;;  %2931 = vrot.lane.b32.xlu2 %v2668_v11, %s5790_s12  ;;  %v3174_v6 = vrot.slane %v5363_v62, 5  ;;  %v5531_v62 = vld [vmem:[%s6993_s22 + $0xc] sm:$0x1] }
 0x244   : > { %v2355_v18 = vpop.permute.xlu1 %2354 }
 0x245   : > { %2448 = vst.msk [vmem:[#allocation2 + $0xc] sm:$0xf] %vm2444_vm12, %v2355_v18  ;;  %v2353_v23 = vpop.permute.xlu0 %2352  ;;  %v2369_v28 = vpop.permute.xlu2 %2368  ;;  %v3175_v13 = vsel %vm6060_vm6, %v3173_v5, %v3174_v6  ;;  %v3825_v18 = vld [vmem:[%s6993_s22] sm:$0xe]  ;;  %v4164_v5 = vrot.slane %v5531_v62, 5 }
 0x246   : > { %2447 = vst.msk [vmem:[#allocation2 + $0x8] sm:$0xf] %vm2444_vm12, %v2353_v23  ;;  %v3688_v23 = vor.u32 %v3687_v15, %v3684_v14  ;;  %v5498_v26 = vrot.slane %v3825_v18, 9 }
 0x247   : > { %2455 = vst.msk [vmem:[#allocation2 + $0x28] sm:$0xf] %vm2444_vm12, %v2369_v28 }
 0x248   : > { %v3689_v34 = vrot.slane %v3688_v23, 4  ;;  %v5533_v23 = vld [vmem:[%s6993_s22 + $0x14] sm:$0x1] }
 0x24a   : > { %2941 = vrot.lane.b32.xlu1 %v2730_v27, %s5790_s12  ;;  %v3859_v27 = vrot.slane %v3826_v19, 5  ;;  %v3694_v41 = vsel %vm5885_vm2, %v3689_v34, %v3693_v35  ;;  %v5555_v34 = vld [vmem:[%s6993_s22 + $0x18] sm:$0xf] }
 0x24b   : > { %2939 = vrot.lane.b32.xlu0 %v2716_v33, %s5790_s12  ;;  %2937 = vrot.lane.b32.xlu2 %v2706_v37, %s5790_s12  ;;  %v5516_v33 = vld [vmem:[%s6993_s22 + $0x10] sm:$0xf]  ;;  %v5514_v37 = vld [vmem:[%s6993_s22 + $0x8] sm:$0xf] }
 0x24c   : > { %v2361_v43 = vpop.permute.xlu1 %2360  ;;  %v3860_v30 = vsel %vm6060_vm6, %v5498_v26, %v3859_v27  ;;  %v4001_v39 = vshrl.u32 %v5516_v33, 16  ;;  %v4004_v40 = vshll.u32 %v5516_v33, 16  ;;  %v3987_v42 = vshrl.u32 %v5514_v37, 16 }
 0x24d   : > { %2451 = vst.msk [vmem:[#allocation2 + $0x18] sm:$0xf] %vm2444_vm12, %v2361_v43  ;;  %v2359_v47 = vpop.permute.xlu0 %2358  ;;  %v2375_v53 = vpop.permute.xlu2 %2374  ;;  %v3990_v43 = vshll.u32 %v5514_v37, 16  ;;  %v4168_v33 = vrot.slane %v5533_v23, 5 }
 0x24e   : > { %2450 = vst.msk [vmem:[#allocation2 + $0x14] sm:$0xf] %vm2444_vm12, %v2359_v47  ;;  %v5517_v47 = vld [vmem:[%s6993_s22 + $0x14] sm:$0x1]  ;;  %v4003_v49 = vrot.slane %v4001_v39, 4  ;;  %v4006_v50 = vrot.slane %v4004_v40, 5 }
 0x24f   : > { %2458 = vst.msk [vmem:[#allocation2 + $0x34] sm:$0xf] %vm2444_vm12, %v2375_v53  ;;  %v5499_v53 = vrot.slane %v3827_v44, 9  ;;  %v3992_v55 = vrot.slane %v3990_v43, 5  ;;  %v4010_v52 = vshll.u32 %v5517_v47, 16  ;;  %v3713_v47 = vshll.u32 %v3669_v31, 16 }
 0x250   : > { %v5563_v39 = vld [vmem:[%s6993_s22 + $0x14] sm:$0x1]  ;;  %v5578_v40 = vld [vmem:[%s6993_s22 + $0x10] sm:$0xe] }
 0x251   : > { %v3864_v58 = vsel %vm6060_vm6, %v5499_v53, %v3863_v48  ;;  %v4012_v8 = vrot.slane %v4010_v52, 5  ;;  %v5579_v43 = vld [vmem:[%s6993_s22 + $0x14] sm:$0x1]  ;;  %v5594_v53 = vrot.slane %v5578_v40, 9  ;;  %v3715_v62 = vrot.slane %v3713_v47, 5 }
 0x252   : > { %2947 = vrot.lane.b32.xlu1 %v2764_v54, %s5790_s12  ;;  %v3989_v54 = vrot.slane %v3987_v42, 4  ;;  %v3727_v42 = vshll.u32 %v3671_v29, 16  ;;  %v4469_v48 = vrot.slane %v5579_v43, 5  ;;  %v3670_v52 = vld [vmem:[%s6993_s22 + $0x14] sm:$0x1] }
 0x253   : > { %2945 = vrot.lane.b32.xlu0 %v2754_v57, %s5790_s12  ;;  %2943 = vrot.lane.b32.xlu2 %v2740_v63, %s5790_s12  ;;  %v5515_v57 = vld [vmem:[%s6993_s22 + $0xc] sm:$0x1]  ;;  %v4007_v63 = vor.u32 %v4006_v50, %v4003_v49 }
 0x254   : > { %v2367_v4 = vpop.permute.xlu1 %2366  ;;  %v3993_v0 = vor.u32 %v3992_v55, %v3989_v54  ;;  %v3996_v2 = vshll.u32 %v5515_v57, 16  ;;  %v3729_v55 = vrot.slane %v3727_v42, 5 }
 0x255   : > { %2454 = vst.msk [vmem:[#allocation2 + $0x24] sm:$0xf] %vm2444_vm12, %v2367_v4  ;;  %v2365_v11 = vpop.permute.xlu0 %2364  ;;  %v2381_v16 = vpop.permute.xlu2 %2380  ;;  %v5546_v4 = vrot.slane %v5530_v61, 9  ;;  %v4008_v7 = vrot.slane %v4007_v63, 4 }
 0x256   : > { %2453 = vst.msk [vmem:[#allocation2 + $0x20] sm:$0xf] %vm2444_vm12, %v2365_v11  ;;  %v3994_v12 = vrot.slane %v3993_v0, 4  ;;  %v3998_v14 = vrot.slane %v3996_v2, 5 }
 0x257   : > { %2461 = vst.msk [vmem:[#allocation2 + $0x40] sm:$0xf] %vm2444_vm12, %v2381_v16  ;;  %v5562_v16 = vld [vmem:[%s6993_s22 + $0x10] sm:$0xf]  ;;  %v4165_v10 = vsel %vm6060_vm6, %v5546_v4, %v4164_v5  ;;  %v4013_v18 = vsel %vm5885_vm2, %v4008_v7, %v4012_v8  ;;  %v4470_v4 = vsel %vm6060_vm6, %v5594_v53, %v4469_v48 }
 0x258   : > { %v3999_v19 = vsel %vm5885_vm2, %v3994_v12, %v3998_v14  ;;  %v4292_v20 = vshrl.u32 %v5562_v16, 16  ;;  %v4295_v21 = vshll.u32 %v5562_v16, 16  ;;  %v5580_v12 = vld [vmem:[%s6993_s22 + $0x18] sm:$0xe]  ;;  %v5581_v14 = vld [vmem:[%s6993_s22 + $0x1c] sm:$0x1] }
 0x25a   : > { %2949 = vrot.lane.b32.xlu1 %v2778_v17, %s5790_s12  ;;  %v4306_v17 = vshrl.u32 %v5564_v9, 16  ;;  %v4297_v37 = vrot.slane %v4295_v21, 5  ;;  %v4473_v21 = vrot.slane %v5581_v14, 5  ;;  %v5534_v14 = vld [vmem:[%s6993_s22 + $0x18] sm:$0xe] }
 0x25b   : > { %3268 = vrot.lane.b32.xlu0 %v3175_v13, %s5791_s23  ;;  %3266 = vrot.lane.b32.xlu2 %v3172_v22, %s5791_s23  ;;  %v4309_v13 = vshll.u32 %v5564_v9, 16  ;;  %v5532_v22 = vld [vmem:[%s6993_s22 + $0x10] sm:$0xe]  ;;  %v3719_v9 = vshll.u32 %v3670_v52, 16 }
 0x25c   : > { %v2373_v28 = vpop.permute.xlu1 %2372  ;;  %v4308_v24 = vrot.slane %v4306_v17, 4  ;;  %v5547_v35 = vrot.slane %v5532_v22, 9  ;;  %v5518_v22 = vld [vmem:[%s6993_s22 + $0x18] sm:$0xf] }
 0x25d   : > { %2457 = vst.msk [vmem:[#allocation2 + $0x30] sm:$0xf] %vm2444_vm12, %v2373_v28  ;;  %v2371_v32 = vpop.permute.xlu0 %2370  ;;  %v2387_v36 = vpop.permute.xlu2 %2386  ;;  %v4311_v26 = vrot.slane %v4309_v13, 5  ;;  %v5565_v28 = vld [vmem:[%s6993_s22 + $0x1c] sm:$0x1]  ;;  %v3721_v13 = vrot.slane %v3719_v9, 5 }
 0x25e   : > { %2456 = vst.msk [vmem:[#allocation2 + $0x2c] sm:$0xf] %vm2444_vm12, %v2371_v32  ;;  %v4315_v45 = vshll.u32 %v5565_v28, 16  ;;  %v4169_v49 = vsel %vm6060_vm6, %v5547_v35, %v4168_v33  ;;  %v3829_v33 = vld [vmem:[%s6993_s22 + $0x10] sm:$0xe] }
 0x25f   : > { %2464 = vst.msk [vmem:[#allocation2 + $0x4c] sm:$0xf] %vm2444_vm12, %v2387_v36  ;;  %v4294_v36 = vrot.slane %v4292_v20, 4  ;;  %v4312_v44 = vor.u32 %v4311_v26, %v4308_v24  ;;  %v5595_v20 = vrot.slane %v5580_v12, 9  ;;  %v5536_v9 = vld [vmem:[%s6993_s22 + $0x20] sm:$0xe] }
 0x260   : > { %v5509_v12 = vld [vmem:[%s6993_s22 + $0x20] sm:$0xf] }
 0x261   : > { %v4298_v50 = vor.u32 %v4297_v37, %v4294_v36  ;;  %v4313_v57 = vrot.slane %v4312_v44, 4  ;;  %v4474_v35 = vsel %vm6060_vm6, %v5595_v20, %v4473_v21  ;;  %v3830_v36 = vld [vmem:[%s6993_s22 + $0x14] sm:$0x1]  ;;  %v5569_v20 = vld [vmem:[%s6993_s22 + $0x2c] sm:$0x1] }
 0x262   : > { %3889 = vrot.lane.b32.xlu1 %v3860_v30, %s5785_s7  ;;  %v5554_v30 = vld [vmem:[%s6993_s22 + $0x10] sm:$0xf]  ;;  %v3867_v47 = vrot.slane %v3830_v36, 5 }
 0x263   : > { %3795 = vrot.lane.b32.xlu0 %v3708_v38, %s5784_s6  ;;  %3793 = vrot.lane.b32.xlu2 %v3694_v41, %s5784_s6  ;;  %v3724_v41 = vshrl.u32 %v3671_v29, 16  ;;  %v4015_v29 = vshrl.u32 %v5518_v22, 16 }
 0x264   : > { %v2379_v46 = vpop.permute.xlu1 %2378 }
 0x265   : > { %2460 = vst.msk [vmem:[#allocation2 + $0x3c] sm:$0xf] %vm2444_vm12, %v2379_v46  ;;  %v2377_v51 = vpop.permute.xlu0 %2376  ;;  %v2393_v56 = vpop.permute.xlu2 %2392  ;;  %v3710_v46 = vshrl.u32 %v3669_v31, 16  ;;  %v3726_v54 = vrot.slane %v3724_v41, 4  ;;  %v4018_v31 = vshll.u32 %v5518_v22, 16  ;;  %v4017_v42 = vrot.slane %v4015_v29, 4 }
 0x266   : > { %2459 = vst.msk [vmem:[#allocation2 + $0x38] sm:$0xf] %vm2444_vm12, %v2377_v51  ;;  %v4301_v51 = vshll.u32 %v5563_v39, 16  ;;  %v5521_v41 = vld [vmem:[%s6993_s22 + $0x24] sm:$0x1] }
 0x267   : > { %2467 = vst.msk [vmem:[#allocation2 + $0x58] sm:$0xf] %vm2444_vm12, %v2393_v56  ;;  %v3712_v61 = vrot.slane %v3710_v46, 4  ;;  %v3730_v5 = vor.u32 %v3729_v55, %v3726_v54  ;;  %v4020_v43 = vrot.slane %v4018_v31, 5  ;;  %v5500_v46 = vrot.slane %v3829_v33, 9 }
 0x268   : > { %v4303_v0 = vrot.slane %v4301_v51, 5  ;;  %v4038_v53 = vshll.u32 %v5521_v41, 16 }
 0x269   : > { %v3716_v8 = vor.u32 %v3715_v62, %v3712_v61  ;;  %v4021_v54 = vor.u32 %v4020_v43, %v4017_v42 }
 0x26a   : > { %3940 = vrot.lane.b32.xlu1 %v5507_v59, %s5786_s8  ;;  %v4317_v59 = vrot.slane %v4315_v45, 5  ;;  %v5519_v45 = vld [vmem:[%s6993_s22 + $0x1c] sm:$0x1] }
 0x26b   : > { %3938 = vrot.lane.b32.xlu0 %v5506_v60, %s5786_s8  ;;  %3891 = vrot.lane.b32.xlu2 %v3864_v58, %s5785_s7  ;;  %v3672_v60 = vld [vmem:[%s6993_s22 + $0x1c] sm:$0x1]  ;;  %v4299_v58 = vrot.slane %v4298_v50, 4  ;;  %v3717_v17 = vrot.slane %v3716_v8, 4  ;;  %v5508_v50 = vld [vmem:[%s6993_s22 + $0x18] sm:$0xf] }
 0x26c   : > { %v2385_v6 = vpop.permute.xlu1 %2384  ;;  %v4318_v7 = vsel %vm5885_vm2, %v4313_v57, %v4317_v59  ;;  %v4024_v55 = vshll.u32 %v5519_v45, 16  ;;  %v4040_v59 = vrot.slane %v4038_v53, 5  ;;  %v4022_v61 = vrot.slane %v4021_v54, 4  ;;  %v5332_v45 = vld [vmem:[%s5874_s5 + $0xa0] sm:$0xf] }
 0x26d   : > { %2463 = vst.msk [vmem:[#allocation2 + $0x48] sm:$0xf] %vm2444_vm12, %v2385_v6  ;;  %v2383_v11 = vpop.permute.xlu0 %2382  ;;  %v2399_v15 = vpop.permute.xlu2 %2398  ;;  %v3733_v6 = vshll.u32 %v3672_v60, 16  ;;  %v3722_v28 = vsel %vm5885_vm2, %v3717_v17, %v3721_v13  ;;  %v5331_v17 = vld [vmem:[%s5874_s5 + $0x9c] sm:$0xf] }
 0x26e   : > { %2462 = vst.msk [vmem:[#allocation2 + $0x44] sm:$0xf] %vm2444_vm12, %v2383_v11  ;;  %v4304_v11 = vsel %vm5885_vm2, %v4299_v58, %v4303_v0  ;;  %v4026_v62 = vrot.slane %v4024_v55, 5  ;;  %v5566_v58 = vld [vmem:[%s6993_s22 + $0x20] sm:$0xf]  ;;  %v2790_v29 = vshrl.u32 %v5331_v17, 16 }
 0x26f   : > { %2470 = vst.msk [vmem:[#allocation2 + $0x64] sm:$0xf] %vm2444_vm12, %v2399_v15  ;;  %v3731_v15 = vrot.slane %v3730_v5, 4  ;;  %v3735_v16 = vrot.slane %v3733_v6, 5  ;;  %v4323_v8 = vshll.u32 %v5566_v58, 16  ;;  %v2793_v31 = vshll.u32 %v5331_v17, 16 }
 0x270   : > { %v4027_v6 = vsel %vm5885_vm2, %v4022_v61, %v4026_v62  ;;  %v5585_v54 = vld [vmem:[%s6993_s22 + $0x2c] sm:$0x1]  ;;  %v2803_v55 = vshrl.u32 %v5332_v45, 16  ;;  %v5583_v61 = vld [vmem:[%s6993_s22 + $0x24] sm:$0x1] }
 0x271   : > { %v3736_v24 = vsel %vm5885_vm2, %v3731_v15, %v3735_v16  ;;  %v5535_v15 = vld [vmem:[%s6993_s22 + $0x1c] sm:$0x1]  ;;  %v4325_v22 = vrot.slane %v4323_v8, 5 }
 0x272   : > { %4194 = vrot.lane.b32.xlu1 %v4165_v10, %s5788_s10 }
 0x273   : > { %4100 = vrot.lane.b32.xlu0 %v4013_v18, %s5787_s9  ;;  %4098 = vrot.lane.b32.xlu2 %v3999_v19, %s5787_s9  ;;  %v5520_v18 = vld [vmem:[%s6993_s22 + $0x20] sm:$0xf] }
 0x274   : > { %v2391_v27 = vpop.permute.xlu1 %2390  ;;  %v4029_v26 = vshrl.u32 %v5520_v18, 16 }
 0x275   : > { %2466 = vst.msk [vmem:[#allocation2 + $0x54] sm:$0xf] %vm2444_vm12, %v2391_v27  ;;  %v2389_v32 = vpop.permute.xlu0 %2388  ;;  %v2405_v38 = vpop.permute.xlu2 %2404  ;;  %v4032_v27 = vshll.u32 %v5520_v18, 16  ;;  %v5549_v18 = vrot.slane %v5536_v9, 9  ;;  %v4477_v9 = vrot.slane %v5583_v61, 5 }
 0x276   : > { %2465 = vst.msk [vmem:[#allocation2 + $0x50] sm:$0xf] %vm2444_vm12, %v2389_v32  ;;  %v3831_v32 = vld [vmem:[%s6993_s22 + $0x18] sm:$0xe]  ;;  %v4031_v37 = vrot.slane %v4029_v26, 4  ;;  %v5548_v26 = vrot.slane %v5534_v14, 9 }
 0x277   : > { %2473 = vst.msk [vmem:[#allocation2 + $0x70] sm:$0xf] %vm2444_vm12, %v2405_v38  ;;  %v5501_v39 = vrot.slane %v3831_v32, 9  ;;  %v5556_v32 = vld [vmem:[%s6993_s22 + $0x20] sm:$0xf] }
 0x278   : > { %v5333_v14 = vld [vmem:[%s5874_s5 + $0xa4] sm:$0x1] }
 0x27a   : > { %4245 = vrot.lane.b32.xlu1 %v5555_v34, %s5789_s11  ;;  %v3832_v34 = vld [vmem:[%s6993_s22 + $0x1c] sm:$0x1] }
 0x27b   : > { %4243 = vrot.lane.b32.xlu0 %v5554_v30, %s5789_s11  ;;  %4196 = vrot.lane.b32.xlu2 %v4169_v49, %s5788_s10  ;;  %v4034_v30 = vrot.slane %v4032_v27, 5  ;;  %v3871_v40 = vrot.slane %v3832_v34, 5  ;;  %v4172_v27 = vrot.slane %v5535_v15, 5 }
 0x27c   : > { %v2397_v56 = vpop.permute.xlu1 %2396 }
 0x27d   : > { %2469 = vst.msk [vmem:[#allocation2 + $0x60] sm:$0xf] %vm2444_vm12, %v2397_v56  ;;  %v2395_v63 = vpop.permute.xlu0 %2394  ;;  %v2411_v2 = vpop.permute.xlu2 %2410  ;;  %v4035_v51 = vor.u32 %v4034_v30, %v4031_v37  ;;  %v3872_v48 = vsel %vm6060_vm6, %v5501_v39, %v3871_v40  ;;  %v3868_v56 = vsel %vm6060_vm6, %v5500_v46, %v3867_v47  ;;  %v4173_v30 = vsel %vm6060_vm6, %v5548_v26, %v4172_v27 }
 0x27e   : > { %2468 = vst.msk [vmem:[#allocation2 + $0x5c] sm:$0xf] %vm2444_vm12, %v2395_v63  ;;  %v5568_v63 = vld [vmem:[%s6993_s22 + $0x28] sm:$0xf]  ;;  %v2795_v39 = vrot.slane %v2793_v31, 5  ;;  %v5635_v31 = vld [vmem:[%s7823_s2] sm:$0xff] }
 0x27f   : > { %2476 = vst.msk [vmem:[#allocation2 + $0x7c] sm:$0xf] %vm2444_vm12, %v2411_v2  ;;  %v4036_v57 = vrot.slane %v4035_v51, 4  ;;  %v4337_v5 = vshll.u32 %v5568_v63, 16  ;;  %v2799_v51 = vshll.u32 %v5332_v45, 16 }
 0x281   : > { %v4041_v2 = vsel %vm5885_vm2, %v4036_v57, %v4040_v59  ;;  %v221_v57 = vld [vmem:[%s7823_s2 + $0x10] sm:$0x3] }
 0x282   : > { %4499 = vrot.lane.b32.xlu1 %v4470_v4, %s5791_s23  ;;  %v4334_v4 = vshrl.u32 %v5568_v63, 16  ;;  %v3496_v62 = vunpack.c.l.b16 %v221_v57  ;;  %v2801_v63 = vrot.slane %v2799_v51, 5  ;;  %v5379_v51 = vld [vmem:[%s5874_s5 + $0x9c] sm:$0xe] }
 0x283   : > { %4405 = vrot.lane.b32.xlu0 %v4318_v7, %s5790_s12  ;;  %4403 = vrot.lane.b32.xlu2 %v4304_v11, %s5790_s12  ;;  %v4320_v7 = vshrl.u32 %v5566_v58, 16  ;;  %v5537_v11 = vld [vmem:[%s6993_s22 + $0x24] sm:$0x1]  ;;  %v4481_v58 = vrot.slane %v5585_v54, 5 }
 0x284   : > { %v2403_v10 = vpop.permute.xlu1 %2402  ;;  %v4336_v16 = vrot.slane %v4334_v4, 4  ;;  %v5365_v4 = vld [vmem:[%s5874_s5 + $0x64] sm:$0xf] }
 0x285   : > { %2472 = vst.msk [vmem:[#allocation2 + $0x6c] sm:$0xf] %vm2444_vm12, %v2403_v10  ;;  %v2401_v19 = vpop.permute.xlu0 %2400  ;;  %v2914_v23 = vpop.permute.xlu2 %2913  ;;  %v4339_v10 = vrot.slane %v4337_v5, 5  ;;  %v4322_v21 = vrot.slane %v4320_v7, 4  ;;  %v3673_v5 = vld [vmem:[%s6993_s22 + $0x20] sm:$0xf] }
 0x286   : > { %2471 = vst.msk [vmem:[#allocation2 + $0x68] sm:$0xf] %vm2444_vm12, %v2401_v19  ;;  %v4176_v19 = vrot.slane %v5537_v11, 5  ;;  %v2805_v11 = vrot.slane %v2803_v55, 4  ;;  %v3738_v17 = vshrl.u32 %v3673_v5, 16 }
 0x287   : > { %3008 = vst.msk [vmem:[#allocation2 + $0x8] sm:$0xf] %vm3005_vm13, %v2914_v23  ;;  %v4340_v34 = vor.u32 %v4339_v10, %v4336_v16  ;;  %v4326_v36 = vor.u32 %v4325_v22, %v4322_v21  ;;  %v3178_v10 = vrot.slane %v5365_v4, 5  ;;  %v5364_v21 = vld [vmem:[%s5874_s5 + $0x60] sm:$0xe] }
 0x288   : > { %v4177_v33 = vsel %vm6060_vm6, %v5549_v18, %v4176_v19  ;;  %v5636_v18 = vld [vmem:[%s7823_s2 + $0x8] sm:$0xff]  ;;  %v3833_v4 = vld [vmem:[%s6993_s22 + $0x20] sm:$0xe] }
 0x289   : > { %v4341_v40 = vrot.slane %v4340_v34, 4  ;;  %v4327_v43 = vrot.slane %v4326_v36, 4  ;;  %v3180_v26 = vrot.slane %v3178_v10, 4  ;;  %v5400_v34 = vrot.slane %v5364_v21, 9 }
 0x28a   : > { %3799 = vrot.lane.b32.xlu1 %v3736_v24, %s5784_s6  ;;  %v5567_v24 = vld [vmem:[%s6993_s22 + $0x24] sm:$0x1] }
 0x28b   : > { %3797 = vrot.lane.b32.xlu0 %v3722_v28, %s5784_s6  ;;  %4501 = vrot.lane.b32.xlu2 %v4474_v35, %s5791_s23  ;;  %v4343_v35 = vshll.u32 %v5569_v20, 16  ;;  %v4329_v37 = vshll.u32 %v5567_v24, 16  ;;  %v5366_v20 = vld [vmem:[%s5874_s5 + $0x68] sm:$0x1]  ;;  %v2809_v24 = vshll.u32 %v5333_v14, 16  ;;  %v5502_v14 = vrot.slane %v3833_v4, 9 }
 0x28c   : > { %v2409_v38 = vpop.permute.xlu1 %2408  ;;  %v3181_v27 = vrot.slane %v5366_v20, 5 }
 0x28d   : > { %2475 = vst.msk [vmem:[#allocation2 + $0x78] sm:$0xf] %vm2444_vm12, %v2409_v38  ;;  %v2407_v44 = vpop.permute.xlu0 %2406  ;;  %v2920_v49 = vpop.permute.xlu2 %2919  ;;  %v2792_v38 = vrot.slane %v2790_v29, 4  ;;  %v4345_v41 = vrot.slane %v4343_v35, 5  ;;  %v3674_v35 = vld [vmem:[%s6993_s22 + $0x24] sm:$0x1] }
 0x28e   : > { %2474 = vst.msk [vmem:[#allocation2 + $0x74] sm:$0xf] %vm2444_vm12, %v2407_v44  ;;  %v4331_v44 = vrot.slane %v4329_v37, 5 }
 0x28f   : > { %3011 = vst.msk [vmem:[#allocation2 + $0x14] sm:$0xf] %vm3005_vm13, %v2920_v49  ;;  %v2796_v47 = vor.u32 %v2795_v39, %v2792_v38  ;;  %v3650_v38 = vld [vmem:[%s6993_s22 + $0x8] sm:$0xf] }
 0x290   : > { %v4332_v53 = vsel %vm5885_vm2, %v4327_v43, %v4331_v44  ;;  %v3747_v43 = vshll.u32 %v3674_v35, 16  ;;  %v3179_v44 = vsel %vm6060_vm6, %v5400_v34, %v3178_v10  ;;  %3658 = vst.msk [vmem:[#allocation3 + $0x4] sm:$0xf] %vm254_vm5, %v3650_v38 }
 0x291   : > { %v2797_v59 = vrot.slane %v2796_v47, 4 }
 0x292   : > { %3942 = vrot.lane.b32.xlu1 %v5508_v50, %s5786_s8  ;;  %v4346_v50 = vsel %vm5885_vm2, %v4341_v40, %v4345_v41  ;;  %v3675_v40 = vld [vmem:[%s6993_s22 + $0x28] sm:$0xf]  ;;  %v3182_v41 = vsel %vm6060_vm6, %v3180_v26, %v3181_v27  ;;  %v5347_v26 = vld [vmem:[%s5874_s5 + $0x1c] sm:$0xf] }
 0x293   : > { %3895 = vrot.lane.b32.xlu0 %v3872_v48, %s5785_s7  ;;  %3893 = vrot.lane.b32.xlu2 %v3868_v56, %s5785_s7  ;;  %v5584_v48 = vld [vmem:[%s6993_s22 + $0x28] sm:$0xe]  ;;  %v2802_v16 = vsel %vm5885_vm2, %v2797_v59, %v2801_v63  ;;  %v5405_v59 = vrot.slane %v5379_v51, 9  ;;  %v5572_v51 = vld [vmem:[%s6993_s22 + $0x38] sm:$0xf] }
 0x294   : > { %v2912_v60 = vpop.permute.xlu1 %2911  ;;  %v5557_v56 = vld [vmem:[%s6993_s22 + $0x28] sm:$0xf] }
 0x295   : > { %3007 = vst.msk [vmem:[#allocation2 + $0x4] sm:$0xf] %vm3005_vm13, %v2912_v60  ;;  %v2910_v52 = vpop.permute.xlu0 %2909  ;;  %v2926_v0 = vpop.permute.xlu2 %2925  ;;  %v5582_v60 = vld [vmem:[%s6993_s22 + $0x20] sm:$0xe] }
 0x296   : > { %3006 = vst.msk [vmem:[#allocation2] sm:$0xf] %vm3005_vm13, %v2910_v52  ;;  %v5597_v52 = vrot.slane %v5584_v48, 9  ;;  %v5596_v8 = vrot.slane %v5582_v60, 9  ;;  %v3749_v48 = vrot.slane %v3747_v43, 5 }
 0x297   : > { %3014 = vst.msk [vmem:[#allocation2 + $0x20] sm:$0xf] %vm3005_vm13, %v2926_v0  ;;  %v3649_v0 = vld [vmem:[%s6993_s22] sm:$0xf] }
 0x298   : > { %3657 = vst.msk [vmem:[#allocation3] sm:$0xf] %vm254_vm5, %v3649_v0  ;;  %v4482_v19 = vsel %vm6060_vm6, %v5597_v52, %v4481_v58  ;;  %v4478_v22 = vsel %vm6060_vm6, %v5596_v8, %v4477_v9  ;;  %v3835_v0 = vld [vmem:[%s6993_s22 + $0x28] sm:$0xe] }
 0x299   : > { %v5503_v9 = vrot.slane %v3835_v0, 9 }
 0x29a   : > { %4104 = vrot.lane.b32.xlu1 %v4041_v2, %s5787_s9 }
 0x29b   : > { %4102 = vrot.lane.b32.xlu0 %v4027_v6, %s5787_s9  ;;  %3944 = vrot.lane.b32.xlu2 %v5509_v12, %s5786_s8  ;;  %v3499_v6 = vpack.c.b16 %v3496_v62, %v3496_v62 }
 0x29c   : > { %v2918_v13 = vpop.permute.xlu1 %2917 }
 0x29d   : > { %3010 = vst.msk [vmem:[#allocation2 + $0x10] sm:$0xf] %vm3005_vm13, %v2918_v13  ;;  %v2916_v23 = vpop.permute.xlu0 %2915  ;;  %v2932_v28 = vpop.permute.xlu2 %2931  ;;  %v3553_v15 = vsel %vm3551_vm14, %v3499_v6, 0  ;;  %v3741_v13 = vshll.u32 %v3673_v5, 16  ;;  %v3834_v5 = vld [vmem:[%s6993_s22 + $0x24] sm:$0x1] }
 0x29e   : > { %3009 = vst.msk [vmem:[#allocation2 + $0xc] sm:$0xf] %vm3005_vm13, %v2916_v23  ;;  %5660 = vmatpush.bf16.msra.mxu1 %v3553_v15  ;;  %5661 = vmatpush.bf16.msra.mxu2 %v3553_v15  ;;  %v2806_v23 = vor.u32 %v2805_v11, %v2801_v63  ;;  %v3676_v63 = vld [vmem:[%s6993_s22 + $0x2c] sm:$0x1] }
 0x29f   : > { %3017 = vst.msk [vmem:[#allocation2 + $0x2c] sm:$0xf] %vm3005_vm13, %v2932_v28  ;;  %5662 = vmatpush.bf16.msra.mxu3 %v3553_v15  ;;  %3560 = vmatpush.bf16.msra.mxu0 %v3553_v15  ;;  %v3740_v28 = vrot.slane %v3738_v17, 4  ;;  %v3743_v29 = vrot.slane %v3741_v13, 5  ;;  %v3761_v8 = vshll.u32 %v3676_v63, 16  ;;  %v3875_v15 = vrot.slane %v3834_v5, 5 }
 0x2a0   : > { %v2807_v37 = vrot.slane %v2806_v23, 4  ;;  %v4365_v5 = vshll.u32 %v5572_v51, 16 }
 0x2a1   : > { %v3763_v13 = vrot.slane %v3761_v8, 5  ;;  %v3876_v23 = vsel %vm6060_vm6, %v5502_v14, %v3875_v15 }
 0x2a2   : > { %4247 = vrot.lane.b32.xlu1 %v5556_v32, %s5789_s11  ;;  %5663 = vmatpush.bf16.msra.mxu1 %v5636_v18 }
 0x2a3   : > { %4200 = vrot.lane.b32.xlu0 %v4177_v33, %s5788_s10  ;;  %4198 = vrot.lane.b32.xlu2 %v4173_v30, %s5788_s10  ;;  %v5380_v33 = vld [vmem:[%s5874_s5 + $0xa0] sm:$0xf]  ;;  %v2811_v30 = vrot.slane %v2809_v24, 5  ;;  %v5346_v24 = vld [vmem:[%s5874_s5 + $0x18] sm:$0xe] }
 0x2a4   : > { %v2924_v42 = vpop.permute.xlu1 %2923  ;;  %5664 = vmatpush.bf16.msra.mxu2 %v5636_v18  ;;  %5665 = vmatpush.bf16.msra.mxu3 %v5636_v18  ;;  %v3213_v45 = vrot.slane %v5380_v33, 5 }
 0x2a5   : > { %3013 = vst.msk [vmem:[#allocation2 + $0x1c] sm:$0xf] %vm3005_vm13, %v2924_v42  ;;  %v2922_v46 = vpop.permute.xlu0 %2921  ;;  %v2938_v49 = vpop.permute.xlu2 %2937  ;;  %3561 = vmatpush.bf16.msra.mxu0 %v5636_v18  ;;  %v3744_v42 = vor.u32 %v3743_v29, %v3740_v28  ;;  %v2812_v47 = vsel %vm5885_vm2, %v2807_v37, %v2811_v30  ;;  %v5522_v18 = vld [vmem:[%s6993_s22 + $0x28] sm:$0xf] }
 0x2a6   : > { %3012 = vst.msk [vmem:[#allocation2 + $0x18] sm:$0xf] %vm3005_vm13, %v2922_v46  ;;  %5666 = vmatpush.bf16.msra.mxu1 %v5635_v31  ;;  %v5381_v46 = vld [vmem:[%s5874_s5 + $0xa4] sm:$0x1]  ;;  %v3215_v55 = vrot.slane %v3213_v45, 4  ;;  %v3214_v6 = vsel %vm6060_vm6, %v5405_v59, %v3213_v45  ;;  %v4043_v27 = vshrl.u32 %v5522_v18, 16 }
 0x2a7   : > { %3020 = vst.msk [vmem:[#allocation2 + $0x38] sm:$0xf] %vm3005_vm13, %v2938_v49  ;;  %v3752_v49 = vshrl.u32 %v3675_v40, 16  ;;  %v4046_v28 = vshll.u32 %v5522_v18, 16  ;;  %v5538_v18 = vld [vmem:[%s6993_s22 + $0x28] sm:$0xe] }
 0x2a8   : > { %5667 = vmatpush.bf16.msra.mxu2 %v5635_v31  ;;  %5668 = vmatpush.bf16.msra.mxu3 %v5635_v31  ;;  %v4045_v37 = vrot.slane %v4043_v27, 4  ;;  %v5653_v27 = vld [vmem:[%s7824_s3] sm:$0xff] }
 0x2a9   : > { %3562 = vmatpush.bf16.msra.mxu0 %v5635_v31  ;;  %v3754_v60 = vrot.slane %v3752_v49, 4  ;;  %v5394_v31 = vrot.slane %v5346_v24, 9  ;;  %v4048_v30 = vrot.slane %v4046_v28, 5  ;;  %v3648_v49 = vld [vmem:[%s7824_s3 + $0x10] sm:$0x3] }
 0x2aa   : > { %4409 = vrot.lane.b32.xlu1 %v4346_v50, %s5790_s12  ;;  %v3755_v50 = vshll.u32 %v3675_v40, 16 }
 0x2ab   : > { %4407 = vrot.lane.b32.xlu0 %v4332_v53, %s5790_s12  ;;  %4249 = vrot.lane.b32.xlu2 %v5557_v56, %s5789_s11  ;;  %v3745_v53 = vrot.slane %v3744_v42, 4  ;;  %v3216_v56 = vrot.slane %v5381_v46, 5  ;;  %v4049_v45 = vor.u32 %v4048_v30, %v4045_v37 }
 0x2ac   : > { %v2930_v2 = vpop.permute.xlu1 %2929  ;;  %v3757_v61 = vrot.slane %v3755_v50, 5  ;;  %v5348_v50 = vld [vmem:[%s5874_s5 + $0x20] sm:$0x1] }
 0x2ad   : > { %3016 = vst.msk [vmem:[#allocation2 + $0x28] sm:$0xf] %vm3005_vm13, %v2930_v2  ;;  %v2928_v7 = vpop.permute.xlu0 %2927  ;;  %v2944_v12 = vpop.permute.xlu2 %2943  ;;  %v3750_v52 = vsel %vm5885_vm2, %v3745_v53, %v3749_v48  ;;  %v3217_v58 = vsel %vm6060_vm6, %v3215_v55, %v3216_v56  ;;  %v3836_v2 = vld [vmem:[%s6993_s22 + $0x2c] sm:$0x1]  ;;  %v4568_v53 = vunpack.c.l.b16 %v3648_v49  ;;  %v5570_v55 = vld [vmem:[%s6993_s22 + $0x30] sm:$0xf] }
 0x2ae   : > { %3015 = vst.msk [vmem:[#allocation2 + $0x24] sm:$0xf] %vm3005_vm13, %v2928_v7  ;;  %v3758_v7 = vor.u32 %v3757_v61, %v3754_v60  ;;  %v3879_v11 = vrot.slane %v3836_v2, 5  ;;  %v5540_v60 = vld [vmem:[%s6993_s22 + $0x30] sm:$0xe]  ;;  %v3139_v0 = vrot.slane %v5348_v50, 5 }
 0x2af   : > { %3023 = vst.msk [vmem:[#allocation2 + $0x44] sm:$0xf] %vm3005_vm13, %v2944_v12  ;;  %v5541_v61 = vld [vmem:[%s6993_s22 + $0x34] sm:$0x1]  ;;  %v4362_v2 = vshrl.u32 %v5572_v51, 16  ;;  %v5551_v14 = vrot.slane %v5540_v60, 9 }
 0x2b0   : > { %v3759_v17 = vrot.slane %v3758_v7, 4  ;;  %v3880_v20 = vsel %vm6060_vm6, %v5503_v9, %v3879_v11  ;;  %v4351_v11 = vshll.u32 %v5570_v55, 16  ;;  %v4184_v15 = vrot.slane %v5541_v61, 5  ;;  %v5335_v50 = vld [vmem:[%s5874_s5 + $0xac] sm:$0xf] }
 0x2b1   : > { %v5589_v60 = vld [vmem:[%s6993_s22 + $0x3c] sm:$0x1]  ;;  %v5559_v61 = vld [vmem:[%s6993_s22 + $0x38] sm:$0xf] }
 0x2b2   : > { %2953 = vrot.lane.b32.xlu1 %v2802_v16, %s5790_s12  ;;  %v5524_v16 = vld [vmem:[%s6993_s22 + $0x30] sm:$0xf]  ;;  %v3764_v29 = vsel %vm5885_vm2, %v3759_v17, %v3763_v13  ;;  %v4367_v17 = vrot.slane %v4365_v5, 5  ;;  %v4353_v24 = vrot.slane %v4351_v11, 5 }
 0x2b3   : > { %4505 = vrot.lane.b32.xlu0 %v4482_v19, %s5791_s23  ;;  %4503 = vrot.lane.b32.xlu2 %v4478_v22, %s5791_s23  ;;  %v4057_v21 = vshrl.u32 %v5524_v16, 16  ;;  %v4060_v22 = vshll.u32 %v5524_v16, 16  ;;  %v5368_v5 = vld [vmem:[%s5874_s5 + $0x70] sm:$0xf] }
 0x2b4   : > { %v2936_v32 = vpop.permute.xlu1 %2935 }
 0x2b5   : > { %3019 = vst.msk [vmem:[#allocation2 + $0x34] sm:$0xf] %vm3005_vm13, %v2936_v32  ;;  %v2934_v36 = vpop.permute.xlu0 %2933  ;;  %v3267_v39 = vpop.permute.xlu2 %3266  ;;  %v3136_v32 = vrot.slane %v5347_v26, 5  ;;  %v4059_v34 = vrot.slane %v4057_v21, 4  ;;  %v4062_v35 = vrot.slane %v4060_v22, 5 }
 0x2b6   : > { %3018 = vst.msk [vmem:[#allocation2 + $0x30] sm:$0xf] %vm3005_vm13, %v2934_v36  ;;  %v5525_v36 = vld [vmem:[%s6993_s22 + $0x34] sm:$0x1]  ;;  %v3652_v22 = vld [vmem:[%s6993_s22 + $0x18] sm:$0xf] }
 0x2b7   : > { %3353 = vst.msk [vmem:[#allocation2 + $0x28] sm:$0xf] %vm3342_vm15, %v3267_v39  ;;  %v5523_v39 = vld [vmem:[%s6993_s22 + $0x2c] sm:$0x1]  ;;  %v4063_v42 = vor.u32 %v4062_v35, %v4059_v34  ;;  %v4066_v43 = vshll.u32 %v5525_v36, 16 }
 0x2b8   : > { %v4052_v46 = vshll.u32 %v5523_v39, 16  ;;  %v5571_v21 = vld [vmem:[%s6993_s22 + $0x34] sm:$0x1]  ;;  %v5334_v26 = vld [vmem:[%s5874_s5 + $0xa8] sm:$0xf] }
 0x2b9   : > { %v4064_v48 = vrot.slane %v4063_v42, 4  ;;  %3660 = vst.msk [vmem:[#allocation3 + $0xc] sm:$0xf] %vm254_vm5, %v3652_v22  ;;  %v5558_v34 = vld [vmem:[%s6993_s22 + $0x30] sm:$0xf]  ;;  %v2814_v37 = vshrl.u32 %v5334_v26, 16 }
 0x2ba   : > { %3272 = vrot.lane.b32.xlu1 %v3182_v41, %s5791_s23  ;;  %v3137_v41 = vsel %vm6060_vm6, %v5394_v31, %v3136_v32  ;;  %v4054_v59 = vrot.slane %v4052_v46, 5  ;;  %v2817_v30 = vshll.u32 %v5334_v26, 16  ;;  %v5338_v26 = vld [vmem:[%s5874_s5 + $0xb8] sm:$0xf] }
 0x2bb   : > { %3270 = vrot.lane.b32.xlu0 %v3179_v44, %s5791_s23  ;;  %2955 = vrot.lane.b32.xlu2 %v2812_v47, %s5790_s12  ;;  %v5511_v44 = vld [vmem:[%s6993_s22 + $0x30] sm:$0xf]  ;;  %v5510_v47 = vld [vmem:[%s6993_s22 + $0x28] sm:$0xf] }
 0x2bc   : > { %v2942_v54 = vpop.permute.xlu1 %2941 }
 0x2bd   : > { %3022 = vst.msk [vmem:[#allocation2 + $0x40] sm:$0xf] %vm3005_vm13, %v2942_v54  ;;  %v2940_v57 = vpop.permute.xlu0 %2939  ;;  %v3794_v62 = vpop.permute.xlu2 %3793  ;;  %v4068_v54 = vrot.slane %v4066_v43, 5 }
 0x2be   : > { %3021 = vst.msk [vmem:[#allocation2 + $0x3c] sm:$0xf] %vm3005_vm13, %v2940_v57  ;;  %v4050_v57 = vrot.slane %v4049_v45, 4  ;;  %v2819_v45 = vrot.slane %v2817_v30, 5  ;;  %v5349_v30 = vld [vmem:[%s5874_s5 + $0x24] sm:$0xe] }
 0x2bf   : > { %3817 = vst.msk [vmem:[#allocation3] sm:$0xf] %vm818_vm7, %v3794_v62  ;;  %v4571_v62 = vpack.c.b16 %v4568_v53, %v4568_v53  ;;  %v4069_v8 = vsel %vm5885_vm2, %v4064_v48, %v4068_v54 }
 0x2c0   : > { %v4055_v9 = vsel %vm5885_vm2, %v4050_v57, %v4054_v59  ;;  %v2827_v57 = vshrl.u32 %v5335_v50, 16  ;;  %v5588_v59 = vld [vmem:[%s6993_s22 + $0x38] sm:$0xe] }
 0x2c1   : > { %v4587_v7 = vsel %vm3551_vm14, %v4571_v62, 0  ;;  %v5586_v62 = vld [vmem:[%s6993_s22 + $0x30] sm:$0xe] }
 0x2c2   : > { %3801 = vrot.lane.b32.xlu1 %v3750_v52, %s5784_s6  ;;  %4594 = vmatpush.bf16.msrb.mxu1 %v4587_v7  ;;  %v5598_v7 = vrot.slane %v5586_v62, 9 }
 0x2c3   : > { %3292 = vrot.lane.b32.xlu0 %v3217_v58, %s5791_s23  ;;  %3290 = vrot.lane.b32.xlu2 %v3214_v6, %s5791_s23  ;;  %v3138_v58 = vrot.slane %v3136_v32, 4  ;;  %v4348_v6 = vshrl.u32 %v5570_v55, 16  ;;  %v3651_v32 = vld [vmem:[%s6993_s22 + $0x10] sm:$0xf]  ;;  %v2823_v55 = vshll.u32 %v5335_v50, 16 }
 0x2c4   : > { %v2948_v12 = vpop.permute.xlu1 %2947  ;;  %3659 = vst.msk [vmem:[#allocation3 + $0x8] sm:$0xf] %vm254_vm5, %v3651_v32 }
 0x2c5   : > { %3025 = vst.msk [vmem:[#allocation2 + $0x4c] sm:$0xf] %vm3005_vm13, %v2948_v12  ;;  %v2946_v10 = vpop.permute.xlu0 %2945  ;;  %v3892_v19 = vpop.permute.xlu2 %3891  ;;  %v5654_v12 = vld [vmem:[%s7824_s3 + $0x8] sm:$0xff]  ;;  %v3140_v16 = vsel %vm6060_vm6, %v3138_v58, %v3139_v0  ;;  %v4350_v13 = vrot.slane %v4348_v6, 4  ;;  %v2825_v58 = vrot.slane %v2823_v55, 5 }
 0x2c6   : > { %3024 = vst.msk [vmem:[#allocation2 + $0x48] sm:$0xf] %vm3005_vm13, %v2946_v10  ;;  %v4364_v10 = vrot.slane %v4362_v2, 4  ;;  %4595 = vmatpush.bf16.msrb.mxu1 %v5654_v12  ;;  %v5599_v2 = vrot.slane %v5588_v59, 9  ;;  %v5336_v12 = vld [vmem:[%s5874_s5 + $0xb0] sm:$0x1] }
 0x2c7   : > { %v4354_v39 = vor.u32 %v4353_v24, %v4350_v13  ;;  %v5383_v24 = vld [vmem:[%s5874_s5 + $0xac] sm:$0xf] }
 0x2ca   : > { %3899 = vrot.lane.b32.xlu1 %v3880_v20, %s5785_s7  ;;  %v5573_v20 = vld [vmem:[%s6993_s22 + $0x3c] sm:$0x1]  ;;  %4596 = vmatpush.bf16.msrb.mxu1 %v5653_v27 }
 0x2cb   : > { %3897 = vrot.lane.b32.xlu0 %v3876_v23, %s5785_s7  ;;  %3803 = vrot.lane.b32.xlu2 %v3764_v29, %s5784_s6  ;;  %v5550_v29 = vrot.slane %v5538_v18, 9  ;;  %v4371_v36 = vshll.u32 %v5573_v20, 16 }
 0x2cc   : > { %v2950_v33 = vpop.permute.xlu1 %2949 }
 0x2cd   : > { %3026 = vst.msk [vmem:[#allocation2 + $0x50] sm:$0xf] %vm3005_vm13, %v2950_v33  ;;  %v3269_v38 = vpop.permute.xlu0 %3268  ;;  %v7274_v40 = vpop.permute.xlu2 %4098  ;;  %v4368_v33 = vor.u32 %v4367_v17, %v4364_v10  ;;  %v4373_v43 = vrot.slane %v4371_v36, 5  ;;  %v5369_v10 = vld [vmem:[%s5874_s5 + $0x74] sm:$0x1]  ;;  %v2851_v36 = vshrl.u32 %v5338_v26, 16 }
 0x2ce   : > { %3354 = vst.msk [vmem:[#allocation2 + $0x2c] sm:$0xf] %vm3342_vm15, %v3269_v38  ;;  %v4185_v38 = vsel %vm6060_vm6, %v5551_v14, %v4184_v15  ;;  %v3185_v15 = vrot.slane %v5368_v5, 5  ;;  %v5367_v17 = vld [vmem:[%s5874_s5 + $0x6c] sm:$0xe] }
 0x2d0   : > { %v3187_v20 = vrot.slane %v3185_v15, 4 }
 0x2d2   : > { %3246 = vrot.lane.b32.xlu1 %v3137_v41, %s5791_s23  ;;  %v4357_v41 = vshll.u32 %v5571_v21, 16  ;;  %v3188_v21 = vrot.slane %v5369_v10, 5 }
 0x2d3   : > { %3948 = vrot.lane.b32.xlu0 %v5511_v44, %s5786_s8  ;;  %3946 = vrot.lane.b32.xlu2 %v5510_v47, %s5786_s8  ;;  %v2816_v44 = vrot.slane %v2814_v37, 4  ;;  %v4355_v47 = vrot.slane %v4354_v39, 4 }
 0x2d4   : > { %v3890_v56 = vpop.permute.xlu1 %3889  ;;  %v4359_v49 = vrot.slane %v4357_v41, 5 }
 0x2d5   : > { %3913 = vst.msk [vmem:[#allocation3] sm:$0xf] %vm1158_vm8, %v3890_v56  ;;  %v3796_v63 = vpop.permute.xlu0 %3795  ;;  %v5642_v52 = vld [vmem:[#allocation2 + $0x28] sm:$0xff]  ;;  %v7293_v4 = vpop.permute.xlu2 %4196  ;;  %v2820_v54 = vor.u32 %v2819_v45, %v2816_v44  ;;  %v5395_v44 = vrot.slane %v5349_v30, 9 }
 0x2d6   : > { %3818 = vst.msk [vmem:[#allocation3 + $0x4] sm:$0xf] %vm818_vm7, %v3796_v63  ;;  %5487 = vmatmul.msk.bf16.vlgmr.msra.gmra.mxu1 %vm3502_vm0, %v5642_v52  ;;  %v4360_v56 = vsel %vm5885_vm2, %v4355_v47, %v4359_v49  ;;  %v5587_v63 = vld [vmem:[%s6993_s22 + $0x34] sm:$0x1]  ;;  %v2853_v47 = vrot.slane %v2851_v36, 4 }
 0x2d7   : > { %3914 = vst.msk [vmem:[#allocation3 + $0x4] sm:$0xf] %vm1158_vm8, %v3892_v19  ;;  %v5539_v19 = vld [vmem:[%s6993_s22 + $0x2c] sm:$0x1]  ;;  %v2821_v52 = vrot.slane %v2820_v54, 4 }
 0x2d8   : > { %v4180_v31 = vrot.slane %v5539_v19, 5  ;;  %v2833_v19 = vshll.u32 %v5336_v12, 16 }
 0x2d9   : > { %v2826_v14 = vsel %vm5885_vm2, %v2821_v52, %v2825_v58 }
 0x2da   : > { %4108 = vrot.lane.b32.xlu1 %v4069_v8, %s5787_s9  ;;  %v4181_v42 = vsel %vm6060_vm6, %v5550_v29, %v4180_v31  ;;  %v4485_v8 = vrot.slane %v5587_v63, 5  ;;  %v2835_v29 = vrot.slane %v2833_v19, 5  ;;  %v5337_v31 = vld [vmem:[%s5874_s5 + $0xb4] sm:$0xf] }
 0x2db   : > { %4106 = vrot.lane.b32.xlu0 %v4055_v9, %s5787_s9  ;;  %3248 = vrot.lane.b32.xlu2 %v3140_v16, %s5791_s23  ;;  %v2829_v9 = vrot.slane %v2827_v57, 4  ;;  %v2838_v39 = vshrl.u32 %v5337_v31, 16  ;;  %v2841_v41 = vshll.u32 %v5337_v31, 16  ;;  %v5385_v19 = vld [vmem:[%s5874_s5 + $0xb4] sm:$0xe] }
 0x2dc   : > { %v3941_v23 = vpop.permute.xlu1 %3940  ;;  %v4486_v13 = vsel %vm6060_vm6, %v5598_v7, %v4485_v8  ;;  %v5371_v7 = vld [vmem:[%s5874_s5 + $0x7c] sm:$0xf]  ;;  %v3679_v8 = vld [vmem:[%s6993_s22 + $0x38] sm:$0xf] }
 0x2dd   : > { %3963 = vst.msk [vmem:[#allocation3 + $0x4] sm:$0xf] %vm1352_vm9, %v3941_v23  ;;  %v3939_v28 = vpop.permute.xlu0 %3938  ;;  %v4404_v35 = vpop.permute.xlu2 %4403  ;;  %v2830_v18 = vor.u32 %v2829_v9, %v2825_v58  ;;  %v5401_v23 = vrot.slane %v5367_v17, 9  ;;  %v2843_v54 = vrot.slane %v2841_v41, 5  ;;  %v3192_v10 = vrot.slane %v5371_v7, 5 }
 0x2de   : > { %3962 = vst.msk [vmem:[#allocation3] sm:$0xf] %vm1352_vm9, %v3939_v28  ;;  %v3780_v17 = vshrl.u32 %v3679_v8, 16 }
 0x2df   : > { %4122 = vst.msk [vmem:[#allocation3] sm:$0xf] %vm1913_vm10, %v7274_v40  ;;  %v4369_v40 = vrot.slane %v4368_v33, 4  ;;  %v2831_v28 = vrot.slane %v2830_v18, 4  ;;  %v2847_v33 = vshll.u32 %v5338_v26, 16  ;;  %v3186_v37 = vsel %vm6060_vm6, %v5401_v23, %v3185_v15 }
 0x2e0   : > { %v5372_v23 = vld [vmem:[%s5874_s5 + $0x80] sm:$0x1]  ;;  %v5370_v26 = vld [vmem:[%s5874_s5 + $0x78] sm:$0xe] }
 0x2e1   : > { %v4374_v48 = vsel %vm5885_vm2, %v4369_v40, %v4373_v43  ;;  %v2836_v40 = vsel %vm5885_vm2, %v2831_v28, %v2835_v29  ;;  %v5382_v43 = vld [vmem:[%s5874_s5 + $0xa8] sm:$0xe]  ;;  %v3782_v29 = vrot.slane %v3780_v17, 4 }
 0x2e2   : > { %4251 = vrot.lane.b32.xlu1 %v5558_v34, %s5789_s11  ;;  %v3189_v34 = vsel %vm6060_vm6, %v3187_v20, %v3188_v21  ;;  %v5386_v20 = vld [vmem:[%s5874_s5 + $0xb8] sm:$0xf] }
 0x2e3   : > { %4204 = vrot.lane.b32.xlu0 %v4185_v38, %s5788_s10  ;;  %4202 = vrot.lane.b32.xlu2 %v4181_v42, %s5788_s10  ;;  %v5350_v38 = vld [vmem:[%s5874_s5 + $0x28] sm:$0xf]  ;;  %v5384_v42 = vld [vmem:[%s5874_s5 + $0xb0] sm:$0x1]  ;;  %v3227_v28 = vrot.slane %v5386_v20, 5 }
 0x2e4   : > { %v4195_v46 = vpop.permute.xlu1 %4194  ;;  %v3143_v45 = vrot.slane %v5350_v38, 5  ;;  %v3678_v38 = vld [vmem:[%s6993_s22 + $0x34] sm:$0x1] }
 0x2e5   : > { %4218 = vst.msk [vmem:[#allocation3] sm:$0xf] %vm2250_vm11, %v4195_v46  ;;  %v4101_v51 = vpop.permute.xlu0 %4100  ;;  %v4502_v53 = vpop.permute.xlu2 %4501  ;;  %v2849_v46 = vrot.slane %v2847_v33, 5  ;;  %v3680_v33 = vld [vmem:[%s6993_s22 + $0x3c] sm:$0x1] }
 0x2e6   : > { %4123 = vst.msk [vmem:[#allocation3 + $0x4] sm:$0xf] %vm1913_vm10, %v4101_v51  ;;  %v3223_v51 = vrot.slane %v5384_v42, 5 }
 0x2e7   : > { %4219 = vst.msk [vmem:[#allocation3 + $0x4] sm:$0xf] %vm2250_vm11, %v7293_v4  ;;  %v4489_v4 = vrot.slane %v5589_v60, 5  ;;  %v3144_v60 = vsel %vm6060_vm6, %v5395_v44, %v3143_v45 }
 0x2e9   : > { %v4490_v16 = vsel %vm6060_vm6, %v5599_v2, %v4489_v4 }
 0x2ea   : > { %4413 = vrot.lane.b32.xlu1 %v4374_v48, %s5790_s12  ;;  %v2840_v48 = vrot.slane %v2838_v39, 4  ;;  %v5402_v39 = vrot.slane %v5370_v26, 9 }
 0x2eb   : > { %4411 = vrot.lane.b32.xlu0 %v4360_v56, %s5790_s12  ;;  %4253 = vrot.lane.b32.xlu2 %v5559_v61, %s5789_s11  ;;  %v5406_v56 = vrot.slane %v5382_v43, 9  ;;  %v2854_v61 = vor.u32 %v2853_v47, %v2849_v46  ;;  %v3789_v43 = vshll.u32 %v3680_v33, 16 }
 0x2ec   : > { %v4246_v0 = vpop.permute.xlu1 %4245  ;;  %v2844_v52 = vor.u32 %v2843_v54, %v2840_v48  ;;  %v3193_v47 = vsel %vm6060_vm6, %v5402_v39, %v3192_v10 }
 0x2ed   : > { %4268 = vst.msk [vmem:[#allocation3 + $0x4] sm:$0xf] %vm2444_vm12, %v4246_v0  ;;  %v4244_v6 = vpop.permute.xlu0 %4243  ;;  %v3894_v11 = vpop.permute.xlu2 %3893  ;;  %v5351_v0 = vld [vmem:[%s5874_s5 + $0x2c] sm:$0x1]  ;;  %v2855_v2 = vrot.slane %v2854_v61, 4 }
 0x2ee   : > { %4267 = vst.msk [vmem:[#allocation3] sm:$0xf] %vm2444_vm12, %v4244_v6  ;;  %v2845_v6 = vrot.slane %v2844_v52, 4  ;;  %v3146_v12 = vrot.slane %v5351_v0, 5  ;;  %v3653_v61 = vld [vmem:[%s6993_s22 + $0x20] sm:$0xf] }
 0x2ef   : > { %4427 = vst.msk [vmem:[#allocation3] sm:$0xf] %vm3005_vm13, %v4404_v35  ;;  %v3220_v35 = vrot.slane %v5383_v24, 5  ;;  %v3839_v52 = vld [vmem:[%s6993_s22 + $0x38] sm:$0xe] }
 0x2f0   : > { %v2850_v18 = vsel %vm5885_vm2, %v2845_v6, %v2849_v46  ;;  %v3775_v46 = vshll.u32 %v3678_v38, 16  ;;  %3661 = vst.msk [vmem:[#allocation3 + $0x10] sm:$0xf] %vm254_vm5, %v3653_v61  ;;  %v5505_v6 = vrot.slane %v3839_v52, 9 }
 0x2f1   : > { %v3222_v50 = vrot.slane %v3220_v35, 4  ;;  %v3221_v58 = vsel %vm6060_vm6, %v5406_v56, %v3220_v35  ;;  %v3195_v35 = vrot.slane %v5372_v23, 5 }
 0x2f2   : > { %2957 = vrot.lane.b32.xlu1 %v2826_v14, %s5790_s12  ;;  %v3677_v14 = vld [vmem:[%s6993_s22 + $0x30] sm:$0xf] }
 0x2f3   : > { %4509 = vrot.lane.b32.xlu0 %v4490_v16, %s5791_s23  ;;  %4507 = vrot.lane.b32.xlu2 %v4486_v13, %s5791_s23  ;;  %v3224_v63 = vsel %vm6060_vm6, %v3222_v50, %v3223_v51  ;;  %v3783_v13 = vshll.u32 %v3679_v8, 16  ;;  %v3766_v21 = vshrl.u32 %v3677_v14, 16  ;;  %v3791_v51 = vrot.slane %v3789_v43, 5  ;;  %v5353_v8 = vld [vmem:[%s5874_s5 + $0x34] sm:$0xf] }
 0x2f4   : > { %v4500_v22 = vpop.permute.xlu1 %4499  ;;  %v3150_v17 = vrot.slane %v5353_v8, 5 }
 0x2f5   : > { %4523 = vst.msk [vmem:[#allocation3] sm:$0xf] %vm3342_vm15, %v4500_v22  ;;  %v4406_v27 = vpop.permute.xlu0 %4405  ;;  %v3945_v32 = vpop.permute.xlu2 %3944  ;;  %v3769_v22 = vshll.u32 %v3677_v14, 16  ;;  %v3785_v31 = vrot.slane %v3783_v13, 5  ;;  %v3768_v36 = vrot.slane %v3766_v21, 4 }
 0x2f6   : > { %4428 = vst.msk [vmem:[#allocation3 + $0x4] sm:$0xf] %vm3005_vm13, %v4406_v27  ;;  %v5407_v27 = vrot.slane %v5385_v19, 9  ;;  %v5528_v14 = vld [vmem:[%s6993_s22 + $0x40] sm:$0xf]  ;;  %v3152_v26 = vrot.slane %v3150_v17, 4 }
 0x2f7   : > { %4524 = vst.msk [vmem:[#allocation3 + $0x4] sm:$0xf] %vm3342_vm15, %v4502_v53  ;;  %v5339_v53 = vld [vmem:[%s5874_s5 + $0xbc] sm:$0x1]  ;;  %v4085_v19 = vshrl.u32 %v5528_v14, 16  ;;  %v4088_v20 = vshll.u32 %v5528_v14, 16 }
 0x2f8   : > { %v2857_v62 = vshll.u32 %v5339_v53, 16  ;;  %v3228_v42 = vsel %vm6060_vm6, %v5407_v27, %v3227_v28  ;;  %v3654_v53 = vld [vmem:[%s6993_s22 + $0x28] sm:$0xf]  ;;  %v5352_v21 = vld [vmem:[%s5874_s5 + $0x30] sm:$0xe] }
 0x2f9   : > { %3662 = vst.msk [vmem:[#allocation3 + $0x14] sm:$0xf] %vm254_vm5, %v3654_v53  ;;  %v5340_v14 = vld [vmem:[%s5874_s5 + $0xc0] sm:$0xf] }
 0x2fa   : > { %3276 = vrot.lane.b32.xlu1 %v3189_v34, %s5791_s23  ;;  %v2859_v4 = vrot.slane %v2857_v62, 5  ;;  %v3194_v34 = vrot.slane %v3192_v10, 4  ;;  %v5512_v10 = vld [vmem:[%s6993_s22 + $0x38] sm:$0xf] }
 0x2fb   : > { %3274 = vrot.lane.b32.xlu0 %v3186_v37, %s5791_s23  ;;  %2959 = vrot.lane.b32.xlu2 %v2836_v40, %s5790_s12  ;;  %v3771_v37 = vrot.slane %v3769_v22, 5  ;;  %v3786_v40 = vor.u32 %v3785_v31, %v3782_v29  ;;  %v5396_v29 = vrot.slane %v5352_v21, 9  ;;  %v5529_v31 = vld [vmem:[%s6993_s22 + $0x44] sm:$0x1] }
 0x2fc   : > { %v3800_v49 = vpop.permute.xlu1 %3799  ;;  %v2860_v16 = vsel %vm5885_vm2, %v2855_v2, %v2859_v4  ;;  %v3196_v44 = vsel %vm6060_vm6, %v3194_v34, %v3195_v35  ;;  %v3837_v2 = vld [vmem:[%s6993_s22 + $0x30] sm:$0xe]  ;;  %v3838_v4 = vld [vmem:[%s6993_s22 + $0x34] sm:$0x1]  ;;  %v4090_v34 = vrot.slane %v4088_v20, 5  ;;  %v4094_v39 = vshll.u32 %v5529_v31, 16 }
 0x2fd   : > { %3820 = vst.msk [vmem:[#allocation3 + $0xc] sm:$0xf] %vm818_vm7, %v3800_v49  ;;  %v3798_v55 = vpop.permute.xlu0 %3797  ;;  %v4199_v59 = vpop.permute.xlu2 %4198  ;;  %v5387_v49 = vld [vmem:[%s5874_s5 + $0xbc] sm:$0x1]  ;;  %v3787_v50 = vrot.slane %v3786_v40, 4  ;;  %v2865_v31 = vshll.u32 %v5340_v14, 16 }
 0x2fe   : > { %3819 = vst.msk [vmem:[#allocation3 + $0x8] sm:$0xf] %vm818_vm7, %v3798_v55  ;;  %v5655_v57 = vld [vmem:[#allocation3] sm:$0xff]  ;;  %v3777_v55 = vrot.slane %v3775_v46, 5  ;;  %v5543_v40 = vld [vmem:[%s6993_s22 + $0x3c] sm:$0x1] }
 0x2ff   : > { %3915 = vst.msk [vmem:[#allocation3 + $0x8] sm:$0xf] %vm1158_vm8, %v3894_v11  ;;  %5626 = vmatmul.msk.bf16.vlgmr.msrb.gmra.mxu1 %vm3502_vm0, %v5655_v57  ;;  %v3145_v11 = vrot.slane %v3143_v45, 4  ;;  %v3772_v45 = vor.u32 %v3771_v37, %v3768_v36  ;;  %v3229_v57 = vrot.slane %v3227_v28, 4  ;;  %v3792_v62 = vsel %vm5885_vm2, %v3787_v50, %v3791_v51  ;;  %v5575_v21 = vld [vmem:[%s6993_s22 + $0x44] sm:$0x1] }
 0x300   : > { %v4096_v53 = vrot.slane %v4094_v39, 5 }
 0x301   : > { %v3147_v24 = vsel %vm6060_vm6, %v3145_v11, %v3146_v12  ;;  %v3773_v54 = vrot.slane %v3772_v45, 4  ;;  %v5504_v11 = vrot.slane %v3837_v2, 9  ;;  %v3883_v12 = vrot.slane %v3838_v4, 5 }
 0x302   : > { %3250 = vrot.lane.b32.xlu1 %v3144_v60, %s5791_s23 }
 0x303   : > { %3296 = vrot.lane.b32.xlu0 %v3224_v63, %s5791_s23  ;;  %3294 = vrot.lane.b32.xlu2 %v3221_v58, %s5791_s23  ;;  %v3778_v63 = vsel %vm5885_vm2, %v3773_v54, %v3777_v55  ;;  %v3840_v58 = vld [vmem:[%s6993_s22 + $0x3c] sm:$0x1]  ;;  %v3884_v22 = vsel %vm6060_vm6, %v5504_v11, %v3883_v12  ;;  %v5341_v12 = vld [vmem:[%s5874_s5 + $0xc4] sm:$0xf] }
 0x304   : > { %v3943_v5 = vpop.permute.xlu1 %3942  ;;  %v3887_v7 = vrot.slane %v3840_v58, 5 }
 0x305   : > { %3964 = vst.msk [vmem:[#allocation3 + $0x8] sm:$0xf] %vm1352_vm9, %v3943_v5  ;;  %v3896_v9 = vpop.permute.xlu0 %3895  ;;  %v4250_v15 = vpop.permute.xlu2 %4249 }
 0x306   : > { %3916 = vst.msk [vmem:[#allocation3 + $0xc] sm:$0xf] %vm1158_vm8, %v3896_v9  ;;  %v3888_v13 = vsel %vm6060_vm6, %v5505_v6, %v3887_v7  ;;  %v5577_v6 = vld [vmem:[%s6993_s22 + $0x4c] sm:$0x1] }
 0x307   : > { %3965 = vst.msk [vmem:[#allocation3 + $0xc] sm:$0xf] %vm1352_vm9, %v3945_v32 }
 0x30a   : > { %2963 = vrot.lane.b32.xlu1 %v2860_v16, %s5790_s12  ;;  %v5526_v16 = vld [vmem:[%s6993_s22 + $0x38] sm:$0xf] }
 0x30b   : > { %2961 = vrot.lane.b32.xlu0 %v2850_v18, %s5790_s12  ;;  %3252 = vrot.lane.b32.xlu2 %v3147_v24, %s5791_s23  ;;  %v5354_v18 = vld [vmem:[%s5874_s5 + $0x38] sm:$0x1]  ;;  %v4071_v23 = vshrl.u32 %v5526_v16, 16  ;;  %v4074_v24 = vshll.u32 %v5526_v16, 16 }
 0x30c   : > { %v4105_v32 = vpop.permute.xlu1 %4104  ;;  %v3153_v27 = vrot.slane %v5354_v18, 5 }
 0x30d   : > { %4125 = vst.msk [vmem:[#allocation3 + $0xc] sm:$0xf] %vm1913_vm10, %v4105_v32  ;;  %v4103_v30 = vpop.permute.xlu0 %4102  ;;  %v4504_v41 = vpop.permute.xlu2 %4503  ;;  %v4087_v32 = vrot.slane %v4085_v19, 4  ;;  %v4073_v33 = vrot.slane %v4071_v23, 4  ;;  %v4076_v36 = vrot.slane %v4074_v24, 5  ;;  %v2871_v23 = vshll.u32 %v5341_v12, 16 }
 0x30e   : > { %4124 = vst.msk [vmem:[#allocation3 + $0x8] sm:$0xf] %vm1913_vm10, %v4103_v30  ;;  %v5527_v30 = vld [vmem:[%s6993_s22 + $0x3c] sm:$0x1]  ;;  %v3154_v38 = vsel %vm6060_vm6, %v3152_v26, %v3153_v27  ;;  %v5560_v19 = vld [vmem:[%s6993_s22 + $0x40] sm:$0xf] }
 0x30f   : > { %4220 = vst.msk [vmem:[#allocation3 + $0x8] sm:$0xf] %vm2250_vm11, %v4199_v59  ;;  %v3230_v59 = vrot.slane %v5387_v49, 5  ;;  %v4091_v43 = vor.u32 %v4090_v34, %v4087_v32  ;;  %v4077_v45 = vor.u32 %v4076_v36, %v4073_v33  ;;  %v4080_v46 = vshll.u32 %v5527_v30, 16  ;;  %v5590_v26 = vld [vmem:[%s6993_s22 + $0x40] sm:$0xe] }
 0x310   : > { %v4188_v49 = vrot.slane %v5543_v40, 5  ;;  %v2875_v24 = vshrl.u32 %v5341_v12, 16  ;;  %v5591_v27 = vld [vmem:[%s6993_s22 + $0x44] sm:$0x1]  ;;  %v5600_v33 = vrot.slane %v5590_v26, 9 }
 0x311   : > { %v3231_v0 = vsel %vm6060_vm6, %v3229_v57, %v3230_v59  ;;  %v4092_v51 = vrot.slane %v4091_v43, 4  ;;  %v4082_v57 = vrot.slane %v4080_v46, 5  ;;  %v4493_v36 = vrot.slane %v5591_v27, 5  ;;  %v5373_v12 = vld [vmem:[%s5874_s5 + $0x84] sm:$0xe] }
 0x312   : > { %3298 = vrot.lane.b32.xlu1 %v3228_v42, %s5791_s23  ;;  %v5542_v42 = vld [vmem:[%s6993_s22 + $0x38] sm:$0xe]  ;;  %v2877_v30 = vrot.slane %v2875_v24, 4  ;;  %v2867_v43 = vrot.slane %v2865_v31, 5  ;;  %v5357_v31 = vld [vmem:[%s5874_s5 + $0x44] sm:$0x1] }
 0x313   : > { %3280 = vrot.lane.b32.xlu0 %v3196_v44, %s5791_s23  ;;  %3278 = vrot.lane.b32.xlu2 %v3193_v47, %s5791_s23  ;;  %v5513_v44 = vld [vmem:[%s6993_s22 + $0x40] sm:$0xf]  ;;  %v5552_v47 = vrot.slane %v5542_v42, 9  ;;  %v5342_v42 = vld [vmem:[%s5874_s5 + $0xc8] sm:$0x1] }
 0x314   : > { %v4248_v48 = vpop.permute.xlu1 %4247 }
 0x315   : > { %4269 = vst.msk [vmem:[#allocation3 + $0x8] sm:$0xf] %vm2444_vm12, %v4248_v48  ;;  %v4201_v56 = vpop.permute.xlu0 %4200  ;;  %v2956_v60 = vpop.permute.xlu2 %2955  ;;  %v5576_v48 = vld [vmem:[%s6993_s22 + $0x48] sm:$0xf]  ;;  %v4189_v61 = vsel %vm6060_vm6, %v5552_v47, %v4188_v49 }
 0x316   : > { %4221 = vst.msk [vmem:[#allocation3 + $0xc] sm:$0xf] %vm2250_vm11, %v4201_v56  ;;  %v4078_v56 = vrot.slane %v4077_v45, 4  ;;  %v4393_v52 = vshll.u32 %v5576_v48, 16 }
 0x317   : > { %4270 = vst.msk [vmem:[#allocation3 + $0xc] sm:$0xf] %vm2444_vm12, %v4250_v15 }
 0x318   : > { %3029 = vst.msk [vmem:[#allocation2 + $0x5c] sm:$0xf] %vm3005_vm13, %v2956_v60  ;;  %v5574_v60 = vld [vmem:[%s6993_s22 + $0x40] sm:$0xf]  ;;  %v4083_v58 = vsel %vm5885_vm2, %v4078_v56, %v4082_v57  ;;  %v5592_v56 = vld [vmem:[%s6993_s22 + $0x48] sm:$0xe] }
 0x319   : > { %v4376_v2 = vshrl.u32 %v5574_v60, 16  ;;  %v4379_v4 = vshll.u32 %v5574_v60, 16  ;;  %v5593_v57 = vld [vmem:[%s6993_s22 + $0x4c] sm:$0x1] }
 0x31a   : > { %3807 = vrot.lane.b32.xlu1 %v3792_v62, %s5784_s6  ;;  %v4390_v62 = vshrl.u32 %v5576_v48, 16 }
 0x31b   : > { %3805 = vrot.lane.b32.xlu0 %v3778_v63, %s5784_s6  ;;  %3300 = vrot.lane.b32.xlu2 %v3231_v0, %s5791_s23  ;;  %v4097_v63 = vsel %vm5885_vm2, %v4092_v51, %v4096_v53  ;;  %v5544_v0 = vld [vmem:[%s6993_s22 + $0x40] sm:$0xe]  ;;  %v4381_v18 = vrot.slane %v4379_v4, 5  ;;  %v2881_v53 = vshll.u32 %v5342_v42, 16 }
 0x31c   : > { %v4410_v5 = vpop.permute.xlu1 %4409  ;;  %v4392_v7 = vrot.slane %v4390_v62, 4  ;;  %v5553_v11 = vrot.slane %v5544_v0, 9  ;;  %v4497_v0 = vrot.slane %v5593_v57, 5 }
 0x31d   : > { %4430 = vst.msk [vmem:[#allocation3 + $0xc] sm:$0xf] %vm3005_vm13, %v4410_v5  ;;  %v4408_v9 = vpop.permute.xlu0 %4407  ;;  %v3291_v15 = vpop.permute.xlu2 %3290  ;;  %v5545_v5 = vld [vmem:[%s6993_s22 + $0x44] sm:$0x1]  ;;  %v2883_v60 = vrot.slane %v2881_v53, 5 }
 0x31e   : > { %4429 = vst.msk [vmem:[#allocation3 + $0x8] sm:$0xf] %vm3005_vm13, %v4408_v9  ;;  %v4395_v9 = vrot.slane %v4393_v52, 5  ;;  %v5374_v52 = vld [vmem:[%s5874_s5 + $0x88] sm:$0xf] }
 0x31f   : > { %4525 = vst.msk [vmem:[#allocation3 + $0x8] sm:$0xf] %vm3342_vm15, %v4504_v41  ;;  %v3151_v41 = vsel %vm6060_vm6, %v5396_v29, %v3150_v17  ;;  %v4192_v17 = vrot.slane %v5545_v5, 5  ;;  %v2862_v29 = vshrl.u32 %v5340_v14, 16  ;;  %v5388_v5 = vld [vmem:[%s5874_s5 + $0xc0] sm:$0xe] }
 0x320   : > { %v5408_v14 = vrot.slane %v5388_v5, 9 }
 0x321   : > { %v4193_v32 = vsel %vm6060_vm6, %v5553_v11, %v4192_v17  ;;  %v2864_v40 = vrot.slane %v2862_v29, 4 }
 0x322   : > { %3950 = vrot.lane.b32.xlu1 %v5512_v10, %s5786_s8  ;;  %v5561_v10 = vld [vmem:[%s6993_s22 + $0x48] sm:$0xf] }
 0x323   : > { %3903 = vrot.lane.b32.xlu0 %v3888_v13, %s5785_s7  ;;  %3901 = vrot.lane.b32.xlu2 %v3884_v22, %s5785_s7  ;;  %v4378_v13 = vrot.slane %v4376_v2, 4  ;;  %v4399_v22 = vshll.u32 %v5577_v6, 16 }
 0x324   : > { %v2954_v28 = vpop.permute.xlu1 %2953 }
 0x325   : > { %3028 = vst.msk [vmem:[#allocation2 + $0x58] sm:$0xf] %vm3005_vm13, %v2954_v28  ;;  %v4506_v35 = vpop.permute.xlu0 %4505  ;;  %v3804_v37 = vpop.permute.xlu2 %3803  ;;  %v4396_v28 = vor.u32 %v4395_v9, %v4392_v7  ;;  %v4382_v34 = vor.u32 %v4381_v18, %v4378_v13  ;;  %v5389_v7 = vld [vmem:[%s5874_s5 + $0xc4] sm:$0xf]  ;;  %v3199_v9 = vrot.slane %v5374_v52, 5 }
 0x326   : > { %4526 = vst.msk [vmem:[#allocation3 + $0xc] sm:$0xf] %vm3342_vm15, %v4506_v35  ;;  %v4385_v35 = vshll.u32 %v5575_v21, 16  ;;  %v5356_v18 = vld [vmem:[%s5874_s5 + $0x40] sm:$0xf]  ;;  %v5403_v21 = vrot.slane %v5373_v12, 9 }
 0x327   : > { %3365 = vst.msk [vmem:[#allocation2 + $0x58] sm:$0xf] %vm3342_vm15, %v3291_v15  ;;  %v4397_v39 = vrot.slane %v4396_v28, 4  ;;  %v4383_v46 = vrot.slane %v4382_v34, 4  ;;  %v3201_v13 = vrot.slane %v3199_v9, 4  ;;  %v3157_v26 = vrot.slane %v5356_v18, 5 }
 0x328   : > { %3822 = vst.msk [vmem:[#allocation3 + $0x14] sm:$0xf] %vm818_vm7, %v3804_v37  ;;  %v2873_v37 = vrot.slane %v2871_v23, 5  ;;  %v4387_v47 = vrot.slane %v4385_v35, 5  ;;  %v5719_v35 = vld [vmem:[%s5874_s5 + $0x94] sm:$0xf] }
 0x32a   : > { %3256 = vrot.lane.b32.xlu1 %v3154_v38, %s5791_s23  ;;  %v2878_v51 = vor.u32 %v2877_v30, %v2873_v37  ;;  %v5390_v30 = vld [vmem:[%s5874_s5 + $0xc8] sm:$0x1] }
 0x32b   : > { %3254 = vrot.lane.b32.xlu0 %v3151_v41, %s5791_s23  ;;  %3952 = vrot.lane.b32.xlu2 %v5513_v44, %s5786_s8  ;;  %v4401_v41 = vrot.slane %v4399_v22, 5  ;;  %v5343_v22 = vld [vmem:[%s5874_s5 + $0xcc] sm:$0xf] }
 0x32c   : > { %v3273_v50 = vpop.permute.xlu1 %3272  ;;  %v2889_v34 = vshll.u32 %v5343_v22, 16 }
 0x32d   : > { %3356 = vst.msk [vmem:[#allocation2 + $0x34] sm:$0xf] %vm3342_vm15, %v3273_v50  ;;  %v3271_v54 = vpop.permute.xlu0 %3270  ;;  %v5656_v55 = vld [vmem:[#allocation3 + $0x8] sm:$0xff]  ;;  %v7491_v59 = vpop.permute.xlu2 %3946  ;;  %v4494_v50 = vsel %vm6060_vm6, %v5600_v33, %v4493_v36  ;;  %v4402_v48 = vsel %vm5885_vm2, %v4397_v39, %v4401_v41  ;;  %v2779_v33 = vshrl.u32 %v5719_v35, 16  ;;  %v5355_v36 = vld [vmem:[%s5874_s5 + $0x3c] sm:$0xe] }
 0x32e   : > { %3355 = vst.msk [vmem:[#allocation2 + $0x30] sm:$0xf] %vm3342_vm15, %v3271_v54  ;;  %5627 = vmatmul.msk.bf16.gmra.mxu1 %vm3502_vm0, %v5656_v55  ;;  %v2868_v54 = vor.u32 %v2867_v43, %v2864_v40  ;;  %v4388_v55 = vsel %vm5885_vm2, %v4383_v46, %v4387_v47  ;;  %v3160_v39 = vrot.slane %v5357_v31, 5  ;;  %v5397_v43 = vrot.slane %v5355_v36, 9  ;;  %v5393_v31 = vld [vmem:[%s5874_s5 + $0xd4] sm:$0x1] }
 0x32f   : > { %v2891_v46 = vrot.slane %v2889_v34, 5 }
 0x330   : > { %v2869_v62 = vrot.slane %v2868_v54, 4  ;;  %v3158_v57 = vsel %vm6060_vm6, %v5397_v43, %v3157_v26 }
 0x332   : > { %4206 = vrot.lane.b32.xlu1 %v4189_v61, %s5788_s10  ;;  %v2874_v6 = vsel %vm5885_vm2, %v2869_v62, %v2873_v37  ;;  %v3200_v37 = vsel %vm6060_vm6, %v5403_v21, %v3199_v9  ;;  %v5391_v9 = vld [vmem:[%s5874_s5 + $0xcc] sm:$0xe] }
 0x333   : > { %4112 = vrot.lane.b32.xlu0 %v4097_v63, %s5787_s9  ;;  %4110 = vrot.lane.b32.xlu2 %v4083_v58, %s5787_s9  ;;  %v5601_v58 = vrot.slane %v5592_v56, 9  ;;  %s5659_s9 = sshll.u32 %s5839_s19, 8 }
 0x334   : > { %v3802_v8 = vpop.permute.xlu1 %3801 }
 0x335   : > { %3821 = vst.msk [vmem:[#allocation3 + $0x10] sm:$0xf] %vm818_vm7, %v3802_v8  ;;  %v3293_v15 = vpop.permute.xlu0 %3292  ;;  %v5643_v16 = vld [vmem:[#allocation2 + $0x30] sm:$0xff]  ;;  %v3249_v20 = vpop.permute.xlu2 %3248  ;;  %v5375_v8 = vld [vmem:[%s5874_s5 + $0x8c] sm:$0x1]  ;;  %v4498_v11 = vsel %vm6060_vm6, %v5601_v58, %v4497_v0 }
 0x336   : > { %3366 = vst.msk [vmem:[#allocation2 + $0x5c] sm:$0xf] %vm3342_vm15, %v3293_v15  ;;  %5488 = vmatmul.msk.bf16.vlgmr.msra.gmra.mxu2 %vm3502_vm0, %v5643_v16  ;;  %v3234_v15 = vrot.slane %v5389_v7, 5  ;;  %v3202_v16 = vrot.slane %v5375_v8, 5 }
 0x337   : > { %3344 = vst.msk [vmem:[#allocation2 + $0x4] sm:$0xf] %vm3342_vm15, %v3249_v20 }
 0x338   : > { %v3235_v24 = vsel %vm6060_vm6, %v5408_v14, %v3234_v15  ;;  %v3203_v29 = vsel %vm6060_vm6, %v3201_v13, %v3202_v16  ;;  %v5378_v14 = vld [vmem:[%s5874_s5 + $0x98] sm:$0x1]  ;;  %v5376_v16 = vld [vmem:[%s5874_s5 + $0x90] sm:$0xe] }
 0x339   : > { %v5404_v21 = vrot.slane %v5376_v16, 9 }
 0x33a   : > { %4257 = vrot.lane.b32.xlu1 %v5561_v10, %s5789_s11 }
 0x33b   : > { %4255 = vrot.lane.b32.xlu0 %v5560_v19, %s5789_s11  ;;  %4208 = vrot.lane.b32.xlu2 %v4193_v32, %s5788_s10  ;;  %v5344_v19 = vld [vmem:[%s5874_s5 + $0xd0] sm:$0xf]  ;;  %v2886_v32 = vshrl.u32 %v5343_v22, 16 }
 0x33c   : > { %v3900_v38 = vpop.permute.xlu1 %3899  ;;  %v2895_v27 = vshll.u32 %v5344_v19, 16  ;;  %v2899_v28 = vshrl.u32 %v5344_v19, 16  ;;  %v3209_v19 = vrot.slane %v5378_v14, 5 }
 0x33d   : > { %3918 = vst.msk [vmem:[#allocation3 + $0x14] sm:$0xf] %vm1158_vm8, %v3900_v38  ;;  %v3898_v44 = vpop.permute.xlu0 %3897  ;;  %v5648_v45 = vld [vmem:[#allocation2 + $0x58] sm:$0xff]  ;;  %v4203_v49 = vpop.permute.xlu2 %4202  ;;  %v3159_v38 = vrot.slane %v3157_v26, 4 }
 0x33e   : > { %3917 = vst.msk [vmem:[#allocation3 + $0x10] sm:$0xf] %vm1158_vm8, %v3898_v44  ;;  %5493 = vmatmul.msk.bf16.vlgmr.msra.gmra.mxu3 %vm3502_vm0, %v5648_v45  ;;  %v2897_v41 = vrot.slane %v2895_v27, 5  ;;  %v2901_v42 = vrot.slane %v2899_v28, 4  ;;  %v5345_v44 = vld [vmem:[%s5874_s5 + $0xd4] sm:$0x1] }
 0x33f   : > { %3966 = vst.msk [vmem:[#allocation3 + $0x10] sm:$0xf] %vm1352_vm9, %v7491_v59  ;;  %v2879_v59 = vrot.slane %v2878_v51, 4  ;;  %v2888_v45 = vrot.slane %v2886_v32, 4  ;;  %v2781_v51 = vrot.slane %v2779_v33, 4  ;;  %v3161_v54 = vsel %vm6060_vm6, %v3159_v38, %v3160_v39 }
 0x340   : > { %v2905_v56 = vshll.u32 %v5345_v44, 16  ;;  %v5360_v27 = vld [vmem:[%s5874_s5 + $0x50] sm:$0x1]  ;;  %v5358_v28 = vld [vmem:[%s5874_s5 + $0x48] sm:$0xe]  ;;  %v3244_v39 = vrot.slane %v5393_v31, 5 }
 0x341   : > { %v2884_v4 = vsel %vm5885_vm2, %v2879_v59, %v2883_v60  ;;  %v2892_v59 = vor.u32 %v2891_v46, %v2888_v45  ;;  %v3167_v35 = vrot.slane %v5360_v27, 5  ;;  %v5398_v36 = vrot.slane %v5358_v28, 9 }
 0x342   : > { %4511 = vrot.lane.b32.xlu1 %v4494_v50, %s5791_s23  ;;  %v3237_v50 = vrot.slane %v5390_v30, 5  ;;  %v2907_v52 = vrot.slane %v2905_v56, 5 }
 0x343   : > { %4417 = vrot.lane.b32.xlu0 %v4402_v48, %s5790_s12  ;;  %4415 = vrot.lane.b32.xlu2 %v4388_v55, %s5790_s12  ;;  %v5330_v48 = vld [vmem:[%s5874_s5 + $0x98] sm:$0x1]  ;;  %v2902_v55 = vor.u32 %v2901_v42, %v2897_v41  ;;  %v2893_v0 = vrot.slane %v2892_v59, 4 }
 0x344   : > { %v3247_v61 = vpop.permute.xlu1 %3246  ;;  %v2785_v62 = vshll.u32 %v5330_v48, 16 }
 0x345   : > { %3343 = vst.msk [vmem:[#allocation2] sm:$0xf] %vm3342_vm15, %v3247_v61  ;;  %v3949_v63 = vpop.permute.xlu0 %3948  ;;  %v4254_v2 = vpop.permute.xlu2 %4253  ;;  %v2782_v61 = vor.u32 %v2781_v51, %v7014_v3  ;;  %v2898_v8 = vsel %vm5885_vm2, %v2893_v0, %v2897_v41 }
 0x346   : > { %3967 = vst.msk [vmem:[#allocation3 + $0x14] sm:$0xf] %vm1352_vm9, %v3949_v63  ;;  %v2903_v63 = vrot.slane %v2902_v55, 4  ;;  %v2787_v5 = vrot.slane %v2785_v62, 5  ;;  %v3655_v55 = vld [vmem:[%s6993_s22 + $0x30] sm:$0xf] }
 0x347   : > { %v2783_v3 = vrot.slane %v2782_v61, 4  ;;  %3663 = vst.msk [vmem:[#allocation3 + $0x18] sm:$0xf] %vm254_vm5, %v3655_v55 }
 0x348   : > { %v2908_v7 = vsel %vm5885_vm2, %v2903_v63, %v2907_v52 }
 0x34a   : > { %2967 = vrot.lane.b32.xlu1 %v2884_v4, %s5790_s12  ;;  %v5377_v4 = vld [vmem:[%s5874_s5 + $0x94] sm:$0xf] }
 0x34b   : > { %2965 = vrot.lane.b32.xlu0 %v2874_v6, %s5790_s12  ;;  %4513 = vrot.lane.b32.xlu2 %v4498_v11, %s5791_s23  ;;  %v5392_v11 = vld [vmem:[%s5874_s5 + $0xd0] sm:$0xf]  ;;  %v3206_v12 = vrot.slane %v5377_v4, 5 }
 0x34c   : > { %v4109_v10 = vpop.permute.xlu1 %4108  ;;  %v5637_v17 = vld [vmem:[#allocation2] sm:$0xff] }
 0x34d   : > { %4127 = vst.msk [vmem:[#allocation3 + $0x14] sm:$0xf] %vm1913_vm10, %v4109_v10  ;;  %v4107_v20 = vpop.permute.xlu0 %4106  ;;  %5482 = vmatmul.msk.bf16.vlgmr.msra.gmra.mxu0 %vm3502_vm0, %v5637_v17  ;;  %v4508_v23 = vpop.permute.xlu2 %4507  ;;  %v5409_v10 = vrot.slane %v5391_v9, 9  ;;  %v3241_v17 = vrot.slane %v5392_v11, 5  ;;  %v3208_v18 = vrot.slane %v3206_v12, 4 }
 0x34e   : > { %4126 = vst.msk [vmem:[#allocation3 + $0x10] sm:$0xf] %vm1913_vm10, %v4107_v20  ;;  %v5359_v20 = vld [vmem:[%s5874_s5 + $0x4c] sm:$0xf]  ;;  %s203_s5 = sand.u32 1, %s5774_s16  }
 0x34f   : > { %4222 = vst.msk [vmem:[#allocation3 + $0x10] sm:$0xf] %vm2250_vm11, %v4203_v49  ;;  %v3236_v49 = vrot.slane %v3234_v15, 4  ;;  %v2788_v15 = vsel %vm5885_vm2, %v2783_v3, %v2787_v5  ;;  %v3210_v26 = vsel %vm6060_vm6, %v3208_v18, %v3209_v19  ;;  %v3243_v38 = vrot.slane %v3241_v17, 4  ;;  %s5103_s6 = sshll.u32 %s203_s5, 8  ;;  %s5010_s19 = scalar_lea.sflag [#allocation5], %s203_s5 }
 0x350   : > { %s7708_s8 = scalar_lea.vmem [#allocation4], %s5103_s6 }
 0x351   : > { %v3238_v60 = vsel %vm6060_vm6, %v3236_v49, %v3237_v50  ;;  %v3245_v43 = vsel %vm6060_vm6, %v3243_v38, %v3244_v39  ;;  %v3656_v49 = vld [vmem:[%s6993_s22 + $0x38] sm:$0xf]  ;;  %s5022_s22 = sshll.u32 %s7708_s8, 4  ;;  %s5023_s22 = int_to_ptr.vmem [resolvable:$true] %s5022_s22 }
 0x352   : > { %3302 = vrot.lane.b32.xlu1 %v3235_v24, %s5791_s23  ;;  %v3164_v24 = vrot.slane %v5359_v20, 5  ;;  %3664 = vst.msk [vmem:[#allocation3 + $0x1c] sm:$0xf] %vm254_vm5, %v3656_v49 }
 0x353   : > { %3284 = vrot.lane.b32.xlu0 %v3203_v29, %s5791_s23  ;;  %3282 = vrot.lane.b32.xlu2 %v3200_v37, %s5791_s23  ;;  %v3207_v29 = vsel %vm6060_vm6, %v5404_v21, %v3206_v12  ;;  %v7624_v32 = vpop.f32.mrf.mxu1 }
 0x354   : > { %v4252_v40 = vpop.permute.xlu1 %4251  ;;  %v3166_v34 = vrot.slane %v3164_v24, 4 }
 0x355   : > { %4271 = vst.msk [vmem:[#allocation3 + $0x10] sm:$0xf] %vm2444_vm12, %v4252_v40  ;;  %v4205_v47 = vpop.permute.xlu0 %4204  ;;  %v2960_v53 = vpop.permute.xlu2 %2959  ;;  %v3165_v40 = vsel %vm6060_vm6, %v5398_v36, %v3164_v24 }
 0x356   : > { %4223 = vst.msk [vmem:[#allocation3 + $0x14] sm:$0xf] %vm2250_vm11, %v4205_v47  ;;  %v3168_v42 = vsel %vm6060_vm6, %v3166_v34, %v3167_v35 }
 0x357   : > { %4272 = vst.msk [vmem:[#allocation3 + $0x14] sm:$0xf] %vm2444_vm12, %v4254_v2 }
 0x358   : > { %3031 = vst.msk [vmem:[#allocation2 + $0x64] sm:$0xf] %vm3005_vm13, %v2960_v53 }
 0x35a   : > { %3260 = vrot.lane.b32.xlu1 %v3161_v54, %s5791_s23 }
 0x35b   : > { %3258 = vrot.lane.b32.xlu0 %v3158_v57, %s5791_s23  ;;  %3304 = vrot.lane.b32.xlu2 %v3238_v60, %s5791_s23  ;;  %v7641_v45 = vpop.f32.mrf.mxu1 }
 0x35c   : > { %v4414_v58 = vpop.permute.xlu1 %4413 }
 0x35d   : > { %4432 = vst.msk [vmem:[#allocation3 + $0x14] sm:$0xf] %vm3005_vm13, %v4414_v58  ;;  %v4412_v2 = vpop.permute.xlu0 %4411  ;;  %v3295_v6 = vpop.permute.xlu2 %3294 }
 0x35e   : > { %4431 = vst.msk [vmem:[#allocation3 + $0x10] sm:$0xf] %vm3005_vm13, %v4412_v2 }
 0x35f   : > { %4527 = vst.msk [vmem:[#allocation3 + $0x10] sm:$0xf] %vm3342_vm15, %v4508_v23  ;;  %v3242_v23 = vsel %vm6060_vm6, %v5409_v10, %v3241_v17 }
 0x362   : > { %2971 = vrot.lane.b32.xlu1 %v2908_v7, %s5790_s12 }
 0x363   : > { %2969 = vrot.lane.b32.xlu0 %v2898_v8, %s5790_s12  ;;  %2951 = vrot.lane.b32.xlu2 %v2788_v15, %s5790_s12  ;;  %s5021_s12 = scalar_lea.hbm %s7825_s4, %s5659_s9 }
 0x364   : > { %v2958_v13 = vpop.permute.xlu1 %2957 }
 0x365   : > { %3030 = vst.msk [vmem:[#allocation2 + $0x60] sm:$0xf] %vm3005_vm13, %v2958_v13  ;;  %v4510_v25 = vpop.permute.xlu0 %4509  ;;  %v3253_v22 = vpop.permute.xlu2 %3252 }
 0x366   : > { %4528 = vst.msk [vmem:[#allocation3 + $0x14] sm:$0xf] %vm3342_vm15, %v4510_v25 }
 0x367   : > { %3367 = vst.msk [vmem:[#allocation2 + $0x60] sm:$0xf] %vm3342_vm15, %v3295_v6 }
 0x368   : > { %3346 = vst.msk [vmem:[#allocation2 + $0xc] sm:$0xf] %vm3342_vm15, %v3253_v22 }
 0x36a   : > { %3306 = vrot.lane.b32.xlu1 %v3242_v23, %s5791_s23 }
 0x36b   : > { %3288 = vrot.lane.b32.xlu0 %v3210_v26, %s5791_s23  ;;  %3286 = vrot.lane.b32.xlu2 %v3207_v29, %s5791_s23 }
 0x36c   : > { %v3277_v33 = vpop.permute.xlu1 %3276 }
 0x36d   : > { %3358 = vst.msk [vmem:[#allocation2 + $0x3c] sm:$0xf] %vm3342_vm15, %v3277_v33  ;;  %v3275_v37 = vpop.permute.xlu0 %3274  ;;  %v5657_v30 = vld [vmem:[#allocation3 + $0x10] sm:$0xff]  ;;  %v3279_v41 = vpop.permute.xlu2 %3278 }
 0x36e   : > { %3357 = vst.msk [vmem:[#allocation2 + $0x38] sm:$0xf] %vm3342_vm15, %v3275_v37  ;;  %5628 = vmatmul.msk.bf16.gmra.mxu1 %vm3502_vm0, %v5657_v30 }
 0x36f   : > { %3359 = vst.msk [vmem:[#allocation2 + $0x40] sm:$0xf] %vm3342_vm15, %v3279_v41 }
 0x372   : > { %3264 = vrot.lane.b32.xlu1 %v3168_v42, %s5791_s23 }
 0x373   : > { %3262 = vrot.lane.b32.xlu0 %v3165_v40, %s5791_s23  ;;  %3308 = vrot.lane.b32.xlu2 %v3245_v43, %s5791_s23  ;;  %s5024_s23 = sshll.u32 %s5021_s12, 4  ;;  %s5025_s23 = int_to_ptr.hbm [resolvable:$true] %s5024_s23 }
 0x374   : > { %v3251_v44 = vpop.permute.xlu1 %3250  ;;  %s5734_s14 = sshra.s32 %s5025_s23, 4  ;;  %s5735_s14 = int_to_ptr.hbm [resolvable:$true] %s5734_s14 }
 0x375   : > { %3345 = vst.msk [vmem:[#allocation2 + $0x8] sm:$0xf] %vm3342_vm15, %v3251_v44  ;;  %v3297_v46 = vpop.permute.xlu0 %3296  ;;  %v5644_v47 = vld [vmem:[#allocation2 + $0x38] sm:$0xff]  ;;  %v3301_v1 = vpop.permute.xlu2 %3300  ;;  %s5736_s20 = scalar_lea.hbm %s5735_s14, 256  ;;  %p5741_p0 = scmp.lt.s32.totalorder %s5735_s14, %s7825_s4 }
 0x376   : > { %3368 = vst.msk [vmem:[#allocation2 + $0x64] sm:$0xf] %vm3342_vm15, %v3297_v46  ;;  %5489 = vmatmul.msk.bf16.gmra.mxu2 %vm3502_vm0, %v5644_v47  ;;  %p5737_p11 = scmp.ne.s32.totalorder %s5735_s14, %s5736_s20  ;;  %p5742_p1 = scmp.lt.s32.totalorder %s5740_s29, %s5736_s20 }
 0x378   : > { %p5738_p12 = pnand %p5737_p11, %p5856_p5  ;;  %p5743_p2 = por %p5742_p1, %p5741_p0 }
 0x37a   : > { %p5739_p13 = pneg %p5738_p12 }
 0x37c   : > { %v2964_v50 = vpop.permute.xlu1 %2963  ;;  %v5638_v51 = vld [vmem:[#allocation2 + $0x8] sm:$0xff]  ;;  %v4598_v48 = vpop.f32.mrf.mxu1  ;;  %p5744_p3 = pnand %p5743_p2, %p5739_p13 }
 0x37d   : > { %3033 = vst.msk [vmem:[#allocation2 + $0x6c] sm:$0xf] %vm3005_vm13, %v2964_v50  ;;  %v2962_v53 = vpop.permute.xlu0 %2961  ;;  %v5649_v54 = vld [vmem:[#allocation2 + $0x60] sm:$0xff]  ;;  %v4626_v56 = vrot.slane %v4598_v48, 1  ;;  %v4627_v57 = vrot.slane %v4598_v48, 2  ;;  %v4628_v59 = vrot.slane %v4598_v48, 3  ;;  %5483 = vmatmul.msk.bf16.gmra.mxu0 %vm3502_vm0, %v5638_v51  ;;  %v3902_v3 = vpop.permute.xlu2 %3901 }
 0x37e   : > { %3032 = vst.msk [vmem:[#allocation2 + $0x68] sm:$0xf] %vm3005_vm13, %v2962_v53  ;;  %v4629_v60 = vrot.slane %v4598_v48, 4  ;;  %v4630_v61 = vrot.slane %v4598_v48, 5  ;;  %v4631_v62 = vrot.slane %v4598_v48, 6  ;;  %v4682_v63 = vperm.slane %v4598_v48, 0  ;;  %5494 = vmatmul.msk.bf16.gmra.mxu3 %vm3502_vm0, %v5649_v54 }
 0x37f   : > { %3370 = vst.msk [vmem:[#allocation2 + $0x6c] sm:$0xf] %vm3342_vm15, %v3301_v1  ;;  %v4632_v52 = vrot.slane %v4598_v48, 7  ;;  %v4683_v58 = vperm.slane %v4626_v56, 0  ;;  %v4684_v0 = vperm.slane %v4627_v57, 0  ;;  %v4685_v2 = vperm.slane %v4628_v59, 0 }
 0x380   : > { %v4686_v4 = vperm.slane %v4629_v60, 0  ;;  %4746 = vst [vmem:[#allocation1] ss:$4 sm:$0xff] %v4682_v63  ;;  %v4687_v5 = vperm.slane %v4630_v61, 0  ;;  %v4688_v6 = vperm.slane %v4631_v62, 0 }
 0x381   : > { %4748 = vst [vmem:[#allocation1 + $0x1] ss:$4 sm:$0xff] %v4683_v58  ;;  %v4689_v7 = vperm.slane %v4632_v52, 0 }
 0x382   : > { %4750 = vst [vmem:[#allocation1 + $0x2] ss:$4 sm:$0xff] %v4684_v0 }
 0x383   : > { %4752 = vst [vmem:[#allocation1 + $0x3] ss:$4 sm:$0xff] %v4685_v2 }
 0x384   : > { %v3299_v8 = vpop.permute.xlu1 %3298  ;;  %4754 = vst [vmem:[#allocation1 + $0x20] ss:$4 sm:$0xff] %v4686_v4  ;;  %v4600_v10 = vpop.f32.mrf.mxu1 }
 0x385   : > { %v3281_v9 = vpop.permute.xlu0 %3280  ;;  %4756 = vst [vmem:[#allocation1 + $0x21] ss:$4 sm:$0xff] %v4687_v5  ;;  %v3953_v12 = vpop.permute.xlu2 %3952  ;;  %v4633_v18 = vrot.slane %v4600_v10, 1  ;;  %v4634_v19 = vrot.slane %v4600_v10, 2  ;;  %v4635_v20 = vrot.slane %v4600_v10, 3  ;;  %v4636_v21 = vrot.slane %v4600_v10, 4 }
 0x386   : > { %4758 = vst [vmem:[#allocation1 + $0x22] ss:$4 sm:$0xff] %v4688_v6  ;;  %v4637_v22 = vrot.slane %v4600_v10, 5  ;;  %v4690_v23 = vperm.slane %v4600_v10, 0  ;;  %v4638_v29 = vrot.slane %v4600_v10, 6  ;;  %v4639_v34 = vrot.slane %v4600_v10, 7 }
 0x387   : > { %4760 = vst [vmem:[#allocation1 + $0x23] ss:$4 sm:$0xff] %v4689_v7  ;;  %v4691_v28 = vperm.slane %v4633_v18, 0  ;;  %v4692_v31 = vperm.slane %v4634_v19, 0  ;;  %v4693_v35 = vperm.slane %v4635_v20, 0  ;;  %v4694_v33 = vperm.slane %v4636_v21, 0 }
 0x388   : > { %3369 = vst.msk [vmem:[#allocation2 + $0x68] sm:$0xf] %vm3342_vm15, %v3299_v8  ;;  %v4695_v37 = vperm.slane %v4637_v22, 0  ;;  %v4696_v30 = vperm.slane %v4638_v29, 0  ;;  %v4697_v38 = vperm.slane %v4639_v34, 0 }
 0x389   : > { %3360 = vst.msk [vmem:[#allocation2 + $0x44] sm:$0xf] %vm3342_vm15, %v3281_v9 }
 0x38a   : > { %v7657_v11 = vld.sshfl [vmem:[#allocation1] sm:$0xff pattern:$0x73625140] }
 0x38b   : > { %4763 = vst [vmem:[#allocation1] ss:$4 sm:$0xff] %v4682_v63 }
 0x38c   : > { %v3808_v14 = vpop.permute.xlu1 %3807  ;;  %4764 = vst [vmem:[#allocation1 + $0x1] ss:$4 sm:$0xff] %v4683_v58 }
 0x38d   : > { %v3806_v15 = vpop.permute.xlu0 %3805  ;;  %4765 = vst [vmem:[#allocation1 + $0x2] ss:$4 sm:$0xff] %v4684_v0  ;;  %v4111_v26 = vpop.permute.xlu2 %4110 }
 0x38e   : > { %v7659_v16 = vld.sshfl [vmem:[#allocation1 + $0x20] sm:$0xff pattern:$0x73625140]  ;;  %4766 = vst [vmem:[#allocation1 + $0x3] ss:$4 sm:$0xff] %v4685_v2 }
 0x38f   : > { %4767 = vst [vmem:[#allocation1 + $0x20] ss:$4 sm:$0xff] %v4686_v4  ;;  %v5650_v17 = vld [vmem:[#allocation2 + $0x68] sm:$0xff] }
 0x390   : > { %4768 = vst [vmem:[#allocation1 + $0x21] ss:$4 sm:$0xff] %v4687_v5  ;;  %v5645_v13 = vld [vmem:[#allocation2 + $0x40] sm:$0xff]  ;;  %5495 = vmatmul.msk.bf16.gmra.mxu3 %vm3502_vm0, %v5650_v17 }
 0x391   : > { %4769 = vst [vmem:[#allocation1 + $0x22] ss:$4 sm:$0xff] %v4688_v6  ;;  %5490 = vmatmul.msk.bf16.gmra.mxu2 %vm3502_vm0, %v5645_v13 }
 0x392   : > { %4770 = vst [vmem:[#allocation1 + $0x23] ss:$4 sm:$0xff] %v4689_v7 }
 0x393   : > { %3824 = vst.msk [vmem:[#allocation3 + $0x1c] sm:$0xf] %vm818_vm7, %v3808_v14 }
 0x394   : > { %v3951_v25 = vpop.permute.xlu1 %3950  ;;  %3823 = vst.msk [vmem:[#allocation3 + $0x18] sm:$0xf] %vm818_vm7, %v3806_v15 }
 0x395   : > { %v3904_v24 = vpop.permute.xlu0 %3903  ;;  %v7665_v27 = vld.sshfl [vmem:[#allocation1] sm:$0xff pattern:$0x73625140]  ;;  %3919 = vst.msk [vmem:[#allocation3 + $0x18] sm:$0xf] %vm1158_vm8, %v3902_v3  ;;  %v4209_v42 = vpop.permute.xlu2 %4208 }
 0x396   : > { %4773 = vst [vmem:[#allocation1] ss:$4 sm:$0xff] %v4690_v23 }
 0x397   : > { %4774 = vst [vmem:[#allocation1 + $0x1] ss:$4 sm:$0xff] %v4691_v28 }
 0x398   : > { %4775 = vst [vmem:[#allocation1 + $0x2] ss:$4 sm:$0xff] %v4692_v31 }
 0x399   : > { %v7668_v36 = vld.sshfl [vmem:[#allocation1 + $0x20] sm:$0xff pattern:$0x73625140]  ;;  %4776 = vst [vmem:[#allocation1 + $0x3] ss:$4 sm:$0xff] %v4693_v35 }
 0x39a   : > { %4777 = vst [vmem:[#allocation1 + $0x20] ss:$4 sm:$0xff] %v4694_v33 }
 0x39b   : > { %4778 = vst [vmem:[#allocation1 + $0x21] ss:$4 sm:$0xff] %v4695_v37 }
 0x39c   : > { %v3257_v39 = vpop.permute.xlu1 %3256  ;;  %4779 = vst [vmem:[#allocation1 + $0x22] ss:$4 sm:$0xff] %v4696_v30 }
 0x39d   : > { %v3255_v41 = vpop.permute.xlu0 %3254  ;;  %4780 = vst [vmem:[#allocation1 + $0x23] ss:$4 sm:$0xff] %v4697_v38  ;;  %v4416_v47 = vpop.permute.xlu2 %4415 }
 0x39e   : > { %3968 = vst.msk [vmem:[#allocation3 + $0x18] sm:$0xf] %vm1352_vm9, %v3951_v25 }
 0x39f   : > { %3920 = vst.msk [vmem:[#allocation3 + $0x1c] sm:$0xf] %vm1158_vm8, %v3904_v24 }
 0x3a0   : > { %v7672_v40 = vld.sshfl [vmem:[#allocation1] sm:$0xff pattern:$0x73625140]  ;;  %3969 = vst.msk [vmem:[#allocation3 + $0x1c] sm:$0xf] %vm1352_vm9, %v3953_v12 }
 0x3a1   : > { %4783 = vst [vmem:[#allocation1] ss:$4 sm:$0xff] %v4690_v23 }
 0x3a2   : > { %4784 = vst [vmem:[#allocation1 + $0x1] ss:$4 sm:$0xff] %v4691_v28 }
 0x3a3   : > { %4785 = vst [vmem:[#allocation1 + $0x2] ss:$4 sm:$0xff] %v4692_v31 }
 0x3a4   : > { %v4207_v43 = vpop.permute.xlu1 %4206  ;;  %v7675_v44 = vld.sshfl [vmem:[#allocation1 + $0x20] sm:$0xff pattern:$0x73625140]  ;;  %4786 = vst [vmem:[#allocation1 + $0x3] ss:$4 sm:$0xff] %v4693_v35 }
 0x3a5   : > { %v4113_v46 = vpop.permute.xlu0 %4112  ;;  %4787 = vst [vmem:[#allocation1 + $0x20] ss:$4 sm:$0xff] %v4694_v33  ;;  %v4514_v0 = vpop.permute.xlu2 %4513 }
 0x3a6   : > { %4788 = vst [vmem:[#allocation1 + $0x21] ss:$4 sm:$0xff] %v4695_v37 }
 0x3a7   : > { %4789 = vst [vmem:[#allocation1 + $0x22] ss:$4 sm:$0xff] %v4696_v30 }
 0x3a8   : > { %4790 = vst [vmem:[#allocation1 + $0x23] ss:$4 sm:$0xff] %v4697_v38 }
 0x3a9   : > { %4128 = vst.msk [vmem:[#allocation3 + $0x18] sm:$0xf] %vm1913_vm10, %v4111_v26 }
 0x3aa   : > { %3348 = vst.msk [vmem:[#allocation2 + $0x14] sm:$0xf] %vm3342_vm15, %v3257_v39 }
 0x3ab   : > { %3347 = vst.msk [vmem:[#allocation2 + $0x10] sm:$0xf] %vm3342_vm15, %v3255_v41  ;;  %v4603_v49 = vpop.f32.mrf.mxu1  ;;  %v7683_v56 = vld.sshfl [vmem:[#allocation1] sm:$0xff pattern:$0x73625140] }
 0x3ac   : > { %v4258_v1 = vpop.permute.xlu1 %4257  ;;  %4224 = vst.msk [vmem:[#allocation3 + $0x18] sm:$0xf] %vm2250_vm11, %v4207_v43  ;;  %v4640_v51 = vrot.slane %v4603_v49, 1  ;;  %v4641_v53 = vrot.slane %v4603_v49, 2  ;;  %v4642_v48 = vrot.slane %v4603_v49, 3  ;;  %v4643_v54 = vrot.slane %v4603_v49, 4 }
 0x3ad   : > { %v4256_v50 = vpop.permute.xlu0 %4255  ;;  %4129 = vst.msk [vmem:[#allocation3 + $0x1c] sm:$0xf] %vm1913_vm10, %v4113_v46  ;;  %v4698_v55 = vperm.slane %v4603_v49, 0  ;;  %v4644_v57 = vrot.slane %v4603_v49, 5  ;;  %v4645_v60 = vrot.slane %v4603_v49, 6  ;;  %v4646_v62 = vrot.slane %v4603_v49, 7  ;;  %v3283_v12 = vpop.permute.xlu2 %3282 }
 0x3ae   : > { %4225 = vst.msk [vmem:[#allocation3 + $0x1c] sm:$0xf] %vm2250_vm11, %v4209_v42  ;;  %v4699_v59 = vperm.slane %v4640_v51, 0  ;;  %v4700_v61 = vperm.slane %v4641_v53, 0  ;;  %v4701_v63 = vperm.slane %v4642_v48, 0  ;;  %v4702_v58 = vperm.slane %v4643_v54, 0 }
 0x3af   : > { %4274 = vst.msk [vmem:[#allocation3 + $0x1c] sm:$0xf] %vm2444_vm12, %v4258_v1  ;;  %v4703_v2 = vperm.slane %v4644_v57, 0  ;;  %v4704_v3 = vperm.slane %v4645_v60, 0  ;;  %v4705_v7 = vperm.slane %v4646_v62, 0 }
 0x3b0   : > { %4273 = vst.msk [vmem:[#allocation3 + $0x18] sm:$0xf] %vm2444_vm12, %v4256_v50  ;;  %v7689_v6 = vld.sshfl [vmem:[#allocation1 + $0x20] sm:$0xff pattern:$0x73625140] }
 0x3b1   : > { %4433 = vst.msk [vmem:[#allocation3 + $0x18] sm:$0xf] %vm3005_vm13, %v4416_v47 }
 0x3b2   : > { %v5639_v52 = vld [vmem:[#allocation2 + $0x10] sm:$0xff]  ;;  %4793 = vst [vmem:[#allocation1] ss:$4 sm:$0xff] %v4698_v55 }
 0x3b3   : > { %4794 = vst [vmem:[#allocation1 + $0x1] ss:$4 sm:$0xff] %v4699_v59  ;;  %5484 = vmatmul.msk.bf16.gmra.mxu0 %vm3502_vm0, %v5639_v52  ;;  %v4605_v10 = vpop.f32.mrf.mxu1 }
 0x3b4   : > { %v4512_v4 = vpop.permute.xlu1 %4511  ;;  %4795 = vst [vmem:[#allocation1 + $0x2] ss:$4 sm:$0xff] %v4700_v61  ;;  %v4647_v17 = vrot.slane %v4605_v10, 1  ;;  %v4648_v20 = vrot.slane %v4605_v10, 2  ;;  %v4649_v25 = vrot.slane %v4605_v10, 3  ;;  %v4650_v21 = vrot.slane %v4605_v10, 4 }
 0x3b5   : > { %v4418_v5 = vpop.permute.xlu0 %4417  ;;  %4796 = vst [vmem:[#allocation1 + $0x3] ss:$4 sm:$0xff] %v4701_v63  ;;  %v4706_v22 = vperm.slane %v4605_v10, 0  ;;  %v3305_v23 = vpop.permute.xlu2 %3304  ;;  %v4651_v29 = vrot.slane %v4605_v10, 5  ;;  %v4652_v34 = vrot.slane %v4605_v10, 6  ;;  %v4653_v35 = vrot.slane %v4605_v10, 7 }
 0x3b6   : > { %4797 = vst [vmem:[#allocation1 + $0x20] ss:$4 sm:$0xff] %v4702_v58  ;;  %v4707_v26 = vperm.slane %v4647_v17, 0  ;;  %v4708_v31 = vperm.slane %v4648_v20, 0  ;;  %v4709_v33 = vperm.slane %v4649_v25, 0  ;;  %v4710_v30 = vperm.slane %v4650_v21, 0 }
 0x3b7   : > { %4798 = vst [vmem:[#allocation1 + $0x21] ss:$4 sm:$0xff] %v4703_v2  ;;  %v4711_v41 = vperm.slane %v4651_v29, 0  ;;  %v4712_v42 = vperm.slane %v4652_v34, 0  ;;  %v4713_v46 = vperm.slane %v4653_v35, 0 }
 0x3b8   : > { %4799 = vst [vmem:[#allocation1 + $0x22] ss:$4 sm:$0xff] %v4704_v3 }
 0x3b9   : > { %4800 = vst [vmem:[#allocation1 + $0x23] ss:$4 sm:$0xff] %v4705_v7  ;;  %v3594_v43 = vpop.f32.mrf.mxu2 }
 0x3ba   : > { %4529 = vst.msk [vmem:[#allocation3 + $0x18] sm:$0xf] %vm3342_vm15, %v4512_v4 }
 0x3bb   : > { %4434 = vst.msk [vmem:[#allocation3 + $0x1c] sm:$0xf] %vm3005_vm13, %v4418_v5 }
 0x3bc   : > { %v2968_v8 = vpop.permute.xlu1 %2967  ;;  %v7693_v9 = vld.sshfl [vmem:[#allocation1] sm:$0xff pattern:$0x73625140]  ;;  %4530 = vst.msk [vmem:[#allocation3 + $0x1c] sm:$0xf] %vm3342_vm15, %v4514_v0 }
 0x3bd   : > { %v2966_v14 = vpop.permute.xlu0 %2965  ;;  %4803 = vst [vmem:[#allocation1] ss:$4 sm:$0xff] %v4698_v55  ;;  %v2952_v47 = vpop.permute.xlu2 %2951 }
 0x3be   : > { %4804 = vst [vmem:[#allocation1 + $0x1] ss:$4 sm:$0xff] %v4699_v59 }
 0x3bf   : > { %4805 = vst [vmem:[#allocation1 + $0x2] ss:$4 sm:$0xff] %v4700_v61 }
 0x3c0   : > { %v7697_v15 = vld.sshfl [vmem:[#allocation1 + $0x20] sm:$0xff pattern:$0x73625140]  ;;  %4806 = vst [vmem:[#allocation1 + $0x3] ss:$4 sm:$0xff] %v4701_v63 }
 0x3c1   : > { %4807 = vst [vmem:[#allocation1 + $0x20] ss:$4 sm:$0xff] %v4702_v58  ;;  %v3596_v48 = vpop.f32.mrf.mxu2 }
 0x3c2   : > { %4808 = vst [vmem:[#allocation1 + $0x21] ss:$4 sm:$0xff] %v4703_v2 }
 0x3c3   : > { %4809 = vst [vmem:[#allocation1 + $0x22] ss:$4 sm:$0xff] %v4704_v3  ;;  %v5658_v13 = vld [vmem:[#allocation3 + $0x18] sm:$0xff] }
 0x3c4   : > { %v3303_v18 = vpop.permute.xlu1 %3302  ;;  %4810 = vst [vmem:[#allocation1 + $0x23] ss:$4 sm:$0xff] %v4705_v7  ;;  %5629 = vmatmul.msk.bf16.gmra.mxu1 %vm3502_vm0, %v5658_v13 }
 0x3c5   : > { %v7701_v19 = vpop.permute.xlu0 %3284  ;;  %3361 = vst.msk [vmem:[#allocation2 + $0x48] sm:$0xf] %vm3342_vm15, %v3283_v12  ;;  %v3287_v57 = vpop.permute.xlu2 %3286 }
 0x3c6   : > { %3035 = vst.msk [vmem:[#allocation2 + $0x74] sm:$0xf] %vm3005_vm13, %v2968_v8 }
 0x3c7   : > { %v4811_v24 = vld.sshfl [vmem:[#allocation1] sm:$0xff pattern:$0x73625140]  ;;  %3034 = vst.msk [vmem:[#allocation2 + $0x70] sm:$0xf] %vm3005_vm13, %v2966_v14 }
 0x3c8   : > { %v4955_v28 = vadd.f32 %v4811_v24, %v7624_v32  ;;  %4813 = vst [vmem:[#allocation1] ss:$4 sm:$0xff] %v4706_v22 }
 0x3c9   : > { %4814 = vst [vmem:[#allocation1 + $0x1] ss:$4 sm:$0xff] %v4707_v26 }
 0x3ca   : > { %4987 = vst [vmem:[%s7708_s8 + $0x50] sm:$0xff] %v4955_v28  ;;  %v3564_v51 = vpop.f32.mrf.mxu0 }
 0x3cb   : > { %v4812_v37 = vld.sshfl [vmem:[#allocation1 + $0x20] sm:$0xff pattern:$0x73625140]  ;;  %4815 = vst [vmem:[#allocation1 + $0x2] ss:$4 sm:$0xff] %v4708_v31  ;;  %v4945_v60 = vadd.f32 %v7657_v11, %v3564_v51 }
 0x3cc   : > { %v3261_v38 = vpop.permute.xlu1 %3260  ;;  %v4956_v39 = vadd.f32 %v4812_v37, %v7641_v45  ;;  %4816 = vst [vmem:[#allocation1 + $0x3] ss:$4 sm:$0xff] %v4709_v33 }
 0x3cd   : > { %v3259_v32 = vpop.permute.xlu0 %3258  ;;  %4817 = vst [vmem:[#allocation1 + $0x20] ss:$4 sm:$0xff] %v4710_v30  ;;  %v3309_v52 = vpop.permute.xlu2 %3308 }
 0x3ce   : > { %4988 = vst [vmem:[%s7708_s8 + $0x58] sm:$0xff] %v4956_v39 }
 0x3cf   : > { %4818 = vst [vmem:[#allocation1 + $0x21] ss:$4 sm:$0xff] %v4711_v41 }
 0x3d0   : > { %4819 = vst [vmem:[#allocation1 + $0x22] ss:$4 sm:$0xff] %v4712_v42 }
 0x3d1   : > { %4820 = vst [vmem:[#allocation1 + $0x23] ss:$4 sm:$0xff] %v4713_v46 }
 0x3d2   : > { %3372 = vst.msk [vmem:[#allocation2 + $0x74] sm:$0xf] %vm3342_vm15, %v3305_v23  ;;  %v3566_v62 = vpop.f32.mrf.mxu0 }
 0x3d3   : > { %v4821_v1 = vld.sshfl [vmem:[#allocation1] sm:$0xff pattern:$0x73625140]  ;;  %3371 = vst.msk [vmem:[#allocation2 + $0x70] sm:$0xf] %vm3342_vm15, %v3303_v18  ;;  %v4946_v63 = vadd.f32 %v7659_v16, %v3566_v62 }
 0x3d4   : > { %v2972_v49 = vpop.permute.xlu1 %2971  ;;  %4823 = vst [vmem:[#allocation1] ss:$4 sm:$0xff] %v4706_v22  ;;  %v4957_v45 = vadd.f32 %v4821_v1, %v3594_v43 }
 0x3d5   : > { %v2970_v50 = vpop.permute.xlu0 %2969  ;;  %4824 = vst [vmem:[#allocation1 + $0x1] ss:$4 sm:$0xff] %v4707_v26 }
 0x3d6   : > { %4825 = vst [vmem:[#allocation1 + $0x2] ss:$4 sm:$0xff] %v4708_v31 }
 0x3d7   : > { %4826 = vst [vmem:[#allocation1 + $0x3] ss:$4 sm:$0xff] %v4709_v33 }
 0x3d8   : > { %v4822_v53 = vld.sshfl [vmem:[#allocation1 + $0x20] sm:$0xff pattern:$0x73625140]  ;;  %4989 = vst [vmem:[%s7708_s8 + $0x60] sm:$0xff] %v4957_v45 }
 0x3d9   : > { %4827 = vst [vmem:[#allocation1 + $0x20] ss:$4 sm:$0xff] %v4710_v30  ;;  %v4958_v54 = vadd.f32 %v4822_v53, %v3596_v48 }
 0x3da   : > { %4828 = vst [vmem:[#allocation1 + $0x21] ss:$4 sm:$0xff] %v4711_v41  ;;  %v5651_v55 = vld [vmem:[#allocation2 + $0x70] sm:$0xff] }
 0x3db   : > { %4829 = vst [vmem:[#allocation1 + $0x22] ss:$4 sm:$0xff] %v4712_v42  ;;  %5496 = vmatmul.msk.bf16.gmra.mxu3 %vm3502_vm0, %v5651_v55 }
 0x3dc   : > { %4830 = vst [vmem:[#allocation1 + $0x23] ss:$4 sm:$0xff] %v4713_v46  ;;  %v3307_v59 = vpop.permute.xlu1 %3306 }
 0x3dd   : > { %4990 = vst [vmem:[%s7708_s8 + $0x68] sm:$0xff] %v4958_v54  ;;  %v3289_v61 = vpop.permute.xlu0 %3288 }
 0x3de   : > { %3362 = vst.msk [vmem:[#allocation2 + $0x4c] sm:$0xf] %vm3342_vm15, %v7701_v19  ;;  %v4831_v8 = vld.sshfl [vmem:[#allocation1] sm:$0xff pattern:$0x73625140] }
 0x3df   : > { %3027 = vst.msk [vmem:[#allocation2 + $0x54] sm:$0xf] %vm3005_vm13, %v2952_v47 }
 0x3e0   : > { %3350 = vst.msk [vmem:[#allocation2 + $0x1c] sm:$0xf] %vm3342_vm15, %v3261_v38 }
 0x3e1   : > { %3349 = vst.msk [vmem:[#allocation2 + $0x18] sm:$0xf] %vm3342_vm15, %v3259_v32 }
 0x3e2   : > { %4977 = vst [vmem:[%s7708_s8] sm:$0xff] %v4945_v60 }
 0x3e3   : > { %3363 = vst.msk [vmem:[#allocation2 + $0x50] sm:$0xf] %vm3342_vm15, %v3287_v57  ;;  %v4832_v23 = vld.sshfl [vmem:[#allocation1 + $0x20] sm:$0xff pattern:$0x73625140] }
 0x3e4   : > { %3037 = vst.msk [vmem:[#allocation2 + $0x7c] sm:$0xf] %vm3005_vm13, %v2972_v49  ;;  %v3265_v11 = vpop.permute.xlu1 %3264 }
 0x3e5   : > { %v5646_v58 = vld [vmem:[#allocation2 + $0x48] sm:$0xff]  ;;  %3036 = vst.msk [vmem:[#allocation2 + $0x78] sm:$0xf] %vm3005_vm13, %v2970_v50  ;;  %v3263_v2 = vpop.permute.xlu0 %3262 }
 0x3e6   : > { %4978 = vst [vmem:[%s7708_s8 + $0x8] sm:$0xff] %v4946_v63  ;;  %5491 = vmatmul.msk.bf16.gmra.mxu2 %vm3502_vm0, %v5646_v58  ;;  %v3619_v63 = vpop.f32.mrf.mxu3 }
 0x3e7   : > { %3374 = vst.msk [vmem:[#allocation2 + $0x7c] sm:$0xf] %vm3342_vm15, %v3309_v52 }
 0x3e8   : > { %v5640_v0 = vld [vmem:[#allocation2 + $0x18] sm:$0xff]  ;;  %3373 = vst.msk [vmem:[#allocation2 + $0x78] sm:$0xf] %vm3342_vm15, %v3307_v59 }
 0x3e9   : > { %3364 = vst.msk [vmem:[#allocation2 + $0x54] sm:$0xf] %vm3342_vm15, %v3289_v61  ;;  %5485 = vmatmul.msk.bf16.gmra.mxu0 %vm3502_vm0, %v5640_v0 }
 0x3ea   : > { %3352 = vst.msk [vmem:[#allocation2 + $0x24] sm:$0xf] %vm3342_vm15, %v3265_v11 }
 0x3eb   : > { %3351 = vst.msk [vmem:[#allocation2 + $0x20] sm:$0xf] %vm3342_vm15, %v3263_v2  ;;  %v4608_v16 = vpop.f32.mrf.mxu1 }
 0x3ec   : > { %v4654_v4 = vrot.slane %v4608_v16, 1  ;;  %v4655_v3 = vrot.slane %v4608_v16, 2  ;;  %v4656_v5 = vrot.slane %v4608_v16, 3  ;;  %v4657_v7 = vrot.slane %v4608_v16, 4 }
 0x3ed   : > { %v4658_v12 = vrot.slane %v4608_v16, 5  ;;  %v4659_v14 = vrot.slane %v4608_v16, 6  ;;  %v4714_v10 = vperm.slane %v4608_v16, 0  ;;  %v4660_v17 = vrot.slane %v4608_v16, 7 }
 0x3ee   : > { %v4715_v13 = vperm.slane %v4654_v4, 0  ;;  %v4716_v18 = vperm.slane %v4655_v3, 0  ;;  %v4717_v19 = vperm.slane %v4656_v5, 0  ;;  %v4718_v25 = vperm.slane %v4657_v7, 0  ;;  %v3621_v2 = vpop.f32.mrf.mxu3 }
 0x3ef   : > { %v5652_v20 = vld [vmem:[#allocation2 + $0x78] sm:$0xff]  ;;  %4833 = vst [vmem:[#allocation1] ss:$4 sm:$0xff] %v4714_v10  ;;  %v4719_v21 = vperm.slane %v4658_v12, 0  ;;  %v4720_v22 = vperm.slane %v4659_v14, 0  ;;  %v4721_v24 = vperm.slane %v4660_v17, 0 }
 0x3f0   : > { %4834 = vst [vmem:[#allocation1 + $0x1] ss:$4 sm:$0xff] %v4715_v13  ;;  %5497 = vmatmul.msk.bf16.gmra.mxu3 %vm3502_vm0, %v5652_v20  ;;  %v5647_v26 = vld [vmem:[#allocation2 + $0x50] sm:$0xff] }
 0x3f1   : > { %4835 = vst [vmem:[#allocation1 + $0x2] ss:$4 sm:$0xff] %v4716_v18 }
 0x3f2   : > { %4836 = vst [vmem:[#allocation1 + $0x3] ss:$4 sm:$0xff] %v4717_v19  ;;  %v5641_v28 = vld [vmem:[#allocation2 + $0x20] sm:$0xff] }
 0x3f3   : > { %4837 = vst [vmem:[#allocation1 + $0x20] ss:$4 sm:$0xff] %v4718_v25  ;;  %v4610_v33 = vpop.f32.mrf.mxu1 }
 0x3f4   : > { %4838 = vst [vmem:[#allocation1 + $0x21] ss:$4 sm:$0xff] %v4719_v21  ;;  %v4661_v38 = vrot.slane %v4610_v33, 1  ;;  %v4662_v39 = vrot.slane %v4610_v33, 2  ;;  %v4663_v41 = vrot.slane %v4610_v33, 3  ;;  %v4664_v43 = vrot.slane %v4610_v33, 4 }
 0x3f5   : > { %4839 = vst [vmem:[#allocation1 + $0x22] ss:$4 sm:$0xff] %v4720_v22  ;;  %v4722_v46 = vperm.slane %v4610_v33, 0  ;;  %v4665_v1 = vrot.slane %v4610_v33, 5  ;;  %v4666_v45 = vrot.slane %v4610_v33, 6 }
 0x3f6   : > { %4840 = vst [vmem:[#allocation1 + $0x23] ss:$4 sm:$0xff] %v4721_v24  ;;  %5492 = vmatmul.msk.bf16.gmra.mxu2 %vm3502_vm0, %v5647_v26  ;;  %v4723_v49 = vperm.slane %v4661_v38, 0  ;;  %v4724_v50 = vperm.slane %v4662_v39, 0  ;;  %v4725_v51 = vperm.slane %v4663_v41, 0  ;;  %v4726_v48 = vperm.slane %v4664_v43, 0 }
 0x3f7   : > { %v4727_v55 = vperm.slane %v4665_v1, 0  ;;  %v4728_v57 = vperm.slane %v4666_v45, 0 }
 0x3f9   : > { %v4841_v29 = vld.sshfl [vmem:[#allocation1] sm:$0xff pattern:$0x73625140]  ;;  %v3599_v31 = vpop.f32.mrf.mxu2  ;;  %5486 = vmatmul.msk.bf16.gmra.mxu0 %vm3502_vm0, %v5641_v28 }
 0x3fa   : > { %4843 = vst [vmem:[#allocation1] ss:$4 sm:$0xff] %v4714_v10  ;;  %v3569_v34 = vpop.f32.mrf.mxu0  ;;  %v4959_v37 = vadd.f32 %v4831_v8, %v3599_v31 }
 0x3fb   : > { %4844 = vst [vmem:[#allocation1 + $0x1] ss:$4 sm:$0xff] %v4715_v13  ;;  %v4947_v30 = vadd.f32 %v7665_v27, %v3569_v34  ;;  %v4667_v27 = vrot.slane %v4610_v33, 7 }
 0x3fc   : > { %4845 = vst [vmem:[#allocation1 + $0x2] ss:$4 sm:$0xff] %v4716_v18 }
 0x3fd   : > { %v4842_v35 = vld.sshfl [vmem:[#allocation1 + $0x20] sm:$0xff pattern:$0x73625140]  ;;  %4846 = vst [vmem:[#allocation1 + $0x3] ss:$4 sm:$0xff] %v4717_v19  ;;  %v4729_v60 = vperm.slane %v4667_v27, 0 }
 0x3fe   : > { %4847 = vst [vmem:[#allocation1 + $0x20] ss:$4 sm:$0xff] %v4718_v25 }
 0x3ff   : > { %4848 = vst [vmem:[#allocation1 + $0x21] ss:$4 sm:$0xff] %v4719_v21 }
 0x400   : > { %4849 = vst [vmem:[#allocation1 + $0x22] ss:$4 sm:$0xff] %v4720_v22 }
 0x401   : > { %4850 = vst [vmem:[#allocation1 + $0x23] ss:$4 sm:$0xff] %v4721_v24  ;;  %v3601_v32 = vpop.f32.mrf.mxu2  ;;  %v3624_v12 = vpop.f32.mrf.mxu3 }
 0x402   : > { %4991 = vst [vmem:[%s7708_s8 + $0x70] sm:$0xff] %v4959_v37  ;;  %v4960_v42 = vadd.f32 %v4832_v23, %v3601_v32  ;;  %v3571_v53 = vpop.f32.mrf.mxu0 }
 0x403   : > { %4979 = vst [vmem:[%s7708_s8 + $0x10] sm:$0xff] %v4947_v30  ;;  %v4948_v59 = vadd.f32 %v7668_v36, %v3571_v53 }
 0x404   : > { %v7743_v47 = vld.sshfl [vmem:[#allocation1] sm:$0xff pattern:$0x73625140]  ;;  %4992 = vst [vmem:[%s7708_s8 + $0x78] sm:$0xff] %v4960_v42 }
 0x405   : > { %4853 = vst [vmem:[#allocation1] ss:$4 sm:$0xff] %v4722_v46 }
 0x406   : > { %4854 = vst [vmem:[#allocation1 + $0x1] ss:$4 sm:$0xff] %v4723_v49 }
 0x407   : > { %4855 = vst [vmem:[#allocation1 + $0x2] ss:$4 sm:$0xff] %v4724_v50 }
 0x408   : > { %v7746_v54 = vld.sshfl [vmem:[#allocation1 + $0x20] sm:$0xff pattern:$0x73625140]  ;;  %4856 = vst [vmem:[#allocation1 + $0x3] ss:$4 sm:$0xff] %v4725_v51 }
 0x409   : > { %4857 = vst [vmem:[#allocation1 + $0x20] ss:$4 sm:$0xff] %v4726_v48  ;;  %v3626_v20 = vpop.f32.mrf.mxu3 }
 0x40a   : > { %4858 = vst [vmem:[#allocation1 + $0x21] ss:$4 sm:$0xff] %v4727_v55 }
 0x40b   : > { %4859 = vst [vmem:[#allocation1 + $0x22] ss:$4 sm:$0xff] %v4728_v57 }
 0x40c   : > { %4860 = vst [vmem:[#allocation1 + $0x23] ss:$4 sm:$0xff] %v4729_v60 }
 0x40d   : > { %4980 = vst [vmem:[%s7708_s8 + $0x18] sm:$0xff] %v4948_v59 }
 0x40f   : > { %v7750_v61 = vld.sshfl [vmem:[#allocation1] sm:$0xff pattern:$0x73625140] }
 0x410   : > { %4863 = vst [vmem:[#allocation1] ss:$4 sm:$0xff] %v4722_v46 }
 0x411   : > { %4864 = vst [vmem:[#allocation1 + $0x1] ss:$4 sm:$0xff] %v4723_v49 }
 0x412   : > { %4865 = vst [vmem:[#allocation1 + $0x2] ss:$4 sm:$0xff] %v4724_v50 }
 0x413   : > { %v7752_v62 = vld.sshfl [vmem:[#allocation1 + $0x20] sm:$0xff pattern:$0x73625140]  ;;  %4866 = vst [vmem:[#allocation1 + $0x3] ss:$4 sm:$0xff] %v4725_v51  ;;  %v3629_v34 = vpop.f32.mrf.mxu3 }
 0x414   : > { %4867 = vst [vmem:[#allocation1 + $0x20] ss:$4 sm:$0xff] %v4726_v48  ;;  %v3604_v36 = vpop.f32.mrf.mxu2 }
 0x415   : > { %4868 = vst [vmem:[#allocation1 + $0x21] ss:$4 sm:$0xff] %v4727_v55  ;;  %v4961_v52 = vadd.f32 %v4841_v29, %v3604_v36 }
 0x416   : > { %4869 = vst [vmem:[#allocation1 + $0x22] ss:$4 sm:$0xff] %v4728_v57 }
 0x417   : > { %4870 = vst [vmem:[#allocation1 + $0x23] ss:$4 sm:$0xff] %v4729_v60 }
 0x418   : > { %4993 = vst [vmem:[%s7708_s8 + $0x80] sm:$0xff] %v4961_v52 }
 0x41a   : > { %v4871_v58 = vld.sshfl [vmem:[#allocation1] sm:$0xff pattern:$0x73625140] }
 0x41b   : > { %v4967_v11 = vadd.f32 %v4871_v58, %v3619_v63  ;;  %v3631_v39 = vpop.f32.mrf.mxu3 }
 0x41c   : > { %v3606_v0 = vpop.f32.mrf.mxu2 }
 0x41d   : > { %4999 = vst [vmem:[%s7708_s8 + $0xb0] sm:$0xff] %v4967_v11  ;;  %v4962_v4 = vadd.f32 %v4842_v35, %v3606_v0 }
 0x41e   : > { %v4872_v16 = vld.sshfl [vmem:[#allocation1 + $0x20] sm:$0xff pattern:$0x73625140] }
 0x41f   : > { %v4968_v3 = vadd.f32 %v4872_v16, %v3621_v2  ;;  %4994 = vst [vmem:[%s7708_s8 + $0x88] sm:$0xff] %v4962_v4 }
 0x421   : > { %5000 = vst [vmem:[%s7708_s8 + $0xb8] sm:$0xff] %v4968_v3 }
 0x430   : > { %v3574_v5 = vpop.f32.mrf.mxu0 }
 0x431   : > { %v4949_v7 = vadd.f32 %v7672_v40, %v3574_v5 }
 0x433   : > { %4981 = vst [vmem:[%s7708_s8 + $0x20] sm:$0xff] %v4949_v7 }
 0x438   : > { %v3576_v8 = vpop.f32.mrf.mxu0 }
 0x439   : > { %v4950_v14 = vadd.f32 %v7675_v44, %v3576_v8 }
 0x43b   : > { %4982 = vst [vmem:[%s7708_s8 + $0x28] sm:$0xff] %v4950_v14 }
 0x441   : > { %v4613_v10 = vpop.f32.mrf.mxu1 }
 0x442   : > { %v4668_v17 = vrot.slane %v4613_v10, 1  ;;  %v4669_v13 = vrot.slane %v4613_v10, 2  ;;  %v4670_v18 = vrot.slane %v4613_v10, 3  ;;  %v4671_v19 = vrot.slane %v4613_v10, 4 }
 0x443   : > { %v4672_v25 = vrot.slane %v4613_v10, 5  ;;  %v4673_v21 = vrot.slane %v4613_v10, 6  ;;  %v4730_v22 = vperm.slane %v4613_v10, 0  ;;  %v4674_v23 = vrot.slane %v4613_v10, 7 }
 0x444   : > { %v4731_v24 = vperm.slane %v4668_v17, 0  ;;  %v4732_v26 = vperm.slane %v4669_v13, 0  ;;  %v4733_v28 = vperm.slane %v4670_v18, 0  ;;  %v4734_v40 = vperm.slane %v4671_v19, 0 }
 0x445   : > { %4873 = vst [vmem:[#allocation1] ss:$4 sm:$0xff] %v4730_v22  ;;  %v4735_v29 = vperm.slane %v4672_v25, 0  ;;  %v4736_v44 = vperm.slane %v4673_v21, 0  ;;  %v4737_v31 = vperm.slane %v4674_v23, 0 }
 0x446   : > { %4874 = vst [vmem:[#allocation1 + $0x1] ss:$4 sm:$0xff] %v4731_v24 }
 0x447   : > { %4875 = vst [vmem:[#allocation1 + $0x2] ss:$4 sm:$0xff] %v4732_v26 }
 0x448   : > { %4876 = vst [vmem:[#allocation1 + $0x3] ss:$4 sm:$0xff] %v4733_v28 }
 0x449   : > { %4877 = vst [vmem:[#allocation1 + $0x20] ss:$4 sm:$0xff] %v4734_v40  ;;  %v4615_v38 = vpop.f32.mrf.mxu1 }
 0x44a   : > { %4878 = vst [vmem:[#allocation1 + $0x21] ss:$4 sm:$0xff] %v4735_v29  ;;  %v4675_v32 = vrot.slane %v4615_v38, 1  ;;  %v4676_v41 = vrot.slane %v4615_v38, 2  ;;  %v4677_v42 = vrot.slane %v4615_v38, 3  ;;  %v4738_v43 = vperm.slane %v4615_v38, 0 }
 0x44b   : > { %4879 = vst [vmem:[#allocation1 + $0x22] ss:$4 sm:$0xff] %v4736_v44  ;;  %v4678_v46 = vrot.slane %v4615_v38, 4  ;;  %v4679_v45 = vrot.slane %v4615_v38, 5  ;;  %v4680_v51 = vrot.slane %v4615_v38, 6  ;;  %v4681_v48 = vrot.slane %v4615_v38, 7 }
 0x44c   : > { %4880 = vst [vmem:[#allocation1 + $0x23] ss:$4 sm:$0xff] %v4737_v31  ;;  %v4739_v1 = vperm.slane %v4675_v32, 0  ;;  %v4740_v50 = vperm.slane %v4676_v41, 0  ;;  %v4741_v53 = vperm.slane %v4677_v42, 0 }
 0x44d   : > { %v4742_v55 = vperm.slane %v4678_v46, 0  ;;  %v4743_v59 = vperm.slane %v4679_v45, 0  ;;  %v4744_v63 = vperm.slane %v4680_v51, 0  ;;  %v4745_v52 = vperm.slane %v4681_v48, 0 }
 0x44f   : > { %v4881_v35 = vld.sshfl [vmem:[#allocation1] sm:$0xff pattern:$0x73625140] }
 0x450   : > { %v4969_v33 = vadd.f32 %v4881_v35, %v3624_v12  ;;  %4883 = vst [vmem:[#allocation1] ss:$4 sm:$0xff] %v4730_v22 }
 0x451   : > { %4884 = vst [vmem:[#allocation1 + $0x1] ss:$4 sm:$0xff] %v4731_v24 }
 0x452   : > { %5001 = vst [vmem:[%s7708_s8 + $0xc0] sm:$0xff] %v4969_v33 }
 0x453   : > { %v4882_v37 = vld.sshfl [vmem:[#allocation1 + $0x20] sm:$0xff pattern:$0x73625140]  ;;  %4885 = vst [vmem:[#allocation1 + $0x2] ss:$4 sm:$0xff] %v4732_v26 }
 0x454   : > { %v4970_v30 = vadd.f32 %v4882_v37, %v3626_v20  ;;  %4886 = vst [vmem:[#allocation1 + $0x3] ss:$4 sm:$0xff] %v4733_v28 }
 0x455   : > { %4887 = vst [vmem:[#allocation1 + $0x20] ss:$4 sm:$0xff] %v4734_v40 }
 0x456   : > { %5002 = vst [vmem:[%s7708_s8 + $0xc8] sm:$0xff] %v4970_v30 }
 0x457   : > { %4888 = vst [vmem:[#allocation1 + $0x21] ss:$4 sm:$0xff] %v4735_v29 }
 0x458   : > { %4889 = vst [vmem:[#allocation1 + $0x22] ss:$4 sm:$0xff] %v4736_v44 }
 0x459   : > { %4890 = vst [vmem:[#allocation1 + $0x23] ss:$4 sm:$0xff] %v4737_v31 }
 0x45b   : > { %v4891_v49 = vld.sshfl [vmem:[#allocation1] sm:$0xff pattern:$0x73625140] }
 0x45c   : > { %4893 = vst [vmem:[#allocation1] ss:$4 sm:$0xff] %v4738_v43  ;;  %v4971_v27 = vadd.f32 %v4891_v49, %v3629_v34 }
 0x45d   : > { %4894 = vst [vmem:[#allocation1 + $0x1] ss:$4 sm:$0xff] %v4739_v1 }
 0x45e   : > { %4895 = vst [vmem:[#allocation1 + $0x2] ss:$4 sm:$0xff] %v4740_v50  ;;  %v3634_v57 = vpop.f32.mrf.mxu3 }
 0x45f   : > { %4896 = vst [vmem:[#allocation1 + $0x3] ss:$4 sm:$0xff] %v4741_v53 }
 0x460   : > { %5003 = vst [vmem:[%s7708_s8 + $0xd0] sm:$0xff] %v4971_v27  ;;  %v4892_v60 = vld.sshfl [vmem:[#allocation1 + $0x20] sm:$0xff pattern:$0x73625140] }
 0x461   : > { %4897 = vst [vmem:[#allocation1 + $0x20] ss:$4 sm:$0xff] %v4742_v55  ;;  %v4972_v36 = vadd.f32 %v4892_v60, %v3631_v39 }
 0x462   : > { %4898 = vst [vmem:[#allocation1 + $0x21] ss:$4 sm:$0xff] %v4743_v59 }
 0x463   : > { %4899 = vst [vmem:[#allocation1 + $0x22] ss:$4 sm:$0xff] %v4744_v63 }
 0x464   : > { %4900 = vst [vmem:[#allocation1 + $0x23] ss:$4 sm:$0xff] %v4745_v52 }
 0x465   : > { %5004 = vst [vmem:[%s7708_s8 + $0xd8] sm:$0xff] %v4972_v36 }
 0x466   : > { %v4901_v58 = vld.sshfl [vmem:[#allocation1] sm:$0xff pattern:$0x73625140]  ;;  %v3579_v11 = vpop.f32.mrf.mxu0  ;;  %v3636_v4 = vpop.f32.mrf.mxu3 }
 0x467   : > { %v4973_v0 = vadd.f32 %v4901_v58, %v3634_v57  ;;  %4903 = vst [vmem:[#allocation1] ss:$4 sm:$0xff] %v4738_v43  ;;  %v4951_v16 = vadd.f32 %v7683_v56, %v3579_v11 }
 0x468   : > { %4904 = vst [vmem:[#allocation1 + $0x1] ss:$4 sm:$0xff] %v4739_v1 }
 0x469   : > { %v3609_v2 = vpop.f32.mrf.mxu2  ;;  %5005 = vst [vmem:[%s7708_s8 + $0xe0] sm:$0xff] %v4973_v0 }
 0x46a   : > { %v4963_v3 = vadd.f32 %v7743_v47, %v3609_v2  ;;  %4905 = vst [vmem:[#allocation1 + $0x2] ss:$4 sm:$0xff] %v4740_v50 }
 0x46b   : > { %4906 = vst [vmem:[#allocation1 + $0x3] ss:$4 sm:$0xff] %v4741_v53  ;;  %v4902_v5 = vld.sshfl [vmem:[#allocation1 + $0x20] sm:$0xff pattern:$0x73625140] }
 0x46c   : > { %4995 = vst [vmem:[%s7708_s8 + $0x90] sm:$0xff] %v4963_v3  ;;  %v4974_v7 = vadd.f32 %v4902_v5, %v3636_v4 }
 0x46d   : > { %4983 = vst [vmem:[%s7708_s8 + $0x30] sm:$0xff] %v4951_v16 }
 0x46e   : > { %5006 = vst [vmem:[%s7708_s8 + $0xe8] sm:$0xff] %v4974_v7  ;;  %v3581_v8 = vpop.f32.mrf.mxu0 }
 0x46f   : > { %4907 = vst [vmem:[#allocation1 + $0x20] ss:$4 sm:$0xff] %v4742_v55  ;;  %v4952_v12 = vadd.f32 %v7689_v6, %v3581_v8 }
 0x470   : > { %4908 = vst [vmem:[#allocation1 + $0x21] ss:$4 sm:$0xff] %v4743_v59 }
 0x471   : > { %v3611_v56 = vpop.f32.mrf.mxu2  ;;  %4909 = vst [vmem:[#allocation1 + $0x22] ss:$4 sm:$0xff] %v4744_v63 }
 0x472   : > { %v4964_v47 = vadd.f32 %v7746_v54, %v3611_v56  ;;  %4910 = vst [vmem:[#allocation1 + $0x23] ss:$4 sm:$0xff] %v4745_v52  ;;  %v4911_v10 = vld.sshfl [vmem:[#allocation1] sm:$0xff pattern:$0x73625140] }
 0x473   : > { %4984 = vst [vmem:[%s7708_s8 + $0x38] sm:$0xff] %v4952_v12  ;;  %v3639_v14 = vpop.f32.mrf.mxu3 }
 0x474   : > { %4996 = vst [vmem:[%s7708_s8 + $0x98] sm:$0xff] %v4964_v47  ;;  %v4975_v17 = vadd.f32 %v4911_v10, %v3639_v14 }
 0x476   : > { %5007 = vst [vmem:[%s7708_s8 + $0xf0] sm:$0xff] %v4975_v17  ;;  %v3584_v13 = vpop.f32.mrf.mxu0 }
 0x477   : > { %v4953_v18 = vadd.f32 %v7693_v9, %v3584_v13 }
 0x479   : > { %v3614_v6 = vpop.f32.mrf.mxu2  ;;  %4985 = vst [vmem:[%s7708_s8 + $0x40] sm:$0xff] %v4953_v18  ;;  %v4912_v20 = vld.sshfl [vmem:[#allocation1 + $0x20] sm:$0xff pattern:$0x73625140] }
 0x47a   : > { %v4965_v19 = vadd.f32 %v7750_v61, %v3614_v6 }
 0x47b   : > { %v3641_v54 = vpop.f32.mrf.mxu3 }
 0x47c   : > { %4997 = vst [vmem:[%s7708_s8 + $0xa0] sm:$0xff] %v4965_v19  ;;  %v4976_v25 = vadd.f32 %v4912_v20, %v3641_v54 }
 0x47e   : > { %5008 = vst [vmem:[%s7708_s8 + $0xf8] sm:$0xff] %v4976_v25  ;;  %v3586_v21 = vpop.f32.mrf.mxu0 }
 0x47f   : > { %v4954_v9 = vadd.f32 %v7697_v15, %v3586_v21 }
 0x481   : > { %v3616_v22 = vpop.f32.mrf.mxu2  ;;  %4986 = vst [vmem:[%s7708_s8 + $0x48] sm:$0xff] %v4954_v9 }
 0x482   : > { %v4966_v61 = vadd.f32 %v7752_v62, %v3616_v22 }
 0x484   : > { %4998 = vst [vmem:[%s7708_s8 + $0xa8] sm:$0xff] %v4966_v61 }
 0x485   : > { %5747 = shalt.err (!%p5744_p3)
}
 0x486   : > { %s5792_s5 = smov 128  }
 0x487   : > { %5671 = dma.vmem_to_hbm [thread:$0]  (%p5856_p5), %s5023_s22, 4096, %s5025_s23, %s5010_s19, %s5792_s5, %s5792_s5, %s5785_s7  }
 0x488 PF: > { %p5677_p4 = scmp.ge.s32.totalorder %s5782_s18, 2  ;;  %s5039_s6 = sand.u32 1, %s5770_s15  }
 0x489   : > { %s5040_s8 = scalar_lea.sflag [#allocation5], %s5039_s6 }
 0x48a   : > { %p5674_p7 = pnand %p5677_p4, %p5860_p6 }
 0x48c   : > { %p5675_p8 = pneg %p5674_p7 }
 0x48e   : > { %5765 = dma.done.wait (%p5675_p8), %s5040_s8, 4096  }
 0x48f   : > { %5767 = vsyncadd (%p5675_p8), %s5040_s8, 4294963200  ;;  %p14_p9 = scmp.ge.s32.totalorder %s5843_s21, 4   ;;  %s7832_s15 = smov %s5774_s16 }
 0x490   : > { %s7833_s16 = smov %s5778_s17  ;;  %s7834_s17 = smov %s5854_s24 }
 0x491   : > { %s7835_s18 = smov %s5843_s21  ;;  %16 = sbr.rel (!%p14_p9) target bundleno = 3 (0x3), region = 85 }
 0x496   :  { %5046 = vsyncpa [#allocation5], 1 }
 0x497   :  { %5048 = vsyncpa [#allocation5 + $0x1], 1 }

</bundles_post_ra>
